<compile_context>
chip_gen: v7x
topology: tpu7x:2x2x1
jax: 0.10.0
libtpu: 0.0.40
codegen_flags: <defaults>
</compile_context>

<pallas_src>
import functools

import jax
import jax.numpy as jnp
from jax.experimental import pallas as pl
from jax.experimental.pallas import tpu as pltpu

# (pad, C_in, C_out, K) for the 5 conv layers of sgn_branch_network
CONV_CFG = [
    ((4, 5), 1, 30, 10),
    ((3, 4), 30, 30, 8),
    ((2, 3), 30, 40, 6),
    ((2, 2), 40, 50, 5),
    ((2, 2), 50, 50, 5),
]
CPAD = 128        # lane-dense channel padding inside the fused conv kernel
BN_CONV_MAX = 8   # samples per conv grid step (batch-blocking)
BN_DENSE = 256    # dense-head batch tile
MAX_TK_DENSE = 2048


def _pick_dense_tk(D):
    """Multiple of 128 minimizing zero-row padding of w1; tie-break larger."""
    best_tk, best_pad = 128, (-D) % 128
    for tk in range(128, MAX_TK_DENSE + 1, 128):
        pad = (-D) % tk
        if pad < best_pad or (pad == best_pad and tk > best_tk):
            best_tk, best_pad = tk, pad
    return best_tk


def _pick_conv_bn(N):
    for cand in range(min(N, BN_CONV_MAX), 0, -1):
        if N % cand == 0:
            return cand
    return 1


# ----------------------------- fused conv stack ---------------------------- #
def _conv_stack_kernel(xp_ref, w1_ref, b1_ref, w2_ref, b2_ref, w3_ref, b3_ref,
                       w4_ref, b4_ref, w5_ref, b5_ref, o_ref, buf_a, buf_b,
                       *, L, bn):
    """bn samples per grid step; all intermediates stay in VMEM (bf16)."""
    M = bn * L

    def conv_layer(buf, w_ref, b_ref, K):
        # y[(b,l), :] = relu(b + sum_k buf[b, l + k, :] @ W_k)     (bn*L, 128)
        acc = jnp.dot(buf[:, 0:L, :].reshape(M, CPAD), w_ref[0],
                      preferred_element_type=jnp.float32)
        for k in range(1, K):
            acc = acc + jnp.dot(buf[:, k:k + L, :].reshape(M, CPAD), w_ref[k],
                                preferred_element_type=jnp.float32)
        return jnp.maximum(acc + b_ref[...], 0.0)

    def stage(buf, y, pad_left):
        # Write activation at the next layer's left-pad offset; zero the pad
        # rows (ConstantPad1d semantics).  Buffers are bf16.
        tail = buf.shape[1] - pad_left - L
        buf[:, 0:pad_left, :] = jnp.zeros((bn, pad_left, CPAD), jnp.bfloat16)
        buf[:, pad_left:pad_left + L, :] = (
            y.reshape(bn, L, CPAD).astype(jnp.bfloat16))
        buf[:, pad_left + L:, :] = jnp.zeros((bn, tail, CPAD), jnp.bfloat16)

    # layer 1 : im2col precomputed in the wrapper -> single (M,10)@(10,128)
    y = jnp.dot(xp_ref[...].reshape(M, 10), w1_ref[...],
                preferred_element_type=jnp.float32)
    y = jnp.maximum(y + b1_ref[...], 0.0)                         # (M, 128)

    stage(buf_a, y, 3); y = conv_layer(buf_a, w2_ref, b2_ref, 8)  # pad (3,4)
    stage(buf_b, y, 2); y = conv_layer(buf_b, w3_ref, b3_ref, 6)  # pad (2,3)
    stage(buf_a, y, 2); y = conv_layer(buf_a, w4_ref, b4_ref, 5)  # pad (2,2)
    stage(buf_b, y, 2); y = conv_layer(buf_b, w5_ref, b5_ref, 5)  # pad (2,2)

    # drop channel pad, emit bf16
    o_ref[...] = y[:, :50].reshape(bn, L, 50).astype(jnp.bfloat16)


def conv_stack(x_ncl, prep, L):
    """x_ncl: (N, 1, L) -> (N, L, 50) bfloat16."""
    N = x_ncl.shape[0]
    x = x_ncl[:, 0, :].astype(jnp.float32)                 # (N, L)
    xpad = jnp.pad(x, ((0, 0), (4, 5)))                    # ConstantPad1d((4,5))
    # Tiny host-side im2col for layer 1 (C_in = 1, K = 10): (N, L, 10) bf16
    patches = jnp.stack([xpad[:, k:k + L] for k in range(10)],
                        axis=-1).astype(jnp.bfloat16)

    bn = _pick_conv_bn(N)
    ws = prep["conv_w_stacks"]      # bf16: [(8,128,128),(6,...),(5,...),(5,...)]
    bs = prep["conv_b"]             # f32:  5 x (1, 128)

    kernel = functools.partial(_conv_stack_kernel, L=L, bn=bn)
    return pl.pallas_call(
        kernel,
        out_shape=jax.ShapeDtypeStruct((N, L, 50), jnp.bfloat16),
        grid=(N // bn,),
        in_specs=[
            pl.BlockSpec((bn, L, 10), lambda n: (n, 0, 0)),         # patches
            pl.BlockSpec((10, CPAD), lambda n: (0, 0)),             # w1 (flat)
            pl.BlockSpec((1, CPAD), lambda n: (0, 0)),              # b1
            pl.BlockSpec((8, CPAD, CPAD), lambda n: (0, 0, 0)),     # w2 stack
            pl.BlockSpec((1, CPAD), lambda n: (0, 0)),              # b2
            pl.BlockSpec((6, CPAD, CPAD), lambda n: (0, 0, 0)),     # w3 stack
            pl.BlockSpec((1, CPAD), lambda n: (0, 0)),              # b3
            pl.BlockSpec((5, CPAD, CPAD), lambda n: (0, 0, 0)),     # w4 stack
            pl.BlockSpec((1, CPAD), lambda n: (0, 0)),              # b4
            pl.BlockSpec((5, CPAD, CPAD), lambda n: (0, 0, 0)),     # w5 stack
            pl.BlockSpec((1, CPAD), lambda n: (0, 0)),              # b5
        ],
        out_specs=pl.BlockSpec((bn, L, 50), lambda n: (n, 0, 0)),
        scratch_shapes=[pltpu.VMEM((bn, L + 8, CPAD), jnp.bfloat16),
                        pltpu.VMEM((bn, L + 8, CPAD), jnp.bfloat16)],
        compiler_params=pltpu.CompilerParams(
            dimension_semantics=("parallel",),
            vmem_limit_bytes=32 * 1024 * 1024),
    )(patches, prep["conv_w1"], bs[0], ws[0], bs[1], ws[1], bs[2],
      ws[2], bs[3], ws[3], bs[4])


# -------------------------------- dense head ------------------------------- #
def _dense_kernel(x_ref, w1_ref, b1_ref, w2_ref, b2_ref, o_ref, acc_ref):
    k = pl.program_id(1)

    @pl.when(k == 0)
    def _():
        acc_ref[...] = jnp.zeros_like(acc_ref)

    acc_ref[...] += jnp.dot(x_ref[...], w1_ref[...],
                            preferred_element_type=jnp.float32)

    @pl.when(k == pl.num_programs(1) - 1)
    def _():
        h = jnp.maximum(acc_ref[...] + b1_ref[...], 0.0)
        o_ref[...] = (jnp.dot(h.astype(jnp.bfloat16), w2_ref[...],
                              preferred_element_type=jnp.float32) + b2_ref[...])


def dense_head(x_flat, w1_bf16, b1, w2_bf16, b2, tk):
    """x_flat: (N, D_pad) bf16; w1: (D_pad, 1024) bf16; w2: (1024, A) bf16."""
    N, D_pad = x_flat.shape
    H = w1_bf16.shape[1]
    A = w2_bf16.shape[1]
    assert D_pad % tk == 0

    # Robust batch tiling: pad the batch to a multiple of the tile if needed.
    if N <= BN_DENSE:
        bn, n_pad = N, 0
    else:
        bn = BN_DENSE
        n_pad = (-N) % bn
        if n_pad:
            x_flat = jnp.pad(x_flat, ((0, n_pad), (0, 0)))
    N_tot = N + n_pad
    grid = (N_tot // bn, D_pad // tk)     # reduction axis (D) last

    out = pl.pallas_call(
        _dense_kernel,
        out_shape=jax.ShapeDtypeStruct((N_tot, A), jnp.float32),
        grid=grid,
        in_specs=[
            pl.BlockSpec((bn, tk), lambda i, k: (i, k)),   # x (bf16)
            pl.BlockSpec((tk, H), lambda i, k: (k, 0)),    # w1 (streamed, bf16)
            pl.BlockSpec((1, H), lambda i, k: (0, 0)),     # b1
            pl.BlockSpec((H, A), lambda i, k: (0, 0)),     # w2 (resident, bf16)
            pl.BlockSpec((1, A), lambda i, k: (0, 0)),     # b2
        ],
        out_specs=pl.BlockSpec((bn, A), lambda i, k: (i, 0)),
        scratch_shapes=[pltpu.VMEM((bn, H), jnp.float32)],
        compiler_params=pltpu.CompilerParams(
            dimension_semantics=("parallel", "arbitrary"),
            vmem_limit_bytes=32 * 1024 * 1024),
    )(x_flat, w1_bf16, b1, w2_bf16, b2)
    return out[:N] if n_pad else out


# ------------------------------ params + forward --------------------------- #
def init_params(key, mains_length, appliance_length):
    """Raw parameters in PyTorch-like layout: conv (C_out, C_in, K), dense (D, H)."""
    conv_ws, conv_bs = [], []
    for (pad, cin, cout, k) in CONV_CFG:
        key, k1, k2 = jax.random.split(key, 3)
        conv_ws.append(jax.random.normal(k1, (cout, cin, k), jnp.float32) * 0.1)
        conv_bs.append(jax.random.normal(k2, (cout,), jnp.float32) * 0.1)
    D = 50 * mains_length
    key, k1, k2, k3, k4 = jax.random.split(key, 5)
    w1 = jax.random.normal(k1, (D, 1024), jnp.float32) * 0.02    # rows: c*L + l (torch order)
    b1 = jax.random.normal(k2, (1024,), jnp.float32) * 0.02
    w2 = jax.random.normal(k3, (1024, appliance_length), jnp.float32) * 0.02
    b2 = jax.random.normal(k4, (appliance_length,), jnp.float32) * 0.02
    return conv_ws, conv_bs, (w1, b1, w2, b2)


def prepare_params(raw_params, mains_length):
    """One-time re-layout of the torch-style params into kernel-friendly layout."""
    conv_ws, conv_bs, (w1, b1, w2, b2) = raw_params
    L = mains_length

    # layer 1: (30, 1, 10) -> (10, 128)  [rows = kernel tap, cols = C_out padded]
    w1c = jnp.pad(jnp.transpose(conv_ws[0][:, 0, :]),
                  ((0, 0), (0, CPAD - 30))).astype(jnp.bfloat16)

    # layers 2..5: (C_out, C_in, K) -> (K, 128, 128) zero-padded channel dims
    conv_w_stacks = []
    for w in conv_ws[1:]:
        cout, cin, _ = w.shape
        wk = jnp.transpose(w, (2, 1, 0))                          # (K, C_in, C_out)
        wk = jnp.pad(wk, ((0, 0), (0, CPAD - cin), (0, CPAD - cout)))
        conv_w_stacks.append(wk.astype(jnp.bfloat16))
    conv_b = [jnp.pad(b, (0, CPAD - b.shape[0])).reshape(1, CPAD).astype(jnp.float32)
              for b in conv_bs]

    # dense: permute w1 rows  (c*L + l)  ->  (l*50 + c)  so the conv output can
    # be consumed in its natural (N, L, 50) order (no activation transpose).
    D = 50 * L
    H = w1.shape[1]
    A = w2.shape[1]
    w1p = w1.reshape(50, L, H).transpose(1, 0, 2).reshape(D, H)
    tk = _pick_dense_tk(D)
    D_pad = pl.cdiv(D, tk) * tk
    if D_pad != D:
        w1p = jnp.pad(w1p, ((0, D_pad - D), (0, 0)))              # zero rows: no effect
    return dict(
        conv_w1=w1c,
        conv_w_stacks=conv_w_stacks,
        conv_b=conv_b,
        w1=w1p.astype(jnp.bfloat16),
        b1=b1.reshape(1, H).astype(jnp.float32),
        w2=w2.astype(jnp.bfloat16),
        b2=b2.reshape(1, A).astype(jnp.float32),
    )


def sgn_branch_forward(x_ncl, prep, mains_length, appliance_length):
    """x_ncl: (N, 1, mains_length) -> (N, appliance_length) float32."""
    L = mains_length
    conv_out = conv_stack(x_ncl, prep, L)                 # (N, L, 50) bf16
    N = conv_out.shape[0]
    x_flat = conv_out.reshape(N, 50 * L)                  # feature index = l*50 + c
    D = 50 * L
    tk = _pick_dense_tk(D)                                # static (L is static)
    D_pad = prep["w1"].shape[0]
    if D_pad != D:
        x_flat = jnp.pad(x_flat, ((0, 0), (0, D_pad - D)))
    return dense_head(x_flat, prep["w1"], prep["b1"], prep["w2"], prep["b2"], tk)


# ------------------------------ pure-JAX reference ------------------------- #
def _reference_forward(x_ncl, raw_params, mains_length, appliance_length):
    conv_ws, conv_bs, (w1, b1, w2, b2) = raw_params
    x = x_ncl.astype(jnp.float32)
    for (pad, _, _, _), w, b in zip(CONV_CFG, conv_ws, conv_bs):
        xp = jnp.pad(x, ((0, 0), (0, 0), (pad[0], pad[1])))
        y = jax.lax.conv_general_dilated(
            xp, w, window_strides=(1,), padding="VALID",
            dimension_numbers=("NCH", "OIH", "NCH"))
        x = jnp.maximum(y + b[None, :, None], 0.0)
    N = x.shape[0]
    xf = x.reshape(N, 50 * mains_length)                  # torch .view(-1, 50*L)
    w1r = w1.astype(jnp.bfloat16).astype(jnp.float32)     # match kernel's bf16 weights
    w2r = w2.astype(jnp.bfloat16).astype(jnp.float32)
    h = jnp.maximum(xf @ w1r + b1, 0.0)
    return h @ w2r + b2


if __name__ == "__main__":
    mains_length = 16
    appliance_length = 8
    batch = 2

    key = jax.random.PRNGKey(0)
    key, xkey = jax.random.split(key)
    x = jax.random.normal(xkey, (batch, 1, mains_length), jnp.float32)

    raw = init_params(key, mains_length, appliance_length)
    prep = prepare_params(raw, mains_length)

    fwd = jax.jit(functools.partial(sgn_branch_forward,
                                    mains_length=mains_length,
                                    appliance_length=appliance_length))
    out = fwd(x, prep)
    jax.block_until_ready(out)

    assert out.shape == (batch, appliance_length)
    ref = _reference_forward(x, raw, mains_length, appliance_length)
    assert jnp.allclose(out, ref, atol=3e-2, rtol=3e-2), \
        float(jnp.max(jnp.abs(out - ref)))
    print("KERNEL_OK")
</pallas_src>

<mosaic_0001>
module attributes {stable_mosaic.version = 11 : i64} {
  func.func @_dense_kernel(%arg0: i32, %arg1: i32, %arg2: memref<2x896xbf16, #tpu.memory_space<vmem>>, %arg3: memref<896x1024xbf16, #tpu.memory_space<vmem>>, %arg4: memref<1x1024xf32, #tpu.memory_space<vmem>>, %arg5: memref<1024x8xbf16, #tpu.memory_space<vmem>>, %arg6: memref<1x8xf32, #tpu.memory_space<vmem>>, %arg7: memref<2x8xf32, #tpu.memory_space<vmem>>, %arg8: memref<2x1024xf32, #tpu.memory_space<vmem>>) attributes {dimension_semantics = [#tpu.dimension_semantics<parallel>, #tpu.dimension_semantics<arbitrary>], iteration_bounds = array<i64: 1, 1>, scalar_prefetch = 0 : i64, scratch_operands = 1 : i64, tpu.core_type = #tpu.core_type<tc>, window_params = [{transform_indices = @transform_0, window_bounds = array<i64: 2, 896>}, {transform_indices = @transform_1, window_bounds = array<i64: 896, 1024>}, {pipeline_mode = #tpu.pipeline_mode<synchronous>, transform_indices = @transform_2, window_bounds = array<i64: 1, 1024>}, {pipeline_mode = #tpu.pipeline_mode<synchronous>, transform_indices = @transform_3, window_bounds = array<i64: 1024, 8>}, {pipeline_mode = #tpu.pipeline_mode<synchronous>, transform_indices = @transform_4, window_bounds = array<i64: 1, 8>}, {transform_indices = @transform_5, window_bounds = array<i64: 2, 8>}]} {
    %c0_i32 = arith.constant 0 : i32
    %0 = arith.cmpi eq, %arg1, %c0_i32 : i32
    %1 = arith.extui %0 : i1 to i32
    %c0_i32_0 = arith.constant 0 : i32
    %2 = arith.cmpi ne, %1, %c0_i32_0 : i32
    scf.if %2 {
      %cst_10 = arith.constant 0.000000e+00 : f32
      %12 = vector.broadcast %cst_10 : f32 to vector<2x1024xf32>
      %c0_11 = arith.constant 0 : index
      %c0_12 = arith.constant 0 : index
      %13 = vector.load %arg8[%c0_11, %c0_12] : memref<2x1024xf32, #tpu.memory_space<vmem>>, vector<2x1024xf32>
      tpu.vector_store %arg8[%c0_11, %c0_12], %12 {strides = array<i32>} : memref<2x1024xf32, #tpu.memory_space<vmem>>, vector<2x1024xf32>,
    } else {
    }
    %c0 = arith.constant 0 : index
    %c0_1 = arith.constant 0 : index
    %3 = vector.load %arg8[%c0, %c0_1] : memref<2x1024xf32, #tpu.memory_space<vmem>>, vector<2x1024xf32>
    %c0_2 = arith.constant 0 : index
    %c0_3 = arith.constant 0 : index
    %4 = vector.load %arg2[%c0_2, %c0_3] : memref<2x896xbf16, #tpu.memory_space<vmem>>, vector<2x896xbf16>
    %c0_4 = arith.constant 0 : index
    %c0_5 = arith.constant 0 : index
    %5 = vector.load %arg3[%c0_4, %c0_5] : memref<896x1024xbf16, #tpu.memory_space<vmem>>, vector<896x1024xbf16>
    %cst = arith.constant dense<0.000000e+00> : vector<2x1024xf32>
    %6 = tpu.matmul %4, %5, %cst {dimension_numbers = #tpu.dot_dimension_numbers<[1], [0], [0], [1], [0, 0, 1, 1], [], []>} : vector<2x896xbf16>, vector<896x1024xbf16>, vector<2x1024xf32> -> vector<2x1024xf32>
    %7 = arith.addf %3, %6 : vector<2x1024xf32>
    %c0_6 = arith.constant 0 : index
    %c0_7 = arith.constant 0 : index
    %8 = vector.load %arg8[%c0_6, %c0_7] : memref<2x1024xf32, #tpu.memory_space<vmem>>, vector<2x1024xf32>
    tpu.vector_store %arg8[%c0_6, %c0_7], %7 {strides = array<i32>} : memref<2x1024xf32, #tpu.memory_space<vmem>>, vector<2x1024xf32>,
    %c0_i32_8 = arith.constant 0 : i32
    %9 = arith.cmpi eq, %arg1, %c0_i32_8 : i32
    %10 = arith.extui %9 : i1 to i32
    %c0_i32_9 = arith.constant 0 : i32
    %11 = arith.cmpi ne, %10, %c0_i32_9 : i32
    scf.if %11 {
      %c0_10 = arith.constant 0 : index
      %c0_11 = arith.constant 0 : index
      %12 = vector.load %arg8[%c0_10, %c0_11] : memref<2x1024xf32, #tpu.memory_space<vmem>>, vector<2x1024xf32>
      %c0_12 = arith.constant 0 : index
      %c0_13 = arith.constant 0 : index
      %13 = vector.load %arg4[%c0_12, %c0_13] : memref<1x1024xf32, #tpu.memory_space<vmem>>, vector<1x1024xf32>
      %14 = vector.broadcast %13 : vector<1x1024xf32> to vector<2x1024xf32>
      %15 = arith.addf %12, %14 : vector<2x1024xf32>
      %cst_14 = arith.constant 0.000000e+00 : f32
      %16 = vector.broadcast %cst_14 : f32 to vector<2x1024xf32>
      %17 = arith.maximumf %15, %16 : vector<2x1024xf32>
      %18 = arith.truncf %17 : vector<2x1024xf32> to vector<2x1024xbf16>
      %c0_15 = arith.constant 0 : index
      %c0_16 = arith.constant 0 : index
      %19 = vector.load %arg5[%c0_15, %c0_16] : memref<1024x8xbf16, #tpu.memory_space<vmem>>, vector<1024x8xbf16>
      %cst_17 = arith.constant dense<0.000000e+00> : vector<2x8xf32>
      %20 = tpu.matmul %18, %19, %cst_17 {dimension_numbers = #tpu.dot_dimension_numbers<[1], [0], [0], [1], [0, 0, 1, 1], [], []>} : vector<2x1024xbf16>, vector<1024x8xbf16>, vector<2x8xf32> -> vector<2x8xf32>
      %c0_18 = arith.constant 0 : index
      %c0_19 = arith.constant 0 : index
      %21 = vector.load %arg6[%c0_18, %c0_19] : memref<1x8xf32, #tpu.memory_space<vmem>>, vector<1x8xf32>
      %22 = vector.broadcast %21 : vector<1x8xf32> to vector<2x8xf32>
      %23 = arith.addf %20, %22 : vector<2x8xf32>
      %c0_20 = arith.constant 0 : index
      %c0_21 = arith.constant 0 : index
      %24 = vector.load %arg7[%c0_20, %c0_21] : memref<2x8xf32, #tpu.memory_space<vmem>>, vector<2x8xf32>
      tpu.vector_store %arg7[%c0_20, %c0_21], %23 {strides = array<i32>} : memref<2x8xf32, #tpu.memory_space<vmem>>, vector<2x8xf32>,
    } else {
    }
    return
  }
  func.func @transform_0(%arg0: i32, %arg1: i32) -> (i32, i32) {
    %c0_i32 = arith.constant 0 : i32
    return %arg0, %arg1 : i32, i32
  }
  func.func @transform_1(%arg0: i32, %arg1: i32) -> (i32, i32) {
    %c0_i32 = arith.constant 0 : i32
    %c0_i32_0 = arith.constant 0 : i32
    return %arg1, %c0_i32 : i32, i32
  }
  func.func @transform_2(%arg0: i32, %arg1: i32) -> (i32, i32) {
    %c0_i32 = arith.constant 0 : i32
    %c0_i32_0 = arith.constant 0 : i32
    %c0_i32_1 = arith.constant 0 : i32
    return %c0_i32, %c0_i32_0 : i32, i32
  }
  func.func @transform_3(%arg0: i32, %arg1: i32) -> (i32, i32) {
    %c0_i32 = arith.constant 0 : i32
    %c0_i32_0 = arith.constant 0 : i32
    %c0_i32_1 = arith.constant 0 : i32
    return %c0_i32, %c0_i32_0 : i32, i32
  }
  func.func @transform_4(%arg0: i32, %arg1: i32) -> (i32, i32) {
    %c0_i32 = arith.constant 0 : i32
    %c0_i32_0 = arith.constant 0 : i32
    %c0_i32_1 = arith.constant 0 : i32
    return %c0_i32, %c0_i32_0 : i32, i32
  }
  func.func @transform_5(%arg0: i32, %arg1: i32) -> (i32, i32) {
    %c0_i32 = arith.constant 0 : i32
    %c0_i32_0 = arith.constant 0 : i32
    return %arg0, %c0_i32 : i32, i32
  }
}

module attributes {stable_mosaic.version = 11 : i64} {
  func.func @_conv_stack_kernel(%arg0: i32, %arg1: memref<2x16x10xbf16, #tpu.memory_space<vmem>>, %arg2: memref<10x128xbf16, #tpu.memory_space<vmem>>, %arg3: memref<1x128xf32, #tpu.memory_space<vmem>>, %arg4: memref<8x128x128xbf16, #tpu.memory_space<vmem>>, %arg5: memref<1x128xf32, #tpu.memory_space<vmem>>, %arg6: memref<6x128x128xbf16, #tpu.memory_space<vmem>>, %arg7: memref<1x128xf32, #tpu.memory_space<vmem>>, %arg8: memref<5x128x128xbf16, #tpu.memory_space<vmem>>, %arg9: memref<1x128xf32, #tpu.memory_space<vmem>>, %arg10: memref<5x128x128xbf16, #tpu.memory_space<vmem>>, %arg11: memref<1x128xf32, #tpu.memory_space<vmem>>, %arg12: memref<2x16x50xbf16, #tpu.memory_space<vmem>>, %arg13: memref<2x24x128xbf16, #tpu.memory_space<vmem>>, %arg14: memref<2x24x128xbf16, #tpu.memory_space<vmem>>) attributes {dimension_semantics = [#tpu.dimension_semantics<parallel>], iteration_bounds = array<i64: 1>, scalar_prefetch = 0 : i64, scratch_operands = 2 : i64, tpu.core_type = #tpu.core_type<tc>, window_params = [{transform_indices = @transform_0, window_bounds = array<i64: 2, 16, 10>}, {pipeline_mode = #tpu.pipeline_mode<synchronous>, transform_indices = @transform_1, window_bounds = array<i64: 10, 128>}, {pipeline_mode = #tpu.pipeline_mode<synchronous>, transform_indices = @transform_2, window_bounds = array<i64: 1, 128>}, {pipeline_mode = #tpu.pipeline_mode<synchronous>, transform_indices = @transform_3, window_bounds = array<i64: 8, 128, 128>}, {pipeline_mode = #tpu.pipeline_mode<synchronous>, transform_indices = @transform_4, window_bounds = array<i64: 1, 128>}, {pipeline_mode = #tpu.pipeline_mode<synchronous>, transform_indices = @transform_5, window_bounds = array<i64: 6, 128, 128>}, {pipeline_mode = #tpu.pipeline_mode<synchronous>, transform_indices = @transform_6, window_bounds = array<i64: 1, 128>}, {pipeline_mode = #tpu.pipeline_mode<synchronous>, transform_indices = @transform_7, window_bounds = array<i64: 5, 128, 128>}, {pipeline_mode = #tpu.pipeline_mode<synchronous>, transform_indices = @transform_8, window_bounds = array<i64: 1, 128>}, {pipeline_mode = #tpu.pipeline_mode<synchronous>, transform_indices = @transform_9, window_bounds = array<i64: 5, 128, 128>}, {pipeline_mode = #tpu.pipeline_mode<synchronous>, transform_indices = @transform_10, window_bounds = array<i64: 1, 128>}, {transform_indices = @transform_11, window_bounds = array<i64: 2, 16, 50>}]} {
    %c0 = arith.constant 0 : index
    %c0_0 = arith.constant 0 : index
    %c0_1 = arith.constant 0 : index
    %0 = vector.load %arg1[%c0, %c0_0, %c0_1] : memref<2x16x10xbf16, #tpu.memory_space<vmem>>, vector<2x16x10xbf16>
    %1 = vector.shape_cast %0 : vector<2x16x10xbf16> to vector<32x10xbf16>
    %c0_2 = arith.constant 0 : index
    %c0_3 = arith.constant 0 : index
    %2 = vector.load %arg2[%c0_2, %c0_3] : memref<10x128xbf16, #tpu.memory_space<vmem>>, vector<10x128xbf16>
    %cst = arith.constant dense<0.000000e+00> : vector<32x128xf32>
    %3 = tpu.matmul %1, %2, %cst {dimension_numbers = #tpu.dot_dimension_numbers<[1], [0], [0], [1], [0, 0, 1, 1], [], []>} : vector<32x10xbf16>, vector<10x128xbf16>, vector<32x128xf32> -> vector<32x128xf32>
    %c0_4 = arith.constant 0 : index
    %c0_5 = arith.constant 0 : index
    %4 = vector.load %arg3[%c0_4, %c0_5] : memref<1x128xf32, #tpu.memory_space<vmem>>, vector<1x128xf32>
    %5 = vector.broadcast %4 : vector<1x128xf32> to vector<32x128xf32>
    %6 = arith.addf %3, %5 : vector<32x128xf32>
    %cst_6 = arith.constant 0.000000e+00 : f32
    %7 = vector.broadcast %cst_6 : f32 to vector<32x128xf32>
    %8 = arith.maximumf %6, %7 : vector<32x128xf32>
    %cst_7 = arith.constant 0.000000e+00 : bf16
    %9 = vector.broadcast %cst_7 : bf16 to vector<2x3x128xbf16>
    %c0_8 = arith.constant 0 : index
    %c0_9 = arith.constant 0 : index
    %c0_10 = arith.constant 0 : index
    %10 = vector.load %arg13[%c0_8, %c0_9, %c0_10] : memref<2x24x128xbf16, #tpu.memory_space<vmem>>, vector<2x3x128xbf16>
    tpu.vector_store %arg13[%c0_8, %c0_9, %c0_10], %9 {strides = array<i32>} : memref<2x24x128xbf16, #tpu.memory_space<vmem>>, vector<2x3x128xbf16>,
    %11 = vector.shape_cast %8 : vector<32x128xf32> to vector<2x16x128xf32>
    %12 = arith.truncf %11 : vector<2x16x128xf32> to vector<2x16x128xbf16>
    %c0_11 = arith.constant 0 : index
    %c3 = arith.constant 3 : index
    %c0_12 = arith.constant 0 : index
    %13 = vector.load %arg13[%c0_11, %c3, %c0_12] : memref<2x24x128xbf16, #tpu.memory_space<vmem>>, vector<2x16x128xbf16>
    tpu.vector_store %arg13[%c0_11, %c3, %c0_12], %12 {strides = array<i32>} : memref<2x24x128xbf16, #tpu.memory_space<vmem>>, vector<2x16x128xbf16>,
    %cst_13 = arith.constant 0.000000e+00 : bf16
    %14 = vector.broadcast %cst_13 : bf16 to vector<2x5x128xbf16>
    %c0_14 = arith.constant 0 : index
    %c19 = arith.constant 19 : index
    %c0_15 = arith.constant 0 : index
    %15 = vector.load %arg13[%c0_14, %c19, %c0_15] : memref<2x24x128xbf16, #tpu.memory_space<vmem>>, vector<2x5x128xbf16>
    tpu.vector_store %arg13[%c0_14, %c19, %c0_15], %14 {strides = array<i32>} : memref<2x24x128xbf16, #tpu.memory_space<vmem>>, vector<2x5x128xbf16>,
    %c0_16 = arith.constant 0 : index
    %c0_17 = arith.constant 0 : index
    %c0_18 = arith.constant 0 : index
    %16 = vector.load %arg13[%c0_16, %c0_17, %c0_18] : memref<2x24x128xbf16, #tpu.memory_space<vmem>>, vector<2x16x128xbf16>
    %17 = vector.shape_cast %16 : vector<2x16x128xbf16> to vector<32x128xbf16>
    %c0_19 = arith.constant 0 : index
    %c0_20 = arith.constant 0 : index
    %c0_21 = arith.constant 0 : index
    %18 = vector.load %arg4[%c0_19, %c0_20, %c0_21] : memref<8x128x128xbf16, #tpu.memory_space<vmem>>, vector<1x128x128xbf16>
    %19 = vector.shape_cast %18 : vector<1x128x128xbf16> to vector<128x128xbf16>
    %cst_22 = arith.constant dense<0.000000e+00> : vector<32x128xf32>
    %20 = tpu.matmul %17, %19, %cst_22 {dimension_numbers = #tpu.dot_dimension_numbers<[1], [0], [0], [1], [0, 0, 1, 1], [], []>} : vector<32x128xbf16>, vector<128x128xbf16>, vector<32x128xf32> -> vector<32x128xf32>
    %c0_23 = arith.constant 0 : index
    %c1 = arith.constant 1 : index
    %c0_24 = arith.constant 0 : index
    %21 = vector.load %arg13[%c0_23, %c1, %c0_24] : memref<2x24x128xbf16, #tpu.memory_space<vmem>>, vector<2x16x128xbf16>
    %22 = vector.shape_cast %21 : vector<2x16x128xbf16> to vector<32x128xbf16>
    %c1_25 = arith.constant 1 : index
    %c0_26 = arith.constant 0 : index
    %c0_27 = arith.constant 0 : index
    %23 = vector.load %arg4[%c1_25, %c0_26, %c0_27] : memref<8x128x128xbf16, #tpu.memory_space<vmem>>, vector<1x128x128xbf16>
    %24 = vector.shape_cast %23 : vector<1x128x128xbf16> to vector<128x128xbf16>
    %cst_28 = arith.constant dense<0.000000e+00> : vector<32x128xf32>
    %25 = tpu.matmul %22, %24, %cst_28 {dimension_numbers = #tpu.dot_dimension_numbers<[1], [0], [0], [1], [0, 0, 1, 1], [], []>} : vector<32x128xbf16>, vector<128x128xbf16>, vector<32x128xf32> -> vector<32x128xf32>
    %26 = arith.addf %20, %25 : vector<32x128xf32>
    %c0_29 = arith.constant 0 : index
    %c2 = arith.constant 2 : index
    %c0_30 = arith.constant 0 : index
    %27 = vector.load %arg13[%c0_29, %c2, %c0_30] : memref<2x24x128xbf16, #tpu.memory_space<vmem>>, vector<2x16x128xbf16>
    %28 = vector.shape_cast %27 : vector<2x16x128xbf16> to vector<32x128xbf16>
    %c2_31 = arith.constant 2 : index
    %c0_32 = arith.constant 0 : index
    %c0_33 = arith.constant 0 : index
    %29 = vector.load %arg4[%c2_31, %c0_32, %c0_33] : memref<8x128x128xbf16, #tpu.memory_space<vmem>>, vector<1x128x128xbf16>
    %30 = vector.shape_cast %29 : vector<1x128x128xbf16> to vector<128x128xbf16>
    %cst_34 = arith.constant dense<0.000000e+00> : vector<32x128xf32>
    %31 = tpu.matmul %28, %30, %cst_34 {dimension_numbers = #tpu.dot_dimension_numbers<[1], [0], [0], [1], [0, 0, 1, 1], [], []>} : vector<32x128xbf16>, vector<128x128xbf16>, vector<32x128xf32> -> vector<32x128xf32>
    %32 = arith.addf %26, %31 : vector<32x128xf32>
    %c0_35 = arith.constant 0 : index
    %c3_36 = arith.constant 3 : index
    %c0_37 = arith.constant 0 : index
    %33 = vector.load %arg13[%c0_35, %c3_36, %c0_37] : memref<2x24x128xbf16, #tpu.memory_space<vmem>>, vector<2x16x128xbf16>
    %34 = vector.shape_cast %33 : vector<2x16x128xbf16> to vector<32x128xbf16>
    %c3_38 = arith.constant 3 : index
    %c0_39 = arith.constant 0 : index
    %c0_40 = arith.constant 0 : index
    %35 = vector.load %arg4[%c3_38, %c0_39, %c0_40] : memref<8x128x128xbf16, #tpu.memory_space<vmem>>, vector<1x128x128xbf16>
    %36 = vector.shape_cast %35 : vector<1x128x128xbf16> to vector<128x128xbf16>
    %cst_41 = arith.constant dense<0.000000e+00> : vector<32x128xf32>
    %37 = tpu.matmul %34, %36, %cst_41 {dimension_numbers = #tpu.dot_dimension_numbers<[1], [0], [0], [1], [0, 0, 1, 1], [], []>} : vector<32x128xbf16>, vector<128x128xbf16>, vector<32x128xf32> -> vector<32x128xf32>
    %38 = arith.addf %32, %37 : vector<32x128xf32>
    %c0_42 = arith.constant 0 : index
    %c4 = arith.constant 4 : index
    %c0_43 = arith.constant 0 : index
    %39 = vector.load %arg13[%c0_42, %c4, %c0_43] : memref<2x24x128xbf16, #tpu.memory_space<vmem>>, vector<2x16x128xbf16>
    %40 = vector.shape_cast %39 : vector<2x16x128xbf16> to vector<32x128xbf16>
    %c4_44 = arith.constant 4 : index
    %c0_45 = arith.constant 0 : index
    %c0_46 = arith.constant 0 : index
    %41 = vector.load %arg4[%c4_44, %c0_45, %c0_46] : memref<8x128x128xbf16, #tpu.memory_space<vmem>>, vector<1x128x128xbf16>
    %42 = vector.shape_cast %41 : vector<1x128x128xbf16> to vector<128x128xbf16>
    %cst_47 = arith.constant dense<0.000000e+00> : vector<32x128xf32>
    %43 = tpu.matmul %40, %42, %cst_47 {dimension_numbers = #tpu.dot_dimension_numbers<[1], [0], [0], [1], [0, 0, 1, 1], [], []>} : vector<32x128xbf16>, vector<128x128xbf16>, vector<32x128xf32> -> vector<32x128xf32>
    %44 = arith.addf %38, %43 : vector<32x128xf32>
    %c0_48 = arith.constant 0 : index
    %c5 = arith.constant 5 : index
    %c0_49 = arith.constant 0 : index
    %45 = vector.load %arg13[%c0_48, %c5, %c0_49] : memref<2x24x128xbf16, #tpu.memory_space<vmem>>, vector<2x16x128xbf16>
    %46 = vector.shape_cast %45 : vector<2x16x128xbf16> to vector<32x128xbf16>
    %c5_50 = arith.constant 5 : index
    %c0_51 = arith.constant 0 : index
    %c0_52 = arith.constant 0 : index
    %47 = vector.load %arg4[%c5_50, %c0_51, %c0_52] : memref<8x128x128xbf16, #tpu.memory_space<vmem>>, vector<1x128x128xbf16>
    %48 = vector.shape_cast %47 : vector<1x128x128xbf16> to vector<128x128xbf16>
    %cst_53 = arith.constant dense<0.000000e+00> : vector<32x128xf32>
    %49 = tpu.matmul %46, %48, %cst_53 {dimension_numbers = #tpu.dot_dimension_numbers<[1], [0], [0], [1], [0, 0, 1, 1], [], []>} : vector<32x128xbf16>, vector<128x128xbf16>, vector<32x128xf32> -> vector<32x128xf32>
    %50 = arith.addf %44, %49 : vector<32x128xf32>
    %c0_54 = arith.constant 0 : index
    %c6 = arith.constant 6 : index
    %c0_55 = arith.constant 0 : index
    %51 = vector.load %arg13[%c0_54, %c6, %c0_55] : memref<2x24x128xbf16, #tpu.memory_space<vmem>>, vector<2x16x128xbf16>
    %52 = vector.shape_cast %51 : vector<2x16x128xbf16> to vector<32x128xbf16>
    %c6_56 = arith.constant 6 : index
    %c0_57 = arith.constant 0 : index
    %c0_58 = arith.constant 0 : index
    %53 = vector.load %arg4[%c6_56, %c0_57, %c0_58] : memref<8x128x128xbf16, #tpu.memory_space<vmem>>, vector<1x128x128xbf16>
    %54 = vector.shape_cast %53 : vector<1x128x128xbf16> to vector<128x128xbf16>
    %cst_59 = arith.constant dense<0.000000e+00> : vector<32x128xf32>
    %55 = tpu.matmul %52, %54, %cst_59 {dimension_numbers = #tpu.dot_dimension_numbers<[1], [0], [0], [1], [0, 0, 1, 1], [], []>} : vector<32x128xbf16>, vector<128x128xbf16>, vector<32x128xf32> -> vector<32x128xf32>
    %56 = arith.addf %50, %55 : vector<32x128xf32>
    %c0_60 = arith.constant 0 : index
    %c7 = arith.constant 7 : index
    %c0_61 = arith.constant 0 : index
    %57 = vector.load %arg13[%c0_60, %c7, %c0_61] : memref<2x24x128xbf16, #tpu.memory_space<vmem>>, vector<2x16x128xbf16>
    %58 = vector.shape_cast %57 : vector<2x16x128xbf16> to vector<32x128xbf16>
    %c7_62 = arith.constant 7 : index
    %c0_63 = arith.constant 0 : index
    %c0_64 = arith.constant 0 : index
    %59 = vector.load %arg4[%c7_62, %c0_63, %c0_64] : memref<8x128x128xbf16, #tpu.memory_space<vmem>>, vector<1x128x128xbf16>
    %60 = vector.shape_cast %59 : vector<1x128x128xbf16> to vector<128x128xbf16>
    %cst_65 = arith.constant dense<0.000000e+00> : vector<32x128xf32>
    %61 = tpu.matmul %58, %60, %cst_65 {dimension_numbers = #tpu.dot_dimension_numbers<[1], [0], [0], [1], [0, 0, 1, 1], [], []>} : vector<32x128xbf16>, vector<128x128xbf16>, vector<32x128xf32> -> vector<32x128xf32>
    %62 = arith.addf %56, %61 : vector<32x128xf32>
    %c0_66 = arith.constant 0 : index
    %c0_67 = arith.constant 0 : index
    %63 = vector.load %arg5[%c0_66, %c0_67] : memref<1x128xf32, #tpu.memory_space<vmem>>, vector<1x128xf32>
    %64 = vector.broadcast %63 : vector<1x128xf32> to vector<32x128xf32>
    %65 = arith.addf %62, %64 : vector<32x128xf32>
    %cst_68 = arith.constant 0.000000e+00 : f32
    %66 = vector.broadcast %cst_68 : f32 to vector<32x128xf32>
    %67 = arith.maximumf %65, %66 : vector<32x128xf32>
    %cst_69 = arith.constant 0.000000e+00 : bf16
    %68 = vector.broadcast %cst_69 : bf16 to vector<2x2x128xbf16>
    %c0_70 = arith.constant 0 : index
    %c0_71 = arith.constant 0 : index
    %c0_72 = arith.constant 0 : index
    %69 = vector.load %arg14[%c0_70, %c0_71, %c0_72] : memref<2x24x128xbf16, #tpu.memory_space<vmem>>, vector<2x2x128xbf16>
    tpu.vector_store %arg14[%c0_70, %c0_71, %c0_72], %68 {strides = array<i32>} : memref<2x24x128xbf16, #tpu.memory_space<vmem>>, vector<2x2x128xbf16>,
    %70 = vector.shape_cast %67 : vector<32x128xf32> to vector<2x16x128xf32>
    %71 = arith.truncf %70 : vector<2x16x128xf32> to vector<2x16x128xbf16>
    %c0_73 = arith.constant 0 : index
    %c2_74 = arith.constant 2 : index
    %c0_75 = arith.constant 0 : index
    %72 = vector.load %arg14[%c0_73, %c2_74, %c0_75] : memref<2x24x128xbf16, #tpu.memory_space<vmem>>, vector<2x16x128xbf16>
    tpu.vector_store %arg14[%c0_73, %c2_74, %c0_75], %71 {strides = array<i32>} : memref<2x24x128xbf16, #tpu.memory_space<vmem>>, vector<2x16x128xbf16>,
    %cst_76 = arith.constant 0.000000e+00 : bf16
    %73 = vector.broadcast %cst_76 : bf16 to vector<2x6x128xbf16>
    %c0_77 = arith.constant 0 : index
    %c18 = arith.constant 18 : index
    %c0_78 = arith.constant 0 : index
    %74 = vector.load %arg14[%c0_77, %c18, %c0_78] : memref<2x24x128xbf16, #tpu.memory_space<vmem>>, vector<2x6x128xbf16>
    tpu.vector_store %arg14[%c0_77, %c18, %c0_78], %73 {strides = array<i32>} : memref<2x24x128xbf16, #tpu.memory_space<vmem>>, vector<2x6x128xbf16>,
    %c0_79 = arith.constant 0 : index
    %c0_80 = arith.constant 0 : index
    %c0_81 = arith.constant 0 : index
    %75 = vector.load %arg14[%c0_79, %c0_80, %c0_81] : memref<2x24x128xbf16, #tpu.memory_space<vmem>>, vector<2x16x128xbf16>
    %76 = vector.shape_cast %75 : vector<2x16x128xbf16> to vector<32x128xbf16>
    %c0_82 = arith.constant 0 : index
    %c0_83 = arith.constant 0 : index
    %c0_84 = arith.constant 0 : index
    %77 = vector.load %arg6[%c0_82, %c0_83, %c0_84] : memref<6x128x128xbf16, #tpu.memory_space<vmem>>, vector<1x128x128xbf16>
    %78 = vector.shape_cast %77 : vector<1x128x128xbf16> to vector<128x128xbf16>
    %cst_85 = arith.constant dense<0.000000e+00> : vector<32x128xf32>
    %79 = tpu.matmul %76, %78, %cst_85 {dimension_numbers = #tpu.dot_dimension_numbers<[1], [0], [0], [1], [0, 0, 1, 1], [], []>} : vector<32x128xbf16>, vector<128x128xbf16>, vector<32x128xf32> -> vector<32x128xf32>
    %c0_86 = arith.constant 0 : index
    %c1_87 = arith.constant 1 : index
    %c0_88 = arith.constant 0 : index
    %80 = vector.load %arg14[%c0_86, %c1_87, %c0_88] : memref<2x24x128xbf16, #tpu.memory_space<vmem>>, vector<2x16x128xbf16>
    %81 = vector.shape_cast %80 : vector<2x16x128xbf16> to vector<32x128xbf16>
    %c1_89 = arith.constant 1 : index
    %c0_90 = arith.constant 0 : index
    %c0_91 = arith.constant 0 : index
    %82 = vector.load %arg6[%c1_89, %c0_90, %c0_91] : memref<6x128x128xbf16, #tpu.memory_space<vmem>>, vector<1x128x128xbf16>
    %83 = vector.shape_cast %82 : vector<1x128x128xbf16> to vector<128x128xbf16>
    %cst_92 = arith.constant dense<0.000000e+00> : vector<32x128xf32>
    %84 = tpu.matmul %81, %83, %cst_92 {dimension_numbers = #tpu.dot_dimension_numbers<[1], [0], [0], [1], [0, 0, 1, 1], [], []>} : vector<32x128xbf16>, vector<128x128xbf16>, vector<32x128xf32> -> vector<32x128xf32>
    %85 = arith.addf %79, %84 : vector<32x128xf32>
    %c0_93 = arith.constant 0 : index
    %c2_94 = arith.constant 2 : index
    %c0_95 = arith.constant 0 : index
    %86 = vector.load %arg14[%c0_93, %c2_94, %c0_95] : memref<2x24x128xbf16, #tpu.memory_space<vmem>>, vector<2x16x128xbf16>
    %87 = vector.shape_cast %86 : vector<2x16x128xbf16> to vector<32x128xbf16>
    %c2_96 = arith.constant 2 : index
    %c0_97 = arith.constant 0 : index
    %c0_98 = arith.constant 0 : index
    %88 = vector.load %arg6[%c2_96, %c0_97, %c0_98] : memref<6x128x128xbf16, #tpu.memory_space<vmem>>, vector<1x128x128xbf16>
    %89 = vector.shape_cast %88 : vector<1x128x128xbf16> to vector<128x128xbf16>
    %cst_99 = arith.constant dense<0.000000e+00> : vector<32x128xf32>
    %90 = tpu.matmul %87, %89, %cst_99 {dimension_numbers = #tpu.dot_dimension_numbers<[1], [0], [0], [1], [0, 0, 1, 1], [], []>} : vector<32x128xbf16>, vector<128x128xbf16>, vector<32x128xf32> -> vector<32x128xf32>
    %91 = arith.addf %85, %90 : vector<32x128xf32>
    %c0_100 = arith.constant 0 : index
    %c3_101 = arith.constant 3 : index
    %c0_102 = arith.constant 0 : index
    %92 = vector.load %arg14[%c0_100, %c3_101, %c0_102] : memref<2x24x128xbf16, #tpu.memory_space<vmem>>, vector<2x16x128xbf16>
    %93 = vector.shape_cast %92 : vector<2x16x128xbf16> to vector<32x128xbf16>
    %c3_103 = arith.constant 3 : index
    %c0_104 = arith.constant 0 : index
    %c0_105 = arith.constant 0 : index
    %94 = vector.load %arg6[%c3_103, %c0_104, %c0_105] : memref<6x128x128xbf16, #tpu.memory_space<vmem>>, vector<1x128x128xbf16>
    %95 = vector.shape_cast %94 : vector<1x128x128xbf16> to vector<128x128xbf16>
    %cst_106 = arith.constant dense<0.000000e+00> : vector<32x128xf32>
    %96 = tpu.matmul %93, %95, %cst_106 {dimension_numbers = #tpu.dot_dimension_numbers<[1], [0], [0], [1], [0, 0, 1, 1], [], []>} : vector<32x128xbf16>, vector<128x128xbf16>, vector<32x128xf32> -> vector<32x128xf32>
    %97 = arith.addf %91, %96 : vector<32x128xf32>
    %c0_107 = arith.constant 0 : index
    %c4_108 = arith.constant 4 : index
    %c0_109 = arith.constant 0 : index
    %98 = vector.load %arg14[%c0_107, %c4_108, %c0_109] : memref<2x24x128xbf16, #tpu.memory_space<vmem>>, vector<2x16x128xbf16>
    %99 = vector.shape_cast %98 : vector<2x16x128xbf16> to vector<32x128xbf16>
    %c4_110 = arith.constant 4 : index
    %c0_111 = arith.constant 0 : index
    %c0_112 = arith.constant 0 : index
    %100 = vector.load %arg6[%c4_110, %c0_111, %c0_112] : memref<6x128x128xbf16, #tpu.memory_space<vmem>>, vector<1x128x128xbf16>
    %101 = vector.shape_cast %100 : vector<1x128x128xbf16> to vector<128x128xbf16>
    %cst_113 = arith.constant dense<0.000000e+00> : vector<32x128xf32>
    %102 = tpu.matmul %99, %101, %cst_113 {dimension_numbers = #tpu.dot_dimension_numbers<[1], [0], [0], [1], [0, 0, 1, 1], [], []>} : vector<32x128xbf16>, vector<128x128xbf16>, vector<32x128xf32> -> vector<32x128xf32>
    %103 = arith.addf %97, %102 : vector<32x128xf32>
    %c0_114 = arith.constant 0 : index
    %c5_115 = arith.constant 5 : index
    %c0_116 = arith.constant 0 : index
    %104 = vector.load %arg14[%c0_114, %c5_115, %c0_116] : memref<2x24x128xbf16, #tpu.memory_space<vmem>>, vector<2x16x128xbf16>
    %105 = vector.shape_cast %104 : vector<2x16x128xbf16> to vector<32x128xbf16>
    %c5_117 = arith.constant 5 : index
    %c0_118 = arith.constant 0 : index
    %c0_119 = arith.constant 0 : index
    %106 = vector.load %arg6[%c5_117, %c0_118, %c0_119] : memref<6x128x128xbf16, #tpu.memory_space<vmem>>, vector<1x128x128xbf16>
    %107 = vector.shape_cast %106 : vector<1x128x128xbf16> to vector<128x128xbf16>
    %cst_120 = arith.constant dense<0.000000e+00> : vector<32x128xf32>
    %108 = tpu.matmul %105, %107, %cst_120 {dimension_numbers = #tpu.dot_dimension_numbers<[1], [0], [0], [1], [0, 0, 1, 1], [], []>} : vector<32x128xbf16>, vector<128x128xbf16>, vector<32x128xf32> -> vector<32x128xf32>
    %109 = arith.addf %103, %108 : vector<32x128xf32>
    %c0_121 = arith.constant 0 : index
    %c0_122 = arith.constant 0 : index
    %110 = vector.load %arg7[%c0_121, %c0_122] : memref<1x128xf32, #tpu.memory_space<vmem>>, vector<1x128xf32>
    %111 = vector.broadcast %110 : vector<1x128xf32> to vector<32x128xf32>
    %112 = arith.addf %109, %111 : vector<32x128xf32>
    %cst_123 = arith.constant 0.000000e+00 : f32
    %113 = vector.broadcast %cst_123 : f32 to vector<32x128xf32>
    %114 = arith.maximumf %112, %113 : vector<32x128xf32>
    %cst_124 = arith.constant 0.000000e+00 : bf16
    %115 = vector.broadcast %cst_124 : bf16 to vector<2x2x128xbf16>
    %c0_125 = arith.constant 0 : index
    %c0_126 = arith.constant 0 : index
    %c0_127 = arith.constant 0 : index
    %116 = vector.load %arg13[%c0_125, %c0_126, %c0_127] : memref<2x24x128xbf16, #tpu.memory_space<vmem>>, vector<2x2x128xbf16>
    tpu.vector_store %arg13[%c0_125, %c0_126, %c0_127], %115 {strides = array<i32>} : memref<2x24x128xbf16, #tpu.memory_space<vmem>>, vector<2x2x128xbf16>,
    %117 = vector.shape_cast %114 : vector<32x128xf32> to vector<2x16x128xf32>
    %118 = arith.truncf %117 : vector<2x16x128xf32> to vector<2x16x128xbf16>
    %c0_128 = arith.constant 0 : index
    %c2_129 = arith.constant 2 : index
    %c0_130 = arith.constant 0 : index
    %119 = vector.load %arg13[%c0_128, %c2_129, %c0_130] : memref<2x24x128xbf16, #tpu.memory_space<vmem>>, vector<2x16x128xbf16>
    tpu.vector_store %arg13[%c0_128, %c2_129, %c0_130], %118 {strides = array<i32>} : memref<2x24x128xbf16, #tpu.memory_space<vmem>>, vector<2x16x128xbf16>,
    %cst_131 = arith.constant 0.000000e+00 : bf16
    %120 = vector.broadcast %cst_131 : bf16 to vector<2x6x128xbf16>
    %c0_132 = arith.constant 0 : index
    %c18_133 = arith.constant 18 : index
    %c0_134 = arith.constant 0 : index
    %121 = vector.load %arg13[%c0_132, %c18_133, %c0_134] : memref<2x24x128xbf16, #tpu.memory_space<vmem>>, vector<2x6x128xbf16>
    tpu.vector_store %arg13[%c0_132, %c18_133, %c0_134], %120 {strides = array<i32>} : memref<2x24x128xbf16, #tpu.memory_space<vmem>>, vector<2x6x128xbf16>,
    %c0_135 = arith.constant 0 : index
    %c0_136 = arith.constant 0 : index
    %c0_137 = arith.constant 0 : index
    %122 = vector.load %arg13[%c0_135, %c0_136, %c0_137] : memref<2x24x128xbf16, #tpu.memory_space<vmem>>, vector<2x16x128xbf16>
    %123 = vector.shape_cast %122 : vector<2x16x128xbf16> to vector<32x128xbf16>
    %c0_138 = arith.constant 0 : index
    %c0_139 = arith.constant 0 : index
    %c0_140 = arith.constant 0 : index
    %124 = vector.load %arg8[%c0_138, %c0_139, %c0_140] : memref<5x128x128xbf16, #tpu.memory_space<vmem>>, vector<1x128x128xbf16>
    %125 = vector.shape_cast %124 : vector<1x128x128xbf16> to vector<128x128xbf16>
    %cst_141 = arith.constant dense<0.000000e+00> : vector<32x128xf32>
    %126 = tpu.matmul %123, %125, %cst_141 {dimension_numbers = #tpu.dot_dimension_numbers<[1], [0], [0], [1], [0, 0, 1, 1], [], []>} : vector<32x128xbf16>, vector<128x128xbf16>, vector<32x128xf32> -> vector<32x128xf32>
    %c0_142 = arith.constant 0 : index
    %c1_143 = arith.constant 1 : index
    %c0_144 = arith.constant 0 : index
    %127 = vector.load %arg13[%c0_142, %c1_143, %c0_144] : memref<2x24x128xbf16, #tpu.memory_space<vmem>>, vector<2x16x128xbf16>
    %128 = vector.shape_cast %127 : vector<2x16x128xbf16> to vector<32x128xbf16>
    %c1_145 = arith.constant 1 : index
    %c0_146 = arith.constant 0 : index
    %c0_147 = arith.constant 0 : index
    %129 = vector.load %arg8[%c1_145, %c0_146, %c0_147] : memref<5x128x128xbf16, #tpu.memory_space<vmem>>, vector<1x128x128xbf16>
    %130 = vector.shape_cast %129 : vector<1x128x128xbf16> to vector<128x128xbf16>
    %cst_148 = arith.constant dense<0.000000e+00> : vector<32x128xf32>
    %131 = tpu.matmul %128, %130, %cst_148 {dimension_numbers = #tpu.dot_dimension_numbers<[1], [0], [0], [1], [0, 0, 1, 1], [], []>} : vector<32x128xbf16>, vector<128x128xbf16>, vector<32x128xf32> -> vector<32x128xf32>
    %132 = arith.addf %126, %131 : vector<32x128xf32>
    %c0_149 = arith.constant 0 : index
    %c2_150 = arith.constant 2 : index
    %c0_151 = arith.constant 0 : index
    %133 = vector.load %arg13[%c0_149, %c2_150, %c0_151] : memref<2x24x128xbf16, #tpu.memory_space<vmem>>, vector<2x16x128xbf16>
    %134 = vector.shape_cast %133 : vector<2x16x128xbf16> to vector<32x128xbf16>
    %c2_152 = arith.constant 2 : index
    %c0_153 = arith.constant 0 : index
    %c0_154 = arith.constant 0 : index
    %135 = vector.load %arg8[%c2_152, %c0_153, %c0_154] : memref<5x128x128xbf16, #tpu.memory_space<vmem>>, vector<1x128x128xbf16>
    %136 = vector.shape_cast %135 : vector<1x128x128xbf16> to vector<128x128xbf16>
    %cst_155 = arith.constant dense<0.000000e+00> : vector<32x128xf32>
    %137 = tpu.matmul %134, %136, %cst_155 {dimension_numbers = #tpu.dot_dimension_numbers<[1], [0], [0], [1], [0, 0, 1, 1], [], []>} : vector<32x128xbf16>, vector<128x128xbf16>, vector<32x128xf32> -> vector<32x128xf32>
    %138 = arith.addf %132, %137 : vector<32x128xf32>
    %c0_156 = arith.constant 0 : index
    %c3_157 = arith.constant 3 : index
    %c0_158 = arith.constant 0 : index
    %139 = vector.load %arg13[%c0_156, %c3_157, %c0_158] : memref<2x24x128xbf16, #tpu.memory_space<vmem>>, vector<2x16x128xbf16>
    %140 = vector.shape_cast %139 : vector<2x16x128xbf16> to vector<32x128xbf16>
    %c3_159 = arith.constant 3 : index
    %c0_160 = arith.constant 0 : index
    %c0_161 = arith.constant 0 : index
    %141 = vector.load %arg8[%c3_159, %c0_160, %c0_161] : memref<5x128x128xbf16, #tpu.memory_space<vmem>>, vector<1x128x128xbf16>
    %142 = vector.shape_cast %141 : vector<1x128x128xbf16> to vector<128x128xbf16>
    %cst_162 = arith.constant dense<0.000000e+00> : vector<32x128xf32>
    %143 = tpu.matmul %140, %142, %cst_162 {dimension_numbers = #tpu.dot_dimension_numbers<[1], [0], [0], [1], [0, 0, 1, 1], [], []>} : vector<32x128xbf16>, vector<128x128xbf16>, vector<32x128xf32> -> vector<32x128xf32>
    %144 = arith.addf %138, %143 : vector<32x128xf32>
    %c0_163 = arith.constant 0 : index
    %c4_164 = arith.constant 4 : index
    %c0_165 = arith.constant 0 : index
    %145 = vector.load %arg13[%c0_163, %c4_164, %c0_165] : memref<2x24x128xbf16, #tpu.memory_space<vmem>>, vector<2x16x128xbf16>
    %146 = vector.shape_cast %145 : vector<2x16x128xbf16> to vector<32x128xbf16>
    %c4_166 = arith.constant 4 : index
    %c0_167 = arith.constant 0 : index
    %c0_168 = arith.constant 0 : index
    %147 = vector.load %arg8[%c4_166, %c0_167, %c0_168] : memref<5x128x128xbf16, #tpu.memory_space<vmem>>, vector<1x128x128xbf16>
    %148 = vector.shape_cast %147 : vector<1x128x128xbf16> to vector<128x128xbf16>
    %cst_169 = arith.constant dense<0.000000e+00> : vector<32x128xf32>
    %149 = tpu.matmul %146, %148, %cst_169 {dimension_numbers = #tpu.dot_dimension_numbers<[1], [0], [0], [1], [0, 0, 1, 1], [], []>} : vector<32x128xbf16>, vector<128x128xbf16>, vector<32x128xf32> -> vector<32x128xf32>
    %150 = arith.addf %144, %149 : vector<32x128xf32>
    %c0_170 = arith.constant 0 : index
    %c0_171 = arith.constant 0 : index
    %151 = vector.load %arg9[%c0_170, %c0_171] : memref<1x128xf32, #tpu.memory_space<vmem>>, vector<1x128xf32>
    %152 = vector.broadcast %151 : vector<1x128xf32> to vector<32x128xf32>
    %153 = arith.addf %150, %152 : vector<32x128xf32>
    %cst_172 = arith.constant 0.000000e+00 : f32
    %154 = vector.broadcast %cst_172 : f32 to vector<32x128xf32>
    %155 = arith.maximumf %153, %154 : vector<32x128xf32>
    %cst_173 = arith.constant 0.000000e+00 : bf16
    %156 = vector.broadcast %cst_173 : bf16 to vector<2x2x128xbf16>
    %c0_174 = arith.constant 0 : index
    %c0_175 = arith.constant 0 : index
    %c0_176 = arith.constant 0 : index
    %157 = vector.load %arg14[%c0_174, %c0_175, %c0_176] : memref<2x24x128xbf16, #tpu.memory_space<vmem>>, vector<2x2x128xbf16>
    tpu.vector_store %arg14[%c0_174, %c0_175, %c0_176], %156 {strides = array<i32>} : memref<2x24x128xbf16, #tpu.memory_space<vmem>>, vector<2x2x128xbf16>,
    %158 = vector.shape_cast %155 : vector<32x128xf32> to vector<2x16x128xf32>
    %159 = arith.truncf %158 : vector<2x16x128xf32> to vector<2x16x128xbf16>
    %c0_177 = arith.constant 0 : index
    %c2_178 = arith.constant 2 : index
    %c0_179 = arith.constant 0 : index
    %160 = vector.load %arg14[%c0_177, %c2_178, %c0_179] : memref<2x24x128xbf16, #tpu.memory_space<vmem>>, vector<2x16x128xbf16>
    tpu.vector_store %arg14[%c0_177, %c2_178, %c0_179], %159 {strides = array<i32>} : memref<2x24x128xbf16, #tpu.memory_space<vmem>>, vector<2x16x128xbf16>,
    %cst_180 = arith.constant 0.000000e+00 : bf16
    %161 = vector.broadcast %cst_180 : bf16 to vector<2x6x128xbf16>
    %c0_181 = arith.constant 0 : index
    %c18_182 = arith.constant 18 : index
    %c0_183 = arith.constant 0 : index
    %162 = vector.load %arg14[%c0_181, %c18_182, %c0_183] : memref<2x24x128xbf16, #tpu.memory_space<vmem>>, vector<2x6x128xbf16>
    tpu.vector_store %arg14[%c0_181, %c18_182, %c0_183], %161 {strides = array<i32>} : memref<2x24x128xbf16, #tpu.memory_space<vmem>>, vector<2x6x128xbf16>,
    %c0_184 = arith.constant 0 : index
    %c0_185 = arith.constant 0 : index
    %c0_186 = arith.constant 0 : index
    %163 = vector.load %arg14[%c0_184, %c0_185, %c0_186] : memref<2x24x128xbf16, #tpu.memory_space<vmem>>, vector<2x16x128xbf16>
    %164 = vector.shape_cast %163 : vector<2x16x128xbf16> to vector<32x128xbf16>
    %c0_187 = arith.constant 0 : index
    %c0_188 = arith.constant 0 : index
    %c0_189 = arith.constant 0 : index
    %165 = vector.load %arg10[%c0_187, %c0_188, %c0_189] : memref<5x128x128xbf16, #tpu.memory_space<vmem>>, vector<1x128x128xbf16>
    %166 = vector.shape_cast %165 : vector<1x128x128xbf16> to vector<128x128xbf16>
    %cst_190 = arith.constant dense<0.000000e+00> : vector<32x128xf32>
    %167 = tpu.matmul %164, %166, %cst_190 {dimension_numbers = #tpu.dot_dimension_numbers<[1], [0], [0], [1], [0, 0, 1, 1], [], []>} : vector<32x128xbf16>, vector<128x128xbf16>, vector<32x128xf32> -> vector<32x128xf32>
    %c0_191 = arith.constant 0 : index
    %c1_192 = arith.constant 1 : index
    %c0_193 = arith.constant 0 : index
    %168 = vector.load %arg14[%c0_191, %c1_192, %c0_193] : memref<2x24x128xbf16, #tpu.memory_space<vmem>>, vector<2x16x128xbf16>
    %169 = vector.shape_cast %168 : vector<2x16x128xbf16> to vector<32x128xbf16>
    %c1_194 = arith.constant 1 : index
    %c0_195 = arith.constant 0 : index
    %c0_196 = arith.constant 0 : index
    %170 = vector.load %arg10[%c1_194, %c0_195, %c0_196] : memref<5x128x128xbf16, #tpu.memory_space<vmem>>, vector<1x128x128xbf16>
    %171 = vector.shape_cast %170 : vector<1x128x128xbf16> to vector<128x128xbf16>
    %cst_197 = arith.constant dense<0.000000e+00> : vector<32x128xf32>
    %172 = tpu.matmul %169, %171, %cst_197 {dimension_numbers = #tpu.dot_dimension_numbers<[1], [0], [0], [1], [0, 0, 1, 1], [], []>} : vector<32x128xbf16>, vector<128x128xbf16>, vector<32x128xf32> -> vector<32x128xf32>
    %173 = arith.addf %167, %172 : vector<32x128xf32>
    %c0_198 = arith.constant 0 : index
    %c2_199 = arith.constant 2 : index
    %c0_200 = arith.constant 0 : index
    %174 = vector.load %arg14[%c0_198, %c2_199, %c0_200] : memref<2x24x128xbf16, #tpu.memory_space<vmem>>, vector<2x16x128xbf16>
    %175 = vector.shape_cast %174 : vector<2x16x128xbf16> to vector<32x128xbf16>
    %c2_201 = arith.constant 2 : index
    %c0_202 = arith.constant 0 : index
    %c0_203 = arith.constant 0 : index
    %176 = vector.load %arg10[%c2_201, %c0_202, %c0_203] : memref<5x128x128xbf16, #tpu.memory_space<vmem>>, vector<1x128x128xbf16>
    %177 = vector.shape_cast %176 : vector<1x128x128xbf16> to vector<128x128xbf16>
    %cst_204 = arith.constant dense<0.000000e+00> : vector<32x128xf32>
    %178 = tpu.matmul %175, %177, %cst_204 {dimension_numbers = #tpu.dot_dimension_numbers<[1], [0], [0], [1], [0, 0, 1, 1], [], []>} : vector<32x128xbf16>, vector<128x128xbf16>, vector<32x128xf32> -> vector<32x128xf32>
    %179 = arith.addf %173, %178 : vector<32x128xf32>
    %c0_205 = arith.constant 0 : index
    %c3_206 = arith.constant 3 : index
    %c0_207 = arith.constant 0 : index
    %180 = vector.load %arg14[%c0_205, %c3_206, %c0_207] : memref<2x24x128xbf16, #tpu.memory_space<vmem>>, vector<2x16x128xbf16>
    %181 = vector.shape_cast %180 : vector<2x16x128xbf16> to vector<32x128xbf16>
    %c3_208 = arith.constant 3 : index
    %c0_209 = arith.constant 0 : index
    %c0_210 = arith.constant 0 : index
    %182 = vector.load %arg10[%c3_208, %c0_209, %c0_210] : memref<5x128x128xbf16, #tpu.memory_space<vmem>>, vector<1x128x128xbf16>
    %183 = vector.shape_cast %182 : vector<1x128x128xbf16> to vector<128x128xbf16>
    %cst_211 = arith.constant dense<0.000000e+00> : vector<32x128xf32>
    %184 = tpu.matmul %181, %183, %cst_211 {dimension_numbers = #tpu.dot_dimension_numbers<[1], [0], [0], [1], [0, 0, 1, 1], [], []>} : vector<32x128xbf16>, vector<128x128xbf16>, vector<32x128xf32> -> vector<32x128xf32>
    %185 = arith.addf %179, %184 : vector<32x128xf32>
    %c0_212 = arith.constant 0 : index
    %c4_213 = arith.constant 4 : index
    %c0_214 = arith.constant 0 : index
    %186 = vector.load %arg14[%c0_212, %c4_213, %c0_214] : memref<2x24x128xbf16, #tpu.memory_space<vmem>>, vector<2x16x128xbf16>
    %187 = vector.shape_cast %186 : vector<2x16x128xbf16> to vector<32x128xbf16>
    %c4_215 = arith.constant 4 : index
    %c0_216 = arith.constant 0 : index
    %c0_217 = arith.constant 0 : index
    %188 = vector.load %arg10[%c4_215, %c0_216, %c0_217] : memref<5x128x128xbf16, #tpu.memory_space<vmem>>, vector<1x128x128xbf16>
    %189 = vector.shape_cast %188 : vector<1x128x128xbf16> to vector<128x128xbf16>
    %cst_218 = arith.constant dense<0.000000e+00> : vector<32x128xf32>
    %190 = tpu.matmul %187, %189, %cst_218 {dimension_numbers = #tpu.dot_dimension_numbers<[1], [0], [0], [1], [0, 0, 1, 1], [], []>} : vector<32x128xbf16>, vector<128x128xbf16>, vector<32x128xf32> -> vector<32x128xf32>
    %191 = arith.addf %185, %190 : vector<32x128xf32>
    %c0_219 = arith.constant 0 : index
    %c0_220 = arith.constant 0 : index
    %192 = vector.load %arg11[%c0_219, %c0_220] : memref<1x128xf32, #tpu.memory_space<vmem>>, vector<1x128xf32>
    %193 = vector.broadcast %192 : vector<1x128xf32> to vector<32x128xf32>
    %194 = arith.addf %191, %193 : vector<32x128xf32>
    %cst_221 = arith.constant 0.000000e+00 : f32
    %195 = vector.broadcast %cst_221 : f32 to vector<32x128xf32>
    %196 = arith.maximumf %194, %195 : vector<32x128xf32>
    %197 = vector.extract_strided_slice %196 {offsets = [0, 0], sizes = [32, 50], strides = [1, 1]} : vector<32x128xf32> to vector<32x50xf32>
    %198 = vector.shape_cast %197 : vector<32x50xf32> to vector<2x16x50xf32>
    %199 = arith.truncf %198 : vector<2x16x50xf32> to vector<2x16x50xbf16>
    %c0_222 = arith.constant 0 : index
    %c0_223 = arith.constant 0 : index
    %c0_224 = arith.constant 0 : index
    %200 = vector.load %arg12[%c0_222, %c0_223, %c0_224] : memref<2x16x50xbf16, #tpu.memory_space<vmem>>, vector<2x16x50xbf16>
    tpu.vector_store %arg12[%c0_222, %c0_223, %c0_224], %199 {strides = array<i32>} : memref<2x16x50xbf16, #tpu.memory_space<vmem>>, vector<2x16x50xbf16>,
    return
  }
  func.func @transform_0(%arg0: i32) -> (i32, i32, i32) {
    %c0_i32 = arith.constant 0 : i32
    %c0_i32_0 = arith.constant 0 : i32
    %c0_i32_1 = arith.constant 0 : i32
    return %arg0, %c0_i32, %c0_i32_0 : i32, i32, i32
  }
  func.func @transform_1(%arg0: i32) -> (i32, i32) {
    %c0_i32 = arith.constant 0 : i32
    %c0_i32_0 = arith.constant 0 : i32
    %c0_i32_1 = arith.constant 0 : i32
    return %c0_i32, %c0_i32_0 : i32, i32
  }
  func.func @transform_2(%arg0: i32) -> (i32, i32) {
    %c0_i32 = arith.constant 0 : i32
    %c0_i32_0 = arith.constant 0 : i32
    %c0_i32_1 = arith.constant 0 : i32
    return %c0_i32, %c0_i32_0 : i32, i32
  }
  func.func @transform_3(%arg0: i32) -> (i32, i32, i32) {
    %c0_i32 = arith.constant 0 : i32
    %c0_i32_0 = arith.constant 0 : i32
    %c0_i32_1 = arith.constant 0 : i32
    %c0_i32_2 = arith.constant 0 : i32
    return %c0_i32, %c0_i32_0, %c0_i32_1 : i32, i32, i32
  }
  func.func @transform_4(%arg0: i32) -> (i32, i32) {
    %c0_i32 = arith.constant 0 : i32
    %c0_i32_0 = arith.constant 0 : i32
    %c0_i32_1 = arith.constant 0 : i32
    return %c0_i32, %c0_i32_0 : i32, i32
  }
  func.func @transform_5(%arg0: i32) -> (i32, i32, i32) {
    %c0_i32 = arith.constant 0 : i32
    %c0_i32_0 = arith.constant 0 : i32
    %c0_i32_1 = arith.constant 0 : i32
    %c0_i32_2 = arith.constant 0 : i32
    return %c0_i32, %c0_i32_0, %c0_i32_1 : i32, i32, i32
  }
  func.func @transform_6(%arg0: i32) -> (i32, i32) {
    %c0_i32 = arith.constant 0 : i32
    %c0_i32_0 = arith.constant 0 : i32
    %c0_i32_1 = arith.constant 0 : i32
    return %c0_i32, %c0_i32_0 : i32, i32
  }
  func.func @transform_7(%arg0: i32) -> (i32, i32, i32) {
    %c0_i32 = arith.constant 0 : i32
    %c0_i32_0 = arith.constant 0 : i32
    %c0_i32_1 = arith.constant 0 : i32
    %c0_i32_2 = arith.constant 0 : i32
    return %c0_i32, %c0_i32_0, %c0_i32_1 : i32, i32, i32
  }
  func.func @transform_8(%arg0: i32) -> (i32, i32) {
    %c0_i32 = arith.constant 0 : i32
    %c0_i32_0 = arith.constant 0 : i32
    %c0_i32_1 = arith.constant 0 : i32
    return %c0_i32, %c0_i32_0 : i32, i32
  }
  func.func @transform_9(%arg0: i32) -> (i32, i32, i32) {
    %c0_i32 = arith.constant 0 : i32
    %c0_i32_0 = arith.constant 0 : i32
    %c0_i32_1 = arith.constant 0 : i32
    %c0_i32_2 = arith.constant 0 : i32
    return %c0_i32, %c0_i32_0, %c0_i32_1 : i32, i32, i32
  }
  func.func @transform_10(%arg0: i32) -> (i32, i32) {
    %c0_i32 = arith.constant 0 : i32
    %c0_i32_0 = arith.constant 0 : i32
    %c0_i32_1 = arith.constant 0 : i32
    return %c0_i32, %c0_i32_0 : i32, i32
  }
  func.func @transform_11(%arg0: i32) -> (i32, i32, i32) {
    %c0_i32 = arith.constant 0 : i32
    %c0_i32_0 = arith.constant 0 : i32
    %c0_i32_1 = arith.constant 0 : i32
    return %arg0, %c0_i32, %c0_i32_0 : i32, i32, i32
  }
}

</mosaic_0001>

<bundles_post_ra>
// kernel: sgn_branch_forward.3
= control target key start
LH: loop header
LB: loop body
LE: loop exit
PB: predicated region body
PF: predicated region fallthrough
CT: control target
= control target key end

     0   :  { %10 = vsyncpa [#allocation4], 0  ;;  %s5568_s0 = inlined_call_operand.vmem [shape: bf16[2,896], index: 0, kind: input, shape index: {}]   ;;  %s5569_s1 = inlined_call_operand.hbm [shape: bf16[896,1024], index: 1, kind: input, shape index: {}]   ;;  %s5570_s2 = inlined_call_operand.hbm [shape: f32[1,1024], index: 2, kind: input, shape index: {}]   ;;  %s5571_s3 = inlined_call_operand.vmem [shape: bf16[1024,8], index: 3, kind: input, shape index: {}]   ;;  %s5572_s4 = inlined_call_operand.hbm [shape: f32[1,8], index: 4, kind: input, shape index: {}]   ;;  %s5573_s5 = inlined_call_operand.hbm [shape: f32[2,8], index: 5, kind: output, shape index: {}]  }
   0x1   :  { %11 = vsyncpa [#allocation7], 0 }
   0x2   :  { %12 = vsyncpa [#allocation5], 0  ;;  %s5161_s18 = smov [#allocation6]   ;;  %s5162_s20 = smov [#allocation3]  }
   0x3   :  { %s33_s19 = sshll.u32 %s5161_s18, 4  ;;  %s20_s21 = sshll.u32 %s5162_s20, 4  ;;  %s34_s19 = int_to_ptr.vmem [resolvable:$true] %s33_s19  ;;  %s5200_s21 = int_to_ptr.vmem [resolvable:$true] %s20_s21 }
   0x4   :  { %s5067_s24 = scalar_lea.hbm %s5570_s2, 128 }
   0x5   :  { %p5068_p0 = scmp.ne.s32.totalorder %s5570_s2, %s5067_s24  ;;  %p5071_p1 = scmp.lt.u32.totalorder %s5067_s24, %s5570_s2 }
   0x7   :  { %p5073_p2 = pnand %p5071_p1, %p5068_p0 }
   0x9   :  { %5076 = shalt.err (!%p5073_p2)
}
   0xa   :  { %s5077_s29 = scalar_lea.vmem %s34_s19, 128  ;;  %p5082_p4 = scmp.lt.s32.totalorder %s34_s19, %s34_s19 }
   0xb   :  { %p5078_p3 = scmp.ne.s32.totalorder %s34_s19, %s5077_s29  ;;  %p5083_p5 = scmp.lt.s32.totalorder %s5077_s29, %s5077_s29 }
   0xd   :  { %p5084_p6 = por %p5083_p5, %p5082_p4 }
   0xf   :  { %p5085_p7 = pnand %p5084_p6, %p5078_p3 }
  0x11   :  { %5088 = shalt.err (!%p5085_p7)
}
  0x12   :  { %36 = dma.hbm_to_vmem [thread:$0]  %s5570_s2, 128, %s34_s19, [#allocation7]  }
  0x13   :  { %s5089_s9 = scalar_lea.hbm %s5569_s1, 57344 }
  0x14   :  { %p5090_p8 = scmp.ne.s32.totalorder %s5569_s1, %s5089_s9  ;;  %p5093_p9 = scmp.lt.u32.totalorder %s5089_s9, %s5569_s1 }
  0x16   :  { %p5095_p10 = pnand %p5093_p9, %p5090_p8 }
  0x18   :  { %5098 = shalt.err (!%p5095_p10)
}
  0x19   :  { %s5099_s14 = scalar_lea.vmem %s5200_s21, 57344  ;;  %p5104_p12 = scmp.lt.s32.totalorder %s5200_s21, %s5200_s21 }
  0x1a   :  { %p5100_p11 = scmp.ne.s32.totalorder %s5200_s21, %s5099_s14  ;;  %p5105_p13 = scmp.lt.s32.totalorder %s5099_s14, %s5099_s14 }
  0x1c   :  { %p5106_p0 = por %p5105_p13, %p5104_p12 }
  0x1e   :  { %p5107_p1 = pnand %p5106_p0, %p5100_p11 }
  0x20   :  { %5110 = shalt.err (!%p5107_p1)
}
  0x21   :  { %s5163_s2 = smov 512   ;;  %s5164_s15 = smov 32  }
  0x22   :  { %26 = dma.hbm_to_vmem [thread:$0]  %s5569_s1, 57344, %s5200_s21, [#allocation4], %s5163_s2, %s5163_s2, %s5164_s15  }
  0x23   :  { %s5165_s18 = smov [#allocation8]   ;;  %s5111_s23 = scalar_lea.hbm %s5572_s4, 16 }
  0x24   :  { %s45_s19 = sshll.u32 %s5165_s18, 4  ;;  %p5112_p2 = scmp.ne.s32.totalorder %s5572_s4, %s5111_s23  ;;  %s46_s19 = int_to_ptr.vmem [resolvable:$true] %s45_s19 }
  0x25   :  { %p5115_p3 = scmp.lt.u32.totalorder %s5111_s23, %s5572_s4 }
  0x27   :  { %p5117_p4 = pnand %p5115_p3, %p5112_p2 }
  0x29   :  { %5120 = shalt.err (!%p5117_p4)
}
  0x2a   :  { %s5121_s28 = scalar_lea.vmem %s46_s19, 16  ;;  %s5125_s1 = scalar_lea.vmem %s46_s19, 32 }
  0x2b   :  { %p5122_p5 = scmp.ne.s32.totalorder %s46_s19, %s5121_s28  ;;  %p5126_p6 = scmp.lt.s32.totalorder %s46_s19, %s46_s19 }
  0x2c   :  { %p5127_p7 = scmp.lt.s32.totalorder %s5125_s1, %s5121_s28 }
  0x2e   :  { %p5128_p8 = por %p5127_p7, %p5126_p6 }
  0x30   :  { %p5129_p9 = pnand %p5128_p8, %p5122_p5 }
  0x32   :  { %5132 = shalt.err (!%p5129_p9)
}
  0x33   :  { %48 = dma.hbm_to_vmem [thread:$0]  %s5572_s4, 16, %s46_s19, [#allocation7]  }
  0x34   :  { %5155 = dma.done.wait [#allocation4], 57344  }
  0x35   :  { %5156 = vsyncadd [#allocation4], 4294909952 }
  0x36   :  { %5157 = dma.done.wait [#allocation7], 144  }
  0x37   :  { %5158 = vsyncadd [#allocation7], 4294967152  ;;  %v68_v0 = vld [vmem:[#allocation3] sm:$0xff]  ;;  %v69_v2 = vld [vmem:[#allocation3 + $0x8] sm:$0xff]  ;;  %v5166_v32 = vmov 1966171168   ;;  %v521_v34 = vlaneseq }
  0x38   :  { %v72_v1 = vld [vmem:[#allocation3 + $0x20] sm:$0xff]  ;;  %v73_v4 = vld [vmem:[#allocation3 + $0x28] sm:$0xff]  ;;  %v519_v33 = vunpack.c.l.s4 %v5166_v32  ;;  %vm4326_vm0 = vcmask 58368  }
  0x39   :  { %v4345_v3 = vcombine.high %v68_v0, %v72_v1  ;;  %v4344_v5 = vcombine.low %v68_v0, %v72_v1  ;;  %v76_v6 = vld [vmem:[#allocation3 + $0x40] sm:$0xff]  ;;  %v4347_v8 = vcombine.high %v69_v2, %v73_v4  ;;  %v4346_v9 = vcombine.low %v69_v2, %v73_v4  ;;  %v77_v11 = vld [vmem:[#allocation3 + $0x48] sm:$0xff] }
  0x3a   :  { %v80_v7 = vld [vmem:[#allocation3 + $0x60] sm:$0xff]  ;;  %v81_v12 = vld [vmem:[#allocation3 + $0x68] sm:$0xff]  ;;  %v520_v43 = vunpack.c.0.s8 %v519_v33  ;;  %v5243_v44 = vshrl.u32 %v521_v34, 7 }
  0x3b   :  { %v4353_v10 = vcombine.high %v76_v6, %v80_v7  ;;  %v84_v13 = vld [vmem:[#allocation3 + $0x80] sm:$0xff]  ;;  %2812 = vmatprep.subr.bf16.mxu0 %v4345_v3  ;;  %v4355_v14 = vcombine.high %v77_v11, %v81_v12  ;;  %v85_v16 = vld [vmem:[#allocation3 + $0x88] sm:$0xff]  ;;  %2976 = vmatprep.subr.bf16.mxu1 %v4347_v8  ;;  %v4352_v18 = vcombine.low %v76_v6, %v80_v7 }
  0x3c   :  { %v88_v15 = vld [vmem:[#allocation3 + $0xa0] sm:$0xff]  ;;  %v89_v17 = vld [vmem:[#allocation3 + $0xa8] sm:$0xff]  ;;  %2813 = vmatpush1.bf16.msra.mxu0 %v4344_v5  ;;  %2977 = vmatpush1.bf16.msra.mxu1 %v4346_v9  ;;  %v4354_v19 = vcombine.low %v77_v11, %v81_v12  ;;  %v5246_v53 = vsub.s32 %v520_v43, %v5243_v44 }
  0x3d   :  { %2814 = vmatprep.subr.bf16.mxu0 %v4353_v10  ;;  %v4361_v20 = vcombine.high %v84_v13, %v88_v15  ;;  %2978 = vmatprep.subr.bf16.mxu1 %v4355_v14  ;;  %v4363_v21 = vcombine.high %v85_v16, %v89_v17  ;;  %v92_v22 = vld [vmem:[#allocation3 + $0xc0] sm:$0xff]  ;;  %v93_v24 = vld [vmem:[#allocation3 + $0xc8] sm:$0xff]  ;;  %v4360_v26 = vcombine.low %v84_v13, %v88_v15 }
  0x3e   :  { %v96_v23 = vld [vmem:[#allocation3 + $0xe0] sm:$0xff]  ;;  %v97_v25 = vld [vmem:[#allocation3 + $0xe8] sm:$0xff]  ;;  %v4362_v27 = vcombine.low %v85_v16, %v89_v17 }
  0x3f   :  { %v4369_v28 = vcombine.high %v92_v22, %v96_v23  ;;  %v4371_v29 = vcombine.high %v93_v24, %v97_v25  ;;  %v100_v30 = vld [vmem:[#allocation3 + $0x100] sm:$0xff]  ;;  %v101_v35 = vld [vmem:[#allocation3 + $0x108] sm:$0xff]  ;;  %v4368_v37 = vcombine.low %v92_v22, %v96_v23  ;;  %v4370_v38 = vcombine.low %v93_v24, %v97_v25 }
  0x40   :  { %2815 = vmatpush1.bf16.msra.mxu0 %v4352_v18  ;;  %2979 = vmatpush1.bf16.msra.mxu1 %v4354_v19  ;;  %v104_v31 = vld [vmem:[#allocation3 + $0x120] sm:$0xff]  ;;  %v105_v36 = vld [vmem:[#allocation3 + $0x128] sm:$0xff] }
  0x41   :  { %2816 = vmatprep.subr.bf16.mxu0 %v4361_v20  ;;  %2980 = vmatprep.subr.bf16.mxu1 %v4363_v21  ;;  %v4377_v39 = vcombine.high %v100_v30, %v104_v31  ;;  %v4379_v40 = vcombine.high %v101_v35, %v105_v36  ;;  %v108_v41 = vld [vmem:[#allocation3 + $0x140] sm:$0xff]  ;;  %v109_v45 = vld [vmem:[#allocation3 + $0x148] sm:$0xff]  ;;  %v4376_v47 = vcombine.low %v100_v30, %v104_v31 }
  0x42   :  { %v112_v42 = vld [vmem:[#allocation3 + $0x160] sm:$0xff]  ;;  %v113_v46 = vld [vmem:[#allocation3 + $0x168] sm:$0xff]  ;;  %v4378_v48 = vcombine.low %v101_v35, %v105_v36 }
  0x43   :  { %v4385_v49 = vcombine.high %v108_v41, %v112_v42  ;;  %v4387_v50 = vcombine.high %v109_v45, %v113_v46  ;;  %v116_v51 = vld [vmem:[#allocation3 + $0x180] sm:$0xff]  ;;  %v117_v54 = vld [vmem:[#allocation3 + $0x188] sm:$0xff]  ;;  %v4384_v56 = vcombine.low %v108_v41, %v112_v42  ;;  %v4386_v57 = vcombine.low %v109_v45, %v113_v46 }
  0x44   :  { %2817 = vmatpush1.bf16.msra.mxu0 %v4360_v26  ;;  %2981 = vmatpush1.bf16.msra.mxu1 %v4362_v27  ;;  %v120_v52 = vld [vmem:[#allocation3 + $0x1a0] sm:$0xff]  ;;  %v121_v55 = vld [vmem:[#allocation3 + $0x1a8] sm:$0xff] }
  0x45   :  { %2818 = vmatprep.subr.bf16.mxu0 %v4369_v28  ;;  %2982 = vmatprep.subr.bf16.mxu1 %v4371_v29  ;;  %v4393_v58 = vcombine.high %v116_v51, %v120_v52  ;;  %v5251_v59 = vld [vmem:[%s5568_s0] sm:$0x7f]  ;;  %v4395_v60 = vcombine.high %v117_v54, %v121_v55  ;;  %v125_v0 = vld [vmem:[#allocation3 + $0x1c8] sm:$0xff]  ;;  %v4392_v2 = vcombine.low %v116_v51, %v120_v52 }
  0x46   :  { %v124_v61 = vld [vmem:[#allocation3 + $0x1c0] sm:$0xff]  ;;  %v5255_v63 = vrot.slane %v5251_v59, %v5246_v53  ;;  %v129_v1 = vld [vmem:[#allocation3 + $0x1e8] sm:$0xff]  ;;  %v4394_v4 = vcombine.low %v117_v54, %v121_v55 }
  0x47   :  { %v128_v62 = vld [vmem:[#allocation3 + $0x1e0] sm:$0xff]  ;;  %v4403_v6 = vcombine.high %v125_v0, %v129_v1  ;;  %v133_v10 = vld [vmem:[#allocation3 + $0x208] sm:$0xff]  ;;  %v4402_v13 = vcombine.low %v125_v0, %v129_v1 }
  0x48   :  { %2819 = vmatpush1.bf16.msra.mxu0 %v4368_v37  ;;  %2983 = vmatpush1.bf16.msra.mxu1 %v4370_v38  ;;  %v532_v3 = vcombine.high %v5255_v63, %v5255_v63  ;;  %v4401_v5 = vcombine.high %v124_v61, %v128_v62  ;;  %v132_v7 = vld [vmem:[#allocation3 + $0x200] sm:$0xff]  ;;  %v137_v11 = vld [vmem:[#allocation3 + $0x228] sm:$0xff]  ;;  %v4400_v12 = vcombine.low %v124_v61, %v128_v62 }
  0x49   :  { %2820 = vmatprep.subr.bf16.mxu0 %v4377_v39  ;;  %2984 = vmatprep.subr.bf16.mxu1 %v4379_v40  ;;  %v136_v8 = vld [vmem:[#allocation3 + $0x220] sm:$0xff]  ;;  %v4411_v15 = vcombine.high %v133_v10, %v137_v11  ;;  %v141_v18 = vld [vmem:[#allocation3 + $0x248] sm:$0xff]  ;;  %v4410_v21 = vcombine.low %v133_v10, %v137_v11 }
  0x4a   :  { %v5260_v9 = vrot.slane %v532_v3, %v5246_v53  ;;  %v4409_v14 = vcombine.high %v132_v7, %v136_v8  ;;  %v140_v16 = vld [vmem:[#allocation3 + $0x240] sm:$0xff]  ;;  %v145_v19 = vld [vmem:[#allocation3 + $0x268] sm:$0xff]  ;;  %v4408_v20 = vcombine.low %v132_v7, %v136_v8 }
  0x4b   :  { %v144_v17 = vld [vmem:[#allocation3 + $0x260] sm:$0xff]  ;;  %v4419_v23 = vcombine.high %v141_v18, %v145_v19  ;;  %v149_v26 = vld [vmem:[#allocation3 + $0x288] sm:$0xff]  ;;  %v4418_v29 = vcombine.low %v141_v18, %v145_v19  ;;  %v517_v18 = vcombine.high %v5251_v59, %v5251_v59 }
  0x4c   :  { %2821 = vmatpush1.bf16.msra.mxu0 %v4376_v47  ;;  %2985 = vmatpush1.bf16.msra.mxu1 %v4378_v48  ;;  %v4417_v22 = vcombine.high %v140_v16, %v144_v17  ;;  %v148_v24 = vld [vmem:[#allocation3 + $0x280] sm:$0xff]  ;;  %v153_v27 = vld [vmem:[#allocation3 + $0x2a8] sm:$0xff]  ;;  %v4416_v28 = vcombine.low %v140_v16, %v144_v17 }
  0x4d   :  { %2822 = vmatprep.subr.bf16.mxu0 %v4385_v49  ;;  %2986 = vmatprep.subr.bf16.mxu1 %v4387_v50  ;;  %v152_v25 = vld [vmem:[#allocation3 + $0x2a0] sm:$0xff]  ;;  %v4427_v31 = vcombine.high %v149_v26, %v153_v27  ;;  %v157_v34 = vld [vmem:[#allocation3 + $0x2c8] sm:$0xff]  ;;  %v4426_v37 = vcombine.low %v149_v26, %v153_v27 }
  0x4e   :  { %2844 = vmatprep.mubr.bf16.mxu0 %v5260_v9  ;;  %3008 = vmatprep.mubr.bf16.mxu1 %v5260_v9  ;;  %v4425_v30 = vcombine.high %v148_v24, %v152_v25  ;;  %v156_v32 = vld [vmem:[#allocation3 + $0x2c0] sm:$0xff]  ;;  %v161_v35 = vld [vmem:[#allocation3 + $0x2e8] sm:$0xff]  ;;  %v4424_v36 = vcombine.low %v148_v24, %v152_v25  ;;  %v531_v24 = vrot.slane %v517_v18, %v5246_v53 }
  0x4f   :  { %v160_v33 = vld [vmem:[#allocation3 + $0x2e0] sm:$0xff]  ;;  %v4435_v39 = vcombine.high %v157_v34, %v161_v35  ;;  %v165_v42 = vld [vmem:[#allocation3 + $0x308] sm:$0xff]  ;;  %v4434_v46 = vcombine.low %v157_v34, %v161_v35  ;;  %v5269_v25 = vrot.slane %v5255_v63, %v5246_v53 }
  0x50   :  { %2823 = vmatpush1.bf16.msra.mxu0 %v4384_v56  ;;  %2987 = vmatpush1.bf16.msra.mxu1 %v4386_v57  ;;  %v4433_v38 = vcombine.high %v156_v32, %v160_v33  ;;  %v164_v40 = vld [vmem:[#allocation3 + $0x300] sm:$0xff]  ;;  %v169_v43 = vld [vmem:[#allocation3 + $0x328] sm:$0xff]  ;;  %v4432_v45 = vcombine.low %v156_v32, %v160_v33 }
  0x51   :  { %2824 = vmatprep.subr.bf16.mxu0 %v4393_v58  ;;  %2988 = vmatprep.subr.bf16.mxu1 %v4395_v60  ;;  %v168_v41 = vld [vmem:[#allocation3 + $0x320] sm:$0xff]  ;;  %v4443_v48 = vcombine.high %v165_v42, %v169_v43  ;;  %v173_v51 = vld [vmem:[#allocation3 + $0x348] sm:$0xff]  ;;  %v4442_v55 = vcombine.low %v165_v42, %v169_v43 }
  0x52   :  { %v4441_v47 = vcombine.high %v164_v40, %v168_v41  ;;  %v172_v49 = vld [vmem:[#allocation3 + $0x340] sm:$0xff]  ;;  %v177_v52 = vld [vmem:[#allocation3 + $0x368] sm:$0xff]  ;;  %v4440_v54 = vcombine.low %v164_v40, %v168_v41 }
  0x53   :  { %v176_v50 = vld [vmem:[#allocation3 + $0x360] sm:$0xff]  ;;  %v4451_v57 = vcombine.high %v173_v51, %v177_v52  ;;  %v181_v61 = vld [vmem:[#allocation3 + $0x388] sm:$0xff]  ;;  %v4450_v1 = vcombine.low %v173_v51, %v177_v52 }
  0x54   :  { %2825 = vmatpush1.bf16.msra.mxu0 %v4392_v2  ;;  %2989 = vmatpush1.bf16.msra.mxu1 %v4394_v4  ;;  %v4449_v56 = vcombine.high %v172_v49, %v176_v50  ;;  %v180_v58 = vld [vmem:[#allocation3 + $0x380] sm:$0xff]  ;;  %v185_v62 = vld [vmem:[#allocation3 + $0x3a8] sm:$0xff]  ;;  %v4448_v0 = vcombine.low %v172_v49, %v176_v50 }
  0x55   :  { %2826 = vmatprep.subr.bf16.mxu0 %v4401_v5  ;;  %2990 = vmatprep.subr.bf16.mxu1 %v4403_v6  ;;  %v184_v60 = vld [vmem:[#allocation3 + $0x3a0] sm:$0xff]  ;;  %v4459_v3 = vcombine.high %v181_v61, %v185_v62  ;;  %v189_v6 = vld [vmem:[#allocation3 + $0x3c8] sm:$0xff]  ;;  %v4458_v10 = vcombine.low %v181_v61, %v185_v62 }
  0x56   :  { %v4457_v2 = vcombine.high %v180_v58, %v184_v60  ;;  %v188_v4 = vld [vmem:[#allocation3 + $0x3c0] sm:$0xff]  ;;  %v193_v7 = vld [vmem:[#allocation3 + $0x3e8] sm:$0xff]  ;;  %v4456_v8 = vcombine.low %v180_v58, %v184_v60 }
  0x57   :  { %v192_v5 = vld [vmem:[#allocation3 + $0x3e0] sm:$0xff]  ;;  %v201_v16 = vld [vmem:[#allocation3 + $0x428] sm:$0xff]  ;;  %v4466_v19 = vcombine.low %v189_v6, %v193_v7 }
  0x58   :  { %2827 = vmatpush1.bf16.msra.mxu0 %v4400_v12  ;;  %2991 = vmatpush1.bf16.msra.mxu1 %v4402_v13  ;;  %v4465_v11 = vcombine.high %v188_v4, %v192_v5  ;;  %v4467_v12 = vcombine.high %v189_v6, %v193_v7  ;;  %v196_v13 = vld [vmem:[#allocation3 + $0x400] sm:$0xff]  ;;  %v4464_v17 = vcombine.low %v188_v4, %v192_v5  ;;  %v205_v26 = vld [vmem:[#allocation3 + $0x448] sm:$0xff] }
  0x59   :  { %2828 = vmatprep.subr.bf16.mxu0 %v4409_v14  ;;  %2992 = vmatprep.subr.bf16.mxu1 %v4411_v15  ;;  %v200_v14 = vld [vmem:[#allocation3 + $0x420] sm:$0xff]  ;;  %v197_v15 = vld [vmem:[#allocation3 + $0x408] sm:$0xff] }
  0x5a   :  { %v209_v27 = vld [vmem:[#allocation3 + $0x468] sm:$0xff]  ;;  %v4474_v59 = vcombine.low %v197_v15, %v201_v16  ;;  %v216_v32 = vld [vmem:[#allocation3 + $0x4a0] sm:$0xff] }
  0x5b   :  { %v213_v33 = vld [vmem:[#allocation3 + $0x488] sm:$0xff]  ;;  %v4483_v34 = vcombine.high %v205_v26, %v209_v27  ;;  %v220_v41 = vld [vmem:[#allocation3 + $0x4c0] sm:$0xff] }
  0x5c   :  { %2829 = vmatpush1.bf16.msra.mxu0 %v4408_v20  ;;  %2993 = vmatpush1.bf16.msra.mxu1 %v4410_v21  ;;  %v4473_v20 = vcombine.high %v196_v13, %v200_v14  ;;  %v4475_v21 = vcombine.high %v197_v15, %v201_v16  ;;  %v217_v35 = vld [vmem:[#allocation3 + $0x4a8] sm:$0xff]  ;;  %v224_v42 = vld [vmem:[#allocation3 + $0x4e0] sm:$0xff] }
  0x5d   :  { %2830 = vmatprep.subr.bf16.mxu0 %v4417_v22  ;;  %2994 = vmatprep.subr.bf16.mxu1 %v4419_v23  ;;  %v204_v22 = vld [vmem:[#allocation3 + $0x440] sm:$0xff]  ;;  %v221_v43 = vld [vmem:[#allocation3 + $0x4c8] sm:$0xff] }
  0x5e   :  { %v208_v23 = vld [vmem:[#allocation3 + $0x460] sm:$0xff]  ;;  %v229_v51 = vld [vmem:[#allocation3 + $0x508] sm:$0xff] }
  0x5f   :  { %v228_v49 = vld [vmem:[#allocation3 + $0x500] sm:$0xff]  ;;  %v237_v61 = vld [vmem:[#allocation3 + $0x548] sm:$0xff] }
  0x60   :  { %2831 = vmatpush1.bf16.msra.mxu0 %v4416_v28  ;;  %2995 = vmatpush1.bf16.msra.mxu1 %v4418_v29  ;;  %v4472_v28 = vcombine.low %v196_v13, %v200_v14  ;;  %v533_v29 = vcombine.high %v531_v24, %v531_v24  ;;  %v232_v50 = vld [vmem:[#allocation3 + $0x520] sm:$0xff]  ;;  %v245_v6 = vld [vmem:[#allocation3 + $0x588] sm:$0xff] }
  0x61   :  { %2832 = vmatprep.subr.bf16.mxu0 %v4425_v30  ;;  %2996 = vmatprep.subr.bf16.mxu1 %v4427_v31  ;;  %v4481_v30 = vcombine.high %v204_v22, %v208_v23  ;;  %v212_v31 = vld [vmem:[#allocation3 + $0x480] sm:$0xff]  ;;  %v253_v15 = vld [vmem:[#allocation3 + $0x5c8] sm:$0xff] }
  0x62   :  { %v5276_v63 = vrot.slane %v533_v29, %v5246_v53  ;;  %v4489_v40 = vcombine.high %v212_v31, %v216_v32  ;;  %v236_v58 = vld [vmem:[#allocation3 + $0x540] sm:$0xff] }
  0x63   :  { %v240_v60 = vld [vmem:[#allocation3 + $0x560] sm:$0xff] }
  0x64   :  { %2833 = vmatpush1.bf16.msra.mxu0 %v4424_v36  ;;  %2997 = vmatpush1.bf16.msra.mxu1 %v4426_v37  ;;  %v5273_v36 = vcombine.high %v5260_v9, %v5260_v9  ;;  %v5279_v37 = vrot.slane %v531_v24, %v5246_v53  ;;  %v4488_v53 = vcombine.low %v212_v31, %v216_v32  ;;  %v244_v4 = vld [vmem:[#allocation3 + $0x580] sm:$0xff]  ;;  %v269_v31 = vld [vmem:[#allocation3 + $0x648] sm:$0xff] }
  0x65   :  { %2834 = vmatprep.subr.bf16.mxu0 %v4433_v38  ;;  %2998 = vmatprep.subr.bf16.mxu1 %v4435_v39  ;;  %v4480_v38 = vcombine.low %v204_v22, %v208_v23  ;;  %v4482_v39 = vcombine.low %v205_v26, %v209_v27  ;;  %v248_v5 = vld [vmem:[#allocation3 + $0x5a0] sm:$0xff]  ;;  %v261_v23 = vld [vmem:[#allocation3 + $0x608] sm:$0xff] }
  0x66   :  { %v252_v13 = vld [vmem:[#allocation3 + $0x5c0] sm:$0xff]  ;;  %v4520_v18 = vcombine.low %v244_v4, %v248_v5  ;;  %v265_v26 = vld [vmem:[#allocation3 + $0x628] sm:$0xff] }
  0x67   :  { %v256_v14 = vld [vmem:[#allocation3 + $0x5e0] sm:$0xff]  ;;  %v4539_v32 = vcombine.high %v261_v23, %v265_v26 }
  0x68   :  { %2835 = vmatpush1.bf16.msra.mxu0 %v4432_v45  ;;  %2999 = vmatpush1.bf16.msra.mxu1 %v4434_v46  ;;  %v4491_v45 = vcombine.high %v213_v33, %v217_v35  ;;  %v225_v46 = vld [vmem:[#allocation3 + $0x4e8] sm:$0xff]  ;;  %v264_v22 = vld [vmem:[#allocation3 + $0x620] sm:$0xff]  ;;  %v4528_v27 = vcombine.low %v252_v13, %v256_v14 }
  0x69   :  { %2836 = vmatprep.subr.bf16.mxu0 %v4441_v47  ;;  %3000 = vmatprep.subr.bf16.mxu1 %v4443_v48  ;;  %v4490_v47 = vcombine.low %v213_v33, %v217_v35  ;;  %v4497_v48 = vcombine.high %v220_v41, %v224_v42  ;;  %v4499_v52 = vcombine.high %v221_v43, %v225_v46  ;;  %v273_v33 = vld [vmem:[#allocation3 + $0x668] sm:$0xff] }
  0x6a   :  { %v4538_v35 = vcombine.low %v261_v23, %v265_v26  ;;  %v321_v23 = vld [vmem:[#allocation3 + $0x7e8] sm:$0xff] }
  0x6c   :  { %2837 = vmatpush1.bf16.msra.mxu0 %v4440_v54  ;;  %3001 = vmatpush1.bf16.msra.mxu1 %v4442_v55  ;;  %v233_v54 = vld [vmem:[#allocation3 + $0x528] sm:$0xff]  ;;  %v4496_v55 = vcombine.low %v220_v41, %v224_v42  ;;  %v4547_v42 = vcombine.high %v269_v31, %v273_v33 }
  0x6d   :  { %2838 = vmatprep.subr.bf16.mxu0 %v4449_v56  ;;  %3002 = vmatprep.subr.bf16.mxu1 %v4451_v57  ;;  %v4498_v56 = vcombine.low %v221_v43, %v225_v46  ;;  %v4505_v57 = vcombine.high %v228_v49, %v232_v50  ;;  %v4507_v62 = vcombine.high %v229_v51, %v233_v54  ;;  %v277_v41 = vld [vmem:[#allocation3 + $0x688] sm:$0xff] }
  0x6e   :  { %v281_v43 = vld [vmem:[#allocation3 + $0x6a8] sm:$0xff]  ;;  %v4546_v46 = vcombine.low %v269_v31, %v273_v33 }
  0x6f   :  { %v329_v31 = vld [vmem:[#allocation3 + $0x828] sm:$0xff] }
  0x70   :  { %2839 = vmatpush1.bf16.msra.mxu0 %v4448_v0  ;;  %3003 = vmatpush1.bf16.msra.mxu1 %v4450_v1  ;;  %v241_v0 = vld [vmem:[#allocation3 + $0x568] sm:$0xff]  ;;  %v4504_v1 = vcombine.low %v228_v49, %v232_v50  ;;  %v4555_v50 = vcombine.high %v277_v41, %v281_v43 }
  0x71   :  { %2840 = vmatprep.subr.bf16.mxu0 %v4457_v2  ;;  %3004 = vmatprep.subr.bf16.mxu1 %v4459_v3  ;;  %v4506_v2 = vcombine.low %v229_v51, %v233_v54  ;;  %v4513_v3 = vcombine.high %v236_v58, %v240_v60  ;;  %v4515_v7 = vcombine.high %v237_v61, %v241_v0  ;;  %v285_v49 = vld [vmem:[#allocation3 + $0x6c8] sm:$0xff] }
  0x72   :  { %v289_v51 = vld [vmem:[#allocation3 + $0x6e8] sm:$0xff]  ;;  %v4554_v54 = vcombine.low %v277_v41, %v281_v43 }
  0x73   :  { %v337_v41 = vld [vmem:[#allocation3 + $0x868] sm:$0xff] }
  0x74   :  { %2841 = vmatpush1.bf16.msra.mxu0 %v4456_v8  ;;  %3005 = vmatpush1.bf16.msra.mxu1 %v4458_v10  ;;  %v249_v8 = vld [vmem:[#allocation3 + $0x5a8] sm:$0xff]  ;;  %v4512_v10 = vcombine.low %v236_v58, %v240_v60  ;;  %v4563_v60 = vcombine.high %v285_v49, %v289_v51 }
  0x75   :  { %2842 = vmatprep.subr.bf16.mxu0 %v4465_v11  ;;  %3006 = vmatprep.subr.bf16.mxu1 %v4467_v12  ;;  %v4514_v11 = vcombine.low %v237_v61, %v241_v0  ;;  %v4521_v12 = vcombine.high %v244_v4, %v248_v5  ;;  %v4523_v16 = vcombine.high %v245_v6, %v249_v8  ;;  %v293_v58 = vld [vmem:[#allocation3 + $0x708] sm:$0xff] }
  0x76   :  { %v297_v61 = vld [vmem:[#allocation3 + $0x728] sm:$0xff]  ;;  %v4562_v0 = vcombine.low %v285_v49, %v289_v51 }
  0x77   :  { %v301_v4 = vld [vmem:[#allocation3 + $0x748] sm:$0xff]  ;;  %v4571_v5 = vcombine.high %v293_v58, %v297_v61 }
  0x78   :  { %2843 = vmatpush1.bf16.msra.mxu0 %v4464_v17  ;;  %3007 = vmatpush1.bf16.msra.mxu1 %v4466_v19  ;;  %v257_v17 = vld [vmem:[#allocation3 + $0x5e8] sm:$0xff]  ;;  %v4522_v19 = vcombine.low %v245_v6, %v249_v8  ;;  %v4570_v8 = vcombine.low %v293_v58, %v297_v61 }
  0x79   :  { %2853 = vmatprep.subr.bf16.mxu0 %v4473_v20  ;;  %3017 = vmatprep.subr.bf16.mxu1 %v4475_v21  ;;  %v4529_v20 = vcombine.high %v252_v13, %v256_v14  ;;  %v260_v21 = vld [vmem:[#allocation3 + $0x600] sm:$0xff]  ;;  %v4531_v24 = vcombine.high %v253_v15, %v257_v17  ;;  %v305_v6 = vld [vmem:[#allocation3 + $0x768] sm:$0xff] }
  0x7a   :  { %v4537_v29 = vcombine.high %v260_v21, %v264_v22  ;;  %v309_v13 = vld [vmem:[#allocation3 + $0x788] sm:$0xff]  ;;  %v4579_v14 = vcombine.high %v301_v4, %v305_v6 }
  0x7b   :  { %2845 = vmatmul.mubr.bf16.vlgmr.msra.gmra.mrb[0].mxu0 %v5269_v25  ;;  %3009 = vmatmul.mubr.bf16.vlgmr.msra.gmra.mrb[0].mxu1 %v5269_v25  ;;  %v341_v49 = vld [vmem:[#allocation3 + $0x888] sm:$0xff] }
  0x7c   :  { %2854 = vmatpush1.bf16.msra.mxu0 %v4472_v28  ;;  %3018 = vmatpush1.bf16.msra.mxu1 %v4474_v59  ;;  %v4530_v28 = vcombine.low %v253_v15, %v257_v17  ;;  %v268_v59 = vld [vmem:[#allocation3 + $0x640] sm:$0xff]  ;;  %v313_v15 = vld [vmem:[#allocation3 + $0x7a8] sm:$0xff]  ;;  %v4578_v17 = vcombine.low %v301_v4, %v305_v6 }
  0x7d   :  { %2855 = vmatprep.subr.bf16.mxu0 %v4481_v30  ;;  %3019 = vmatprep.subr.bf16.mxu1 %v4483_v34  ;;  %v272_v30 = vld [vmem:[#allocation3 + $0x660] sm:$0xff]  ;;  %v4536_v34 = vcombine.low %v260_v21, %v264_v22  ;;  %v317_v21 = vld [vmem:[#allocation3 + $0x7c8] sm:$0xff]  ;;  %v4587_v22 = vcombine.high %v309_v13, %v313_v15  ;;  %v4586_v26 = vcombine.low %v309_v13, %v313_v15 }
  0x7e   :  { %2885 = vmatprep.mubr.bf16.mxu0 %v5273_v36  ;;  %3049 = vmatprep.mubr.bf16.mxu1 %v5273_v36  ;;  %v4594_v33 = vcombine.low %v317_v21, %v321_v23  ;;  %v349_v58 = vld [vmem:[#allocation3 + $0x8c8] sm:$0xff] }
  0x7f   :  { %v357_v4 = vld [vmem:[#allocation3 + $0x908] sm:$0xff] }
  0x80   :  { %2856 = vmatpush1.bf16.msra.mxu0 %v4480_v38  ;;  %3020 = vmatpush1.bf16.msra.mxu1 %v4482_v39  ;;  %v4545_v38 = vcombine.high %v268_v59, %v272_v30  ;;  %v276_v39 = vld [vmem:[#allocation3 + $0x680] sm:$0xff]  ;;  %v365_v13 = vld [vmem:[#allocation3 + $0x948] sm:$0xff] }
  0x81   :  { %2857 = vmatprep.subr.bf16.mxu0 %v4489_v40  ;;  %3021 = vmatprep.subr.bf16.mxu1 %v4491_v45  ;;  %v280_v40 = vld [vmem:[#allocation3 + $0x6a0] sm:$0xff]  ;;  %v4544_v45 = vcombine.low %v268_v59, %v272_v30  ;;  %v325_v59 = vld [vmem:[#allocation3 + $0x808] sm:$0xff]  ;;  %v4595_v30 = vcombine.high %v317_v21, %v321_v23 }
  0x82   :  { %v373_v21 = vld [vmem:[#allocation3 + $0x988] sm:$0xff] }
  0x84   :  { %2858 = vmatpush1.bf16.msra.mxu0 %v4488_v53  ;;  %3022 = vmatpush1.bf16.msra.mxu1 %v4490_v47  ;;  %v4553_v53 = vcombine.high %v276_v39, %v280_v40  ;;  %v284_v47 = vld [vmem:[#allocation3 + $0x6c0] sm:$0xff] }
  0x85   :  { %2859 = vmatprep.subr.bf16.mxu0 %v4497_v48  ;;  %3023 = vmatprep.subr.bf16.mxu1 %v4499_v52  ;;  %v288_v48 = vld [vmem:[#allocation3 + $0x6e0] sm:$0xff]  ;;  %v4552_v52 = vcombine.low %v276_v39, %v280_v40  ;;  %v333_v39 = vld [vmem:[#allocation3 + $0x848] sm:$0xff]  ;;  %v4603_v40 = vcombine.high %v325_v59, %v329_v31 }
  0x88   :  { %2860 = vmatpush1.bf16.msra.mxu0 %v4496_v55  ;;  %3024 = vmatpush1.bf16.msra.mxu1 %v4498_v56  ;;  %v4561_v55 = vcombine.high %v284_v47, %v288_v48  ;;  %v292_v56 = vld [vmem:[#allocation3 + $0x700] sm:$0xff] }
  0x89   :  { %2861 = vmatprep.subr.bf16.mxu0 %v4505_v57  ;;  %3025 = vmatprep.subr.bf16.mxu1 %v4507_v62  ;;  %v296_v57 = vld [vmem:[#allocation3 + $0x720] sm:$0xff]  ;;  %v4560_v62 = vcombine.low %v284_v47, %v288_v48 }
  0x8a   :  { %v340_v47 = vld [vmem:[#allocation3 + $0x880] sm:$0xff] }
  0x8b   :  { %v344_v48 = vld [vmem:[#allocation3 + $0x8a0] sm:$0xff] }
  0x8c   :  { %2862 = vmatpush1.bf16.msra.mxu0 %v4504_v1  ;;  %3026 = vmatpush1.bf16.msra.mxu1 %v4506_v2  ;;  %v4569_v1 = vcombine.high %v292_v56, %v296_v57  ;;  %v300_v2 = vld [vmem:[#allocation3 + $0x740] sm:$0xff]  ;;  %v4616_v61 = vcombine.low %v340_v47, %v344_v48 }
  0x8d   :  { %2863 = vmatprep.subr.bf16.mxu0 %v4513_v3  ;;  %3027 = vmatprep.subr.bf16.mxu1 %v4515_v7  ;;  %v304_v3 = vld [vmem:[#allocation3 + $0x760] sm:$0xff]  ;;  %v4568_v7 = vcombine.low %v292_v56, %v296_v57 }
  0x8e   :  { %v348_v56 = vld [vmem:[#allocation3 + $0x8c0] sm:$0xff] }
  0x8f   :  { %v352_v57 = vld [vmem:[#allocation3 + $0x8e0] sm:$0xff] }
  0x90   :  { %2864 = vmatpush1.bf16.msra.mxu0 %v4512_v10  ;;  %3028 = vmatpush1.bf16.msra.mxu1 %v4514_v11  ;;  %v4577_v10 = vcombine.high %v300_v2, %v304_v3  ;;  %v308_v11 = vld [vmem:[#allocation3 + $0x780] sm:$0xff]  ;;  %v4624_v6 = vcombine.low %v348_v56, %v352_v57 }
  0x91   :  { %2865 = vmatprep.subr.bf16.mxu0 %v4521_v12  ;;  %3029 = vmatprep.subr.bf16.mxu1 %v4523_v16  ;;  %v312_v12 = vld [vmem:[#allocation3 + $0x7a0] sm:$0xff]  ;;  %v4576_v16 = vcombine.low %v300_v2, %v304_v3 }
  0x92   :  { %v356_v2 = vld [vmem:[#allocation3 + $0x900] sm:$0xff] }
  0x93   :  { %v360_v3 = vld [vmem:[#allocation3 + $0x920] sm:$0xff] }
  0x94   :  { %2866 = vmatpush1.bf16.msra.mxu0 %v4520_v18  ;;  %3030 = vmatpush1.bf16.msra.mxu1 %v4522_v19  ;;  %v4585_v18 = vcombine.high %v308_v11, %v312_v12  ;;  %v316_v19 = vld [vmem:[#allocation3 + $0x7c0] sm:$0xff]  ;;  %v4632_v15 = vcombine.low %v356_v2, %v360_v3 }
  0x95   :  { %2867 = vmatprep.subr.bf16.mxu0 %v4529_v20  ;;  %3031 = vmatprep.subr.bf16.mxu1 %v4531_v24  ;;  %v320_v20 = vld [vmem:[#allocation3 + $0x7e0] sm:$0xff]  ;;  %v4584_v24 = vcombine.low %v308_v11, %v312_v12 }
  0x96   :  { %v364_v11 = vld [vmem:[#allocation3 + $0x940] sm:$0xff] }
  0x97   :  { %v368_v12 = vld [vmem:[#allocation3 + $0x960] sm:$0xff] }
  0x98   :  { %2868 = vmatpush1.bf16.msra.mxu0 %v4528_v27  ;;  %3032 = vmatpush1.bf16.msra.mxu1 %v4530_v28  ;;  %v4593_v27 = vcombine.high %v316_v19, %v320_v20  ;;  %v324_v28 = vld [vmem:[#allocation3 + $0x800] sm:$0xff]  ;;  %v4640_v23 = vcombine.low %v364_v11, %v368_v12 }
  0x99   :  { %2869 = vmatprep.subr.bf16.mxu0 %v4537_v29  ;;  %3033 = vmatprep.subr.bf16.mxu1 %v4539_v32  ;;  %v328_v29 = vld [vmem:[#allocation3 + $0x820] sm:$0xff]  ;;  %v4592_v32 = vcombine.low %v316_v19, %v320_v20 }
  0x9a   :  { %v4600_v43 = vcombine.low %v324_v28, %v328_v29  ;;  %v372_v19 = vld [vmem:[#allocation3 + $0x980] sm:$0xff] }
  0x9b   :  { %v376_v20 = vld [vmem:[#allocation3 + $0x9a0] sm:$0xff] }
  0x9c   :  { %2870 = vmatpush1.bf16.msra.mxu0 %v4536_v34  ;;  %3034 = vmatpush1.bf16.msra.mxu1 %v4538_v35  ;;  %v4601_v34 = vcombine.high %v324_v28, %v328_v29  ;;  %v332_v35 = vld [vmem:[#allocation3 + $0x840] sm:$0xff] }
  0x9d   :  { %2871 = vmatprep.subr.bf16.mxu0 %v4545_v38  ;;  %3035 = vmatprep.subr.bf16.mxu1 %v4547_v42  ;;  %v336_v38 = vld [vmem:[#allocation3 + $0x860] sm:$0xff]  ;;  %v5287_v42 = vcombine.high %v5269_v25, %v5269_v25 }
  0x9e   :  { %v4608_v51 = vcombine.low %v332_v35, %v336_v38  ;;  %v380_v28 = vld [vmem:[#allocation3 + $0x9c0] sm:$0xff] }
  0x9f   :  { %v384_v29 = vld [vmem:[#allocation3 + $0x9e0] sm:$0xff] }
  0xa0   :  { %2872 = vmatpush1.bf16.msra.mxu0 %v4544_v45  ;;  %3036 = vmatpush1.bf16.msra.mxu1 %v4546_v46  ;;  %v4602_v45 = vcombine.low %v325_v59, %v329_v31  ;;  %v4609_v46 = vcombine.high %v332_v35, %v336_v38  ;;  %v381_v59 = vld [vmem:[#allocation3 + $0x9c8] sm:$0xff]  ;;  %v4648_v31 = vcombine.low %v372_v19, %v376_v20  ;;  %v388_v35 = vld [vmem:[#allocation3 + $0xa00] sm:$0xff] }
  0xa1   :  { %2873 = vmatprep.subr.bf16.mxu0 %v4553_v53  ;;  %3037 = vmatprep.subr.bf16.mxu1 %v4555_v50  ;;  %v4611_v53 = vcombine.high %v333_v39, %v337_v41  ;;  %v345_v50 = vld [vmem:[#allocation3 + $0x8a8] sm:$0xff]  ;;  %v392_v38 = vld [vmem:[#allocation3 + $0xa20] sm:$0xff] }
  0xa4   :  { %2874 = vmatpush1.bf16.msra.mxu0 %v4552_v52  ;;  %3038 = vmatpush1.bf16.msra.mxu1 %v4554_v54  ;;  %v4610_v52 = vcombine.low %v333_v39, %v337_v41  ;;  %v4617_v54 = vcombine.high %v340_v47, %v344_v48  ;;  %v389_v39 = vld [vmem:[#allocation3 + $0xa08] sm:$0xff]  ;;  %v4656_v41 = vcombine.low %v380_v28, %v384_v29  ;;  %v400_v47 = vld [vmem:[#allocation3 + $0xa60] sm:$0xff] }
  0xa5   :  { %2875 = vmatprep.subr.bf16.mxu0 %v4561_v55  ;;  %3039 = vmatprep.subr.bf16.mxu1 %v4563_v60  ;;  %v4619_v55 = vcombine.high %v341_v49, %v345_v50  ;;  %v353_v60 = vld [vmem:[#allocation3 + $0x8e8] sm:$0xff] }
  0xa6   :  { %v397_v48 = vld [vmem:[#allocation3 + $0xa48] sm:$0xff] }
  0xa8   :  { %2876 = vmatpush1.bf16.msra.mxu0 %v4560_v62  ;;  %3040 = vmatpush1.bf16.msra.mxu1 %v4562_v0  ;;  %v4618_v62 = vcombine.low %v341_v49, %v345_v50  ;;  %v4625_v0 = vcombine.high %v348_v56, %v352_v57  ;;  %v401_v49 = vld [vmem:[#allocation3 + $0xa68] sm:$0xff]  ;;  %v4664_v50 = vcombine.low %v388_v35, %v392_v38  ;;  %v408_v56 = vld [vmem:[#allocation3 + $0xaa0] sm:$0xff] }
  0xa9   :  { %2877 = vmatprep.subr.bf16.mxu0 %v4569_v1  ;;  %3041 = vmatprep.subr.bf16.mxu1 %v4571_v5  ;;  %v4627_v1 = vcombine.high %v349_v58, %v353_v60  ;;  %v361_v5 = vld [vmem:[#allocation3 + $0x928] sm:$0xff] }
  0xaa   :  { %v405_v57 = vld [vmem:[#allocation3 + $0xa88] sm:$0xff] }
  0xac   :  { %2878 = vmatpush1.bf16.msra.mxu0 %v4568_v7  ;;  %3042 = vmatpush1.bf16.msra.mxu1 %v4570_v8  ;;  %v4626_v7 = vcombine.low %v349_v58, %v353_v60  ;;  %v4633_v8 = vcombine.high %v356_v2, %v360_v3  ;;  %v409_v58 = vld [vmem:[#allocation3 + $0xaa8] sm:$0xff]  ;;  %v416_v2 = vld [vmem:[#allocation3 + $0xae0] sm:$0xff] }
  0xad   :  { %2879 = vmatprep.subr.bf16.mxu0 %v4577_v10  ;;  %3043 = vmatprep.subr.bf16.mxu1 %v4579_v14  ;;  %v4635_v10 = vcombine.high %v357_v4, %v361_v5  ;;  %v369_v14 = vld [vmem:[#allocation3 + $0x968] sm:$0xff] }
  0xae   :  { %v413_v3 = vld [vmem:[#allocation3 + $0xac8] sm:$0xff] }
  0xb0   :  { %2880 = vmatpush1.bf16.msra.mxu0 %v4576_v16  ;;  %3044 = vmatpush1.bf16.msra.mxu1 %v4578_v17  ;;  %v4634_v16 = vcombine.low %v357_v4, %v361_v5  ;;  %v4641_v17 = vcombine.high %v364_v11, %v368_v12  ;;  %v417_v4 = vld [vmem:[#allocation3 + $0xae8] sm:$0xff]  ;;  %v424_v11 = vld [vmem:[#allocation3 + $0xb20] sm:$0xff] }
  0xb1   :  { %2881 = vmatprep.subr.bf16.mxu0 %v4585_v18  ;;  %3045 = vmatprep.subr.bf16.mxu1 %v4587_v22  ;;  %v4643_v18 = vcombine.high %v365_v13, %v369_v14  ;;  %v377_v22 = vld [vmem:[#allocation3 + $0x9a8] sm:$0xff] }
  0xb2   :  { %v421_v12 = vld [vmem:[#allocation3 + $0xb08] sm:$0xff] }
  0xb4   :  { %2882 = vmatpush1.bf16.msra.mxu0 %v4584_v24  ;;  %3046 = vmatpush1.bf16.msra.mxu1 %v4586_v26  ;;  %v4642_v24 = vcombine.low %v365_v13, %v369_v14  ;;  %v4649_v26 = vcombine.high %v372_v19, %v376_v20  ;;  %v425_v13 = vld [vmem:[#allocation3 + $0xb28] sm:$0xff]  ;;  %v432_v19 = vld [vmem:[#allocation3 + $0xb60] sm:$0xff] }
  0xb5   :  { %2883 = vmatprep.subr.bf16.mxu0 %v4593_v27  ;;  %3047 = vmatprep.subr.bf16.mxu1 %v4595_v30  ;;  %v4651_v27 = vcombine.high %v373_v21, %v377_v22  ;;  %v385_v30 = vld [vmem:[#allocation3 + $0x9e8] sm:$0xff] }
  0xb6   :  { %v429_v20 = vld [vmem:[#allocation3 + $0xb48] sm:$0xff] }
  0xb8   :  { %2884 = vmatpush1.bf16.msra.mxu0 %v4592_v32  ;;  %3048 = vmatpush1.bf16.msra.mxu1 %v4594_v33  ;;  %v4650_v32 = vcombine.low %v373_v21, %v377_v22  ;;  %v4657_v33 = vcombine.high %v380_v28, %v384_v29  ;;  %v433_v21 = vld [vmem:[#allocation3 + $0xb68] sm:$0xff]  ;;  %v440_v28 = vld [vmem:[#allocation3 + $0xba0] sm:$0xff] }
  0xb9   :  { %2894 = vmatprep.subr.bf16.mxu0 %v4601_v34  ;;  %3058 = vmatprep.subr.bf16.mxu1 %v4603_v40  ;;  %v4659_v34 = vcombine.high %v381_v59, %v385_v30  ;;  %v393_v40 = vld [vmem:[#allocation3 + $0xa28] sm:$0xff] }
  0xba   :  { %v437_v29 = vld [vmem:[#allocation3 + $0xb88] sm:$0xff] }
  0xbb   :  { %2886 = vmatmul.mubr.bf16.vlgmr.msra.gmra.mrb[0].mxu0 %v5287_v42  ;;  %3050 = vmatmul.mubr.bf16.vlgmr.msra.gmra.mrb[0].mxu1 %v5287_v42 }
  0xbc   :  { %2895 = vmatpush1.bf16.msra.mxu0 %v4600_v43  ;;  %3059 = vmatpush1.bf16.msra.mxu1 %v4602_v45  ;;  %v4658_v43 = vcombine.low %v381_v59, %v385_v30  ;;  %v4665_v45 = vcombine.high %v388_v35, %v392_v38  ;;  %v441_v59 = vld [vmem:[#allocation3 + $0xba8] sm:$0xff]  ;;  %v448_v35 = vld [vmem:[#allocation3 + $0xbe0] sm:$0xff] }
  0xbd   :  { %2896 = vmatprep.subr.bf16.mxu0 %v4609_v46  ;;  %3060 = vmatprep.subr.bf16.mxu1 %v4611_v53  ;;  %v4667_v46 = vcombine.high %v389_v39, %v393_v40  ;;  %v396_v53 = vld [vmem:[#allocation3 + $0xa40] sm:$0xff]  ;;  %v445_v38 = vld [vmem:[#allocation3 + $0xbc8] sm:$0xff] }
  0xbe   :  { %2926 = vmatprep.mubr.bf16.mxu0 %v5276_v63  ;;  %3090 = vmatprep.mubr.bf16.mxu1 %v5276_v63  ;;  %v4672_v60 = vcombine.low %v396_v53, %v400_v47 }
  0xc0   :  { %2897 = vmatpush1.bf16.msra.mxu0 %v4608_v51  ;;  %3061 = vmatpush1.bf16.msra.mxu1 %v4610_v52  ;;  %v4666_v51 = vcombine.low %v389_v39, %v393_v40  ;;  %v4673_v52 = vcombine.high %v396_v53, %v400_v47  ;;  %v449_v39 = vld [vmem:[#allocation3 + $0xbe8] sm:$0xff]  ;;  %v456_v53 = vld [vmem:[#allocation3 + $0xc20] sm:$0xff] }
  0xc1   :  { %2898 = vmatprep.subr.bf16.mxu0 %v4617_v54  ;;  %3062 = vmatprep.subr.bf16.mxu1 %v4619_v55  ;;  %v4675_v54 = vcombine.high %v397_v48, %v401_v49  ;;  %v404_v55 = vld [vmem:[#allocation3 + $0xa80] sm:$0xff]  ;;  %v453_v47 = vld [vmem:[#allocation3 + $0xc08] sm:$0xff] }
  0xc2   :  { %v4680_v5 = vcombine.low %v404_v55, %v408_v56 }
  0xc4   :  { %2899 = vmatpush1.bf16.msra.mxu0 %v4616_v61  ;;  %3063 = vmatpush1.bf16.msra.mxu1 %v4618_v62  ;;  %v4674_v61 = vcombine.low %v397_v48, %v401_v49  ;;  %v4681_v62 = vcombine.high %v404_v55, %v408_v56  ;;  %v457_v48 = vld [vmem:[#allocation3 + $0xc28] sm:$0xff]  ;;  %v464_v55 = vld [vmem:[#allocation3 + $0xc60] sm:$0xff] }
  0xc5   :  { %2900 = vmatprep.subr.bf16.mxu0 %v4625_v0  ;;  %3064 = vmatprep.subr.bf16.mxu1 %v4627_v1  ;;  %v4683_v0 = vcombine.high %v405_v57, %v409_v58  ;;  %v412_v1 = vld [vmem:[#allocation3 + $0xac0] sm:$0xff]  ;;  %v461_v56 = vld [vmem:[#allocation3 + $0xc48] sm:$0xff] }
  0xc6   :  { %v4688_v14 = vcombine.low %v412_v1, %v416_v2 }
  0xc8   :  { %2901 = vmatpush1.bf16.msra.mxu0 %v4624_v6  ;;  %3065 = vmatpush1.bf16.msra.mxu1 %v4626_v7  ;;  %v4682_v6 = vcombine.low %v405_v57, %v409_v58  ;;  %v4689_v7 = vcombine.high %v412_v1, %v416_v2  ;;  %v465_v57 = vld [vmem:[#allocation3 + $0xc68] sm:$0xff]  ;;  %v472_v1 = vld [vmem:[#allocation3 + $0xca0] sm:$0xff] }
  0xc9   :  { %2902 = vmatprep.subr.bf16.mxu0 %v4633_v8  ;;  %3066 = vmatprep.subr.bf16.mxu1 %v4635_v10  ;;  %v4691_v8 = vcombine.high %v413_v3, %v417_v4  ;;  %v420_v10 = vld [vmem:[#allocation3 + $0xb00] sm:$0xff]  ;;  %v469_v2 = vld [vmem:[#allocation3 + $0xc88] sm:$0xff] }
  0xca   :  { %v4696_v22 = vcombine.low %v420_v10, %v424_v11 }
  0xcc   :  { %2903 = vmatpush1.bf16.msra.mxu0 %v4632_v15  ;;  %3067 = vmatpush1.bf16.msra.mxu1 %v4634_v16  ;;  %v4690_v15 = vcombine.low %v413_v3, %v417_v4  ;;  %v4697_v16 = vcombine.high %v420_v10, %v424_v11  ;;  %v473_v3 = vld [vmem:[#allocation3 + $0xca8] sm:$0xff]  ;;  %v480_v10 = vld [vmem:[#allocation3 + $0xce0] sm:$0xff]  ;;  %v5167_v11 = vmov 0  }
  0xcd   :  { %2904 = vmatprep.subr.bf16.mxu0 %v4641_v17  ;;  %3068 = vmatprep.subr.bf16.mxu1 %v4643_v18  ;;  %v4699_v17 = vcombine.high %v421_v12, %v425_v13  ;;  %v428_v18 = vld [vmem:[#allocation3 + $0xb40] sm:$0xff] }
  0xce   :  { %v4704_v30 = vcombine.low %v428_v18, %v432_v19 }
  0xd0   :  { %2905 = vmatpush1.bf16.msra.mxu0 %v4640_v23  ;;  %3069 = vmatpush1.bf16.msra.mxu1 %v4642_v24  ;;  %v4698_v23 = vcombine.low %v421_v12, %v425_v13  ;;  %v4705_v24 = vcombine.high %v428_v18, %v432_v19  ;;  %v477_v12 = vld [vmem:[#allocation3 + $0xcc8] sm:$0xff]  ;;  %v484_v18 = vld [vmem:[#allocation3 + $0xd00] sm:$0xff] }
  0xd1   :  { %2906 = vmatprep.subr.bf16.mxu0 %v4649_v26  ;;  %3070 = vmatprep.subr.bf16.mxu1 %v4651_v27  ;;  %v4707_v26 = vcombine.high %v429_v20, %v433_v21  ;;  %v436_v27 = vld [vmem:[#allocation3 + $0xb80] sm:$0xff]  ;;  %v481_v13 = vld [vmem:[#allocation3 + $0xce8] sm:$0xff] }
  0xd2   :  { %v4712_v40 = vcombine.low %v436_v27, %v440_v28  ;;  %v488_v19 = vld [vmem:[#allocation3 + $0xd20] sm:$0xff] }
  0xd4   :  { %2907 = vmatpush1.bf16.msra.mxu0 %v4648_v31  ;;  %3071 = vmatpush1.bf16.msra.mxu1 %v4650_v32  ;;  %v4706_v31 = vcombine.low %v429_v20, %v433_v21  ;;  %v4713_v32 = vcombine.high %v436_v27, %v440_v28  ;;  %v485_v20 = vld [vmem:[#allocation3 + $0xd08] sm:$0xff]  ;;  %v492_v27 = vld [vmem:[#allocation3 + $0xd40] sm:$0xff] }
  0xd5   :  { %2908 = vmatprep.subr.bf16.mxu0 %v4657_v33  ;;  %3072 = vmatprep.subr.bf16.mxu1 %v4659_v34  ;;  %v4715_v33 = vcombine.high %v437_v29, %v441_v59  ;;  %v444_v34 = vld [vmem:[#allocation3 + $0xbc0] sm:$0xff]  ;;  %v489_v21 = vld [vmem:[#allocation3 + $0xd28] sm:$0xff] }
  0xd6   :  { %v4720_v49 = vcombine.low %v444_v34, %v448_v35  ;;  %v496_v28 = vld [vmem:[#allocation3 + $0xd60] sm:$0xff] }
  0xd8   :  { %2909 = vmatpush1.bf16.msra.mxu0 %v4656_v41  ;;  %3073 = vmatpush1.bf16.msra.mxu1 %v4658_v43  ;;  %v4714_v41 = vcombine.low %v437_v29, %v441_v59  ;;  %v4721_v43 = vcombine.high %v444_v34, %v448_v35  ;;  %v493_v29 = vld [vmem:[#allocation3 + $0xd48] sm:$0xff]  ;;  %v500_v34 = vld [vmem:[#allocation3 + $0xd80] sm:$0xff] }
  0xd9   :  { %2910 = vmatprep.subr.bf16.mxu0 %v4665_v45  ;;  %3074 = vmatprep.subr.bf16.mxu1 %v4667_v46  ;;  %v4723_v45 = vcombine.high %v445_v38, %v449_v39  ;;  %v452_v46 = vld [vmem:[#allocation3 + $0xc00] sm:$0xff]  ;;  %v497_v59 = vld [vmem:[#allocation3 + $0xd68] sm:$0xff] }
  0xda   :  { %v4728_v58 = vcombine.low %v452_v46, %v456_v53  ;;  %v504_v35 = vld [vmem:[#allocation3 + $0xda0] sm:$0xff] }
  0xdc   :  { %2911 = vmatpush1.bf16.msra.mxu0 %v4664_v50  ;;  %3075 = vmatpush1.bf16.msra.mxu1 %v4666_v51  ;;  %v4722_v50 = vcombine.low %v445_v38, %v449_v39  ;;  %v4729_v51 = vcombine.high %v452_v46, %v456_v53  ;;  %v501_v38 = vld [vmem:[#allocation3 + $0xd88] sm:$0xff]  ;;  %v508_v46 = vld [vmem:[#allocation3 + $0xdc0] sm:$0xff] }
  0xdd   :  { %2912 = vmatprep.subr.bf16.mxu0 %v4673_v52  ;;  %3076 = vmatprep.subr.bf16.mxu1 %v4675_v54  ;;  %v4731_v52 = vcombine.high %v453_v47, %v457_v48  ;;  %v460_v54 = vld [vmem:[#allocation3 + $0xc40] sm:$0xff]  ;;  %v505_v39 = vld [vmem:[#allocation3 + $0xda8] sm:$0xff] }
  0xde   :  { %v4736_v4 = vcombine.low %v460_v54, %v464_v55  ;;  %v512_v53 = vld [vmem:[#allocation3 + $0xde0] sm:$0xff] }
  0xe0   :  { %2913 = vmatpush1.bf16.msra.mxu0 %v4672_v60  ;;  %3077 = vmatpush1.bf16.msra.mxu1 %v4674_v61  ;;  %v4730_v60 = vcombine.low %v453_v47, %v457_v48  ;;  %v4737_v61 = vcombine.high %v460_v54, %v464_v55  ;;  %v509_v47 = vld [vmem:[#allocation3 + $0xdc8] sm:$0xff]  ;;  %v70_v54 = vld [vmem:[#allocation3 + $0x10] sm:$0xff] }
  0xe1   :  { %2914 = vmatprep.subr.bf16.mxu0 %v4681_v62  ;;  %3078 = vmatprep.subr.bf16.mxu1 %v4683_v0  ;;  %v4739_v62 = vcombine.high %v461_v56, %v465_v57  ;;  %v468_v0 = vld [vmem:[#allocation3 + $0xc80] sm:$0xff]  ;;  %v513_v48 = vld [vmem:[#allocation3 + $0xde8] sm:$0xff]  ;;  %v74_v55 = vld [vmem:[#allocation3 + $0x30] sm:$0xff] }
  0xe4   :  { %2915 = vmatpush1.bf16.msra.mxu0 %v4680_v5  ;;  %3079 = vmatpush1.bf16.msra.mxu1 %v4682_v6  ;;  %v4738_v5 = vcombine.low %v461_v56, %v465_v57  ;;  %v4745_v6 = vcombine.high %v468_v0, %v472_v1  ;;  %v71_v56 = vld [vmem:[#allocation3 + $0x18] sm:$0xff] }
  0xe5   :  { %2916 = vmatprep.subr.bf16.mxu0 %v4689_v7  ;;  %3080 = vmatprep.subr.bf16.mxu1 %v4691_v8  ;;  %v4747_v7 = vcombine.high %v469_v2, %v473_v3  ;;  %v476_v8 = vld [vmem:[#allocation3 + $0xcc0] sm:$0xff]  ;;  %v75_v57 = vld [vmem:[#allocation3 + $0x38] sm:$0xff] }
  0xe8   :  { %2917 = vmatpush1.bf16.msra.mxu0 %v4688_v14  ;;  %3081 = vmatpush1.bf16.msra.mxu1 %v4690_v15  ;;  %v4744_v14 = vcombine.low %v468_v0, %v472_v1  ;;  %v4746_v15 = vcombine.low %v469_v2, %v473_v3  ;;  %v78_v0 = vld [vmem:[#allocation3 + $0x50] sm:$0xff]  ;;  %v5299_v2 = vcombine.high %v5279_v37, %v5279_v37  ;;  %v79_v3 = vld [vmem:[#allocation3 + $0x58] sm:$0xff] }
  0xe9   :  { %2918 = vmatprep.subr.bf16.mxu0 %v4697_v16  ;;  %3082 = vmatprep.subr.bf16.mxu1 %v4699_v17  ;;  %v4753_v16 = vcombine.high %v476_v8, %v480_v10  ;;  %v4755_v17 = vcombine.high %v477_v12, %v481_v13  ;;  %v82_v1 = vld [vmem:[#allocation3 + $0x70] sm:$0xff] }
  0xec   :  { %2919 = vmatpush1.bf16.msra.mxu0 %v4696_v22  ;;  %3083 = vmatpush1.bf16.msra.mxu1 %v4698_v23  ;;  %v4752_v22 = vcombine.low %v476_v8, %v480_v10  ;;  %v4754_v23 = vcombine.low %v477_v12, %v481_v13  ;;  %v86_v10 = vld [vmem:[#allocation3 + $0x90] sm:$0xff]  ;;  %v87_v13 = vld [vmem:[#allocation3 + $0x98] sm:$0xff] }
  0xed   :  { %2920 = vmatprep.subr.bf16.mxu0 %v4705_v24  ;;  %3084 = vmatprep.subr.bf16.mxu1 %v4707_v26  ;;  %v4761_v24 = vcombine.high %v484_v18, %v488_v19  ;;  %v4763_v26 = vcombine.high %v485_v20, %v489_v21  ;;  %v90_v12 = vld [vmem:[#allocation3 + $0xb0] sm:$0xff] }
  0xf0   :  { %2921 = vmatpush1.bf16.msra.mxu0 %v4704_v30  ;;  %3085 = vmatpush1.bf16.msra.mxu1 %v4706_v31  ;;  %v4760_v30 = vcombine.low %v484_v18, %v488_v19  ;;  %v4762_v31 = vcombine.low %v485_v20, %v489_v21  ;;  %v94_v19 = vld [vmem:[#allocation3 + $0xd0] sm:$0xff]  ;;  %v95_v21 = vld [vmem:[#allocation3 + $0xd8] sm:$0xff] }
  0xf1   :  { %2922 = vmatprep.subr.bf16.mxu0 %v4713_v32  ;;  %3086 = vmatprep.subr.bf16.mxu1 %v4715_v33  ;;  %v4769_v32 = vcombine.high %v492_v27, %v496_v28  ;;  %v4771_v33 = vcombine.high %v493_v29, %v497_v59  ;;  %v98_v20 = vld [vmem:[#allocation3 + $0xf0] sm:$0xff] }
  0xf4   :  { %2923 = vmatpush1.bf16.msra.mxu0 %v4712_v40  ;;  %3087 = vmatpush1.bf16.msra.mxu1 %v4714_v41  ;;  %v4768_v40 = vcombine.low %v492_v27, %v496_v28  ;;  %v4770_v41 = vcombine.low %v493_v29, %v497_v59  ;;  %v102_v28 = vld [vmem:[#allocation3 + $0x110] sm:$0xff]  ;;  %v103_v59 = vld [vmem:[#allocation3 + $0x118] sm:$0xff] }
  0xf5   :  { %2924 = vmatprep.subr.bf16.mxu0 %v4721_v43  ;;  %3088 = vmatprep.subr.bf16.mxu1 %v4723_v45  ;;  %v4777_v43 = vcombine.high %v500_v34, %v504_v35  ;;  %v4779_v45 = vcombine.high %v501_v38, %v505_v39  ;;  %v106_v29 = vld [vmem:[#allocation3 + $0x130] sm:$0xff] }
  0xf8   :  { %2925 = vmatpush1.bf16.msra.mxu0 %v4720_v49  ;;  %3089 = vmatpush1.bf16.msra.mxu1 %v4722_v50  ;;  %v4776_v49 = vcombine.low %v500_v34, %v504_v35  ;;  %v4778_v50 = vcombine.low %v501_v38, %v505_v39  ;;  %v110_v34 = vld [vmem:[#allocation3 + $0x150] sm:$0xff]  ;;  %v111_v38 = vld [vmem:[#allocation3 + $0x158] sm:$0xff] }
  0xf9   :  { %2935 = vmatprep.subr.bf16.mxu0 %v4729_v51  ;;  %3099 = vmatprep.subr.bf16.mxu1 %v4731_v52  ;;  %v4785_v51 = vcombine.high %v508_v46, %v512_v53  ;;  %v4787_v52 = vcombine.high %v509_v47, %v513_v48  ;;  %v114_v35 = vld [vmem:[#allocation3 + $0x170] sm:$0xff]  ;;  %v115_v39 = vld [vmem:[#allocation3 + $0x178] sm:$0xff] }
  0xfb   :  { %2927 = vmatmul.mubr.bf16.vlgmr.msra.gmra.mrb[0].mxu0 %v5279_v37  ;;  %3091 = vmatmul.mubr.bf16.vlgmr.msra.gmra.mrb[0].mxu1 %v5279_v37 }
  0xfc   :  { %2936 = vmatpush1.bf16.msra.mxu0 %v4728_v58  ;;  %3100 = vmatpush1.bf16.msra.mxu1 %v4730_v60  ;;  %v4784_v58 = vcombine.low %v508_v46, %v512_v53  ;;  %v4786_v60 = vcombine.low %v509_v47, %v513_v48  ;;  %v118_v46 = vld [vmem:[#allocation3 + $0x190] sm:$0xff]  ;;  %v119_v47 = vld [vmem:[#allocation3 + $0x198] sm:$0xff] }
  0xfd   :  { %2937 = vmatprep.subr.bf16.mxu0 %v4737_v61  ;;  %3101 = vmatprep.subr.bf16.mxu1 %v4739_v62  ;;  %v4349_v61 = vcombine.high %v70_v54, %v74_v55  ;;  %v4351_v62 = vcombine.high %v71_v56, %v75_v57  ;;  %v122_v53 = vld [vmem:[#allocation3 + $0x1b0] sm:$0xff]  ;;  %v123_v48 = vld [vmem:[#allocation3 + $0x1b8] sm:$0xff] }
  0xfe   :  { %2967 = vmatprep.mubr.bf16.mxu0 %v5167_v11  ;;  %3131 = vmatprep.mubr.bf16.mxu1 %v5167_v11 }
 0x100   :  { %2938 = vmatpush1.bf16.msra.mxu0 %v4736_v4  ;;  %3102 = vmatpush1.bf16.msra.mxu1 %v4738_v5  ;;  %v83_v4 = vld [vmem:[#allocation3 + $0x78] sm:$0xff]  ;;  %v4348_v5 = vcombine.low %v70_v54, %v74_v55  ;;  %v126_v54 = vld [vmem:[#allocation3 + $0x1d0] sm:$0xff] }
 0x101   :  { %2939 = vmatprep.subr.bf16.mxu0 %v4745_v6  ;;  %3103 = vmatprep.subr.bf16.mxu1 %v4747_v7  ;;  %v4350_v6 = vcombine.low %v71_v56, %v75_v57  ;;  %v4357_v7 = vcombine.high %v78_v0, %v82_v1  ;;  %v4359_v8 = vcombine.high %v79_v3, %v83_v4  ;;  %v130_v55 = vld [vmem:[#allocation3 + $0x1f0] sm:$0xff]  ;;  %v127_v56 = vld [vmem:[#allocation3 + $0x1d8] sm:$0xff] }
 0x102   :  { %v131_v57 = vld [vmem:[#allocation3 + $0x1f8] sm:$0xff] }
 0x104   :  { %2940 = vmatpush1.bf16.msra.mxu0 %v4744_v14  ;;  %3104 = vmatpush1.bf16.msra.mxu1 %v4746_v15  ;;  %v91_v14 = vld [vmem:[#allocation3 + $0xb8] sm:$0xff]  ;;  %v4356_v15 = vcombine.low %v78_v0, %v82_v1  ;;  %v134_v0 = vld [vmem:[#allocation3 + $0x210] sm:$0xff] }
 0x105   :  { %2941 = vmatprep.subr.bf16.mxu0 %v4753_v16  ;;  %3105 = vmatprep.subr.bf16.mxu1 %v4755_v17  ;;  %v4358_v16 = vcombine.low %v79_v3, %v83_v4  ;;  %v4365_v17 = vcombine.high %v86_v10, %v90_v12  ;;  %v4367_v18 = vcombine.high %v87_v13, %v91_v14  ;;  %v138_v1 = vld [vmem:[#allocation3 + $0x230] sm:$0xff]  ;;  %v135_v3 = vld [vmem:[#allocation3 + $0x218] sm:$0xff] }
 0x106   :  { %v139_v4 = vld [vmem:[#allocation3 + $0x238] sm:$0xff] }
 0x108   :  { %2942 = vmatpush1.bf16.msra.mxu0 %v4752_v22  ;;  %3106 = vmatpush1.bf16.msra.mxu1 %v4754_v23  ;;  %v99_v22 = vld [vmem:[#allocation3 + $0xf8] sm:$0xff]  ;;  %v4364_v23 = vcombine.low %v86_v10, %v90_v12  ;;  %v142_v10 = vld [vmem:[#allocation3 + $0x250] sm:$0xff] }
 0x109   :  { %2943 = vmatprep.subr.bf16.mxu0 %v4761_v24  ;;  %3107 = vmatprep.subr.bf16.mxu1 %v4763_v26  ;;  %v4366_v24 = vcombine.low %v87_v13, %v91_v14  ;;  %v4373_v26 = vcombine.high %v94_v19, %v98_v20  ;;  %v4375_v27 = vcombine.high %v95_v21, %v99_v22  ;;  %v146_v12 = vld [vmem:[#allocation3 + $0x270] sm:$0xff]  ;;  %v143_v13 = vld [vmem:[#allocation3 + $0x258] sm:$0xff] }
 0x10a   :  { %v147_v14 = vld [vmem:[#allocation3 + $0x278] sm:$0xff] }
 0x10c   :  { %2944 = vmatpush1.bf16.msra.mxu0 %v4760_v30  ;;  %3108 = vmatpush1.bf16.msra.mxu1 %v4762_v31  ;;  %v107_v30 = vld [vmem:[#allocation3 + $0x138] sm:$0xff]  ;;  %v4372_v31 = vcombine.low %v94_v19, %v98_v20  ;;  %v150_v19 = vld [vmem:[#allocation3 + $0x290] sm:$0xff] }
 0x10d   :  { %2945 = vmatprep.subr.bf16.mxu0 %v4769_v32  ;;  %3109 = vmatprep.subr.bf16.mxu1 %v4771_v33  ;;  %v4374_v32 = vcombine.low %v95_v21, %v99_v22  ;;  %v4381_v33 = vcombine.high %v102_v28, %v106_v29  ;;  %v154_v20 = vld [vmem:[#allocation3 + $0x2b0] sm:$0xff]  ;;  %v151_v21 = vld [vmem:[#allocation3 + $0x298] sm:$0xff] }
 0x10e   :  { %v155_v22 = vld [vmem:[#allocation3 + $0x2b8] sm:$0xff] }
 0x110   :  { %2946 = vmatpush1.bf16.msra.mxu0 %v4768_v40  ;;  %3110 = vmatpush1.bf16.msra.mxu1 %v4770_v41  ;;  %v4380_v40 = vcombine.low %v102_v28, %v106_v29  ;;  %v4382_v41 = vcombine.low %v103_v59, %v107_v30  ;;  %v158_v28 = vld [vmem:[#allocation3 + $0x2d0] sm:$0xff] }
 0x111   :  { %2947 = vmatprep.subr.bf16.mxu0 %v4777_v43  ;;  %3111 = vmatprep.subr.bf16.mxu1 %v4779_v45  ;;  %v4389_v43 = vcombine.high %v110_v34, %v114_v35  ;;  %v4391_v45 = vcombine.high %v111_v38, %v115_v39  ;;  %v162_v29 = vld [vmem:[#allocation3 + $0x2f0] sm:$0xff] }
 0x114   :  { %2948 = vmatpush1.bf16.msra.mxu0 %v4776_v49  ;;  %3112 = vmatpush1.bf16.msra.mxu1 %v4778_v50  ;;  %v4388_v49 = vcombine.low %v110_v34, %v114_v35  ;;  %v4390_v50 = vcombine.low %v111_v38, %v115_v39  ;;  %v166_v34 = vld [vmem:[#allocation3 + $0x310] sm:$0xff]  ;;  %v167_v38 = vld [vmem:[#allocation3 + $0x318] sm:$0xff] }
 0x115   :  { %2949 = vmatprep.subr.bf16.mxu0 %v4785_v51  ;;  %3113 = vmatprep.subr.bf16.mxu1 %v4787_v52  ;;  %v4397_v51 = vcombine.high %v118_v46, %v122_v53  ;;  %v4399_v52 = vcombine.high %v119_v47, %v123_v48  ;;  %v170_v35 = vld [vmem:[#allocation3 + $0x330] sm:$0xff]  ;;  %v171_v39 = vld [vmem:[#allocation3 + $0x338] sm:$0xff] }
 0x118   :  { %2950 = vmatpush1.bf16.msra.mxu0 %v4784_v58  ;;  %3114 = vmatpush1.bf16.msra.mxu1 %v4786_v60  ;;  %v4396_v58 = vcombine.low %v118_v46, %v122_v53  ;;  %v4398_v60 = vcombine.low %v119_v47, %v123_v48  ;;  %v174_v46 = vld [vmem:[#allocation3 + $0x350] sm:$0xff]  ;;  %v175_v47 = vld [vmem:[#allocation3 + $0x358] sm:$0xff] }
 0x119   :  { %3140 = vmatprep.subr.bf16.mxu0 %v4349_v61  ;;  %3304 = vmatprep.subr.bf16.mxu1 %v4351_v62  ;;  %v4405_v61 = vcombine.high %v126_v54, %v130_v55  ;;  %v4407_v62 = vcombine.high %v127_v56, %v131_v57  ;;  %v178_v53 = vld [vmem:[#allocation3 + $0x370] sm:$0xff]  ;;  %v179_v48 = vld [vmem:[#allocation3 + $0x378] sm:$0xff] }
 0x11b   :  { %2968 = vmatmul.mubr.bf16.vlgmr.msra.gmra.mrb[0].mxu0 %v5299_v2  ;;  %3132 = vmatmul.mubr.bf16.vlgmr.msra.gmra.mrb[0].mxu1 %v5299_v2 }
 0x11c   :  { %3141 = vmatpush1.bf16.msra.mxu0 %v4348_v5  ;;  %3305 = vmatpush1.bf16.msra.mxu1 %v4350_v6  ;;  %v4404_v5 = vcombine.low %v126_v54, %v130_v55  ;;  %v4406_v6 = vcombine.low %v127_v56, %v131_v57  ;;  %v182_v54 = vld [vmem:[#allocation3 + $0x390] sm:$0xff]  ;;  %v183_v56 = vld [vmem:[#allocation3 + $0x398] sm:$0xff] }
 0x11d   :  { %3142 = vmatprep.subr.bf16.mxu0 %v4357_v7  ;;  %3306 = vmatprep.subr.bf16.mxu1 %v4359_v8  ;;  %v4413_v7 = vcombine.high %v134_v0, %v138_v1  ;;  %v4415_v8 = vcombine.high %v135_v3, %v139_v4  ;;  %v186_v55 = vld [vmem:[#allocation3 + $0x3b0] sm:$0xff]  ;;  %v187_v57 = vld [vmem:[#allocation3 + $0x3b8] sm:$0xff] }
 0x11e   :  { %3172 = vmatprep.mubr.bf16.mxu0 %v5260_v9  ;;  %3336 = vmatprep.mubr.bf16.mxu1 %v5260_v9  ;;  %v4383_v9 = vcombine.high %v103_v59, %v107_v30  ;;  %v159_v59 = vld [vmem:[#allocation3 + $0x2d8] sm:$0xff] }
 0x11f   :  { %v163_v30 = vld [vmem:[#allocation3 + $0x2f8] sm:$0xff] }
 0x120   :  { %3143 = vmatpush1.bf16.msra.mxu0 %v4356_v15  ;;  %3307 = vmatpush1.bf16.msra.mxu1 %v4358_v16  ;;  %v4412_v15 = vcombine.low %v134_v0, %v138_v1  ;;  %v4414_v16 = vcombine.low %v135_v3, %v139_v4  ;;  %v190_v0 = vld [vmem:[#allocation3 + $0x3d0] sm:$0xff]  ;;  %v191_v3 = vld [vmem:[#allocation3 + $0x3d8] sm:$0xff] }
 0x121   :  { %3144 = vmatprep.subr.bf16.mxu0 %v4365_v17  ;;  %3308 = vmatprep.subr.bf16.mxu1 %v4367_v18  ;;  %v4421_v17 = vcombine.high %v142_v10, %v146_v12  ;;  %v4423_v18 = vcombine.high %v143_v13, %v147_v14  ;;  %v194_v1 = vld [vmem:[#allocation3 + $0x3f0] sm:$0xff]  ;;  %v195_v4 = vld [vmem:[#allocation3 + $0x3f8] sm:$0xff] }
 0x124   :  { %3145 = vmatpush1.bf16.msra.mxu0 %v4364_v23  ;;  %3309 = vmatpush1.bf16.msra.mxu1 %v4366_v24  ;;  %v4420_v23 = vcombine.low %v142_v10, %v146_v12  ;;  %v4422_v24 = vcombine.low %v143_v13, %v147_v14  ;;  %v198_v10 = vld [vmem:[#allocation3 + $0x410] sm:$0xff]  ;;  %v199_v13 = vld [vmem:[#allocation3 + $0x418] sm:$0xff] }
 0x125   :  { %3146 = vmatprep.subr.bf16.mxu0 %v4373_v26  ;;  %3310 = vmatprep.subr.bf16.mxu1 %v4375_v27  ;;  %v4429_v26 = vcombine.high %v150_v19, %v154_v20  ;;  %v4431_v27 = vcombine.high %v151_v21, %v155_v22  ;;  %v202_v12 = vld [vmem:[#allocation3 + $0x430] sm:$0xff]  ;;  %v203_v14 = vld [vmem:[#allocation3 + $0x438] sm:$0xff] }
 0x128   :  { %3147 = vmatpush1.bf16.msra.mxu0 %v4372_v31  ;;  %3311 = vmatpush1.bf16.msra.mxu1 %v4374_v32  ;;  %v4428_v31 = vcombine.low %v150_v19, %v154_v20  ;;  %v4430_v32 = vcombine.low %v151_v21, %v155_v22  ;;  %v206_v19 = vld [vmem:[#allocation3 + $0x450] sm:$0xff]  ;;  %v207_v21 = vld [vmem:[#allocation3 + $0x458] sm:$0xff] }
 0x129   :  { %3148 = vmatprep.subr.bf16.mxu0 %v4381_v33  ;;  %3312 = vmatprep.subr.bf16.mxu1 %v4383_v9  ;;  %v4437_v33 = vcombine.high %v158_v28, %v162_v29  ;;  %v4439_v9 = vcombine.high %v159_v59, %v163_v30  ;;  %v210_v20 = vld [vmem:[#allocation3 + $0x470] sm:$0xff]  ;;  %v211_v22 = vld [vmem:[#allocation3 + $0x478] sm:$0xff] }
 0x12c   :  { %3149 = vmatpush1.bf16.msra.mxu0 %v4380_v40  ;;  %3313 = vmatpush1.bf16.msra.mxu1 %v4382_v41  ;;  %v4436_v40 = vcombine.low %v158_v28, %v162_v29  ;;  %v4438_v41 = vcombine.low %v159_v59, %v163_v30  ;;  %v214_v28 = vld [vmem:[#allocation3 + $0x490] sm:$0xff]  ;;  %v215_v59 = vld [vmem:[#allocation3 + $0x498] sm:$0xff] }
 0x12d   :  { %3150 = vmatprep.subr.bf16.mxu0 %v4389_v43  ;;  %3314 = vmatprep.subr.bf16.mxu1 %v4391_v45  ;;  %v4445_v43 = vcombine.high %v166_v34, %v170_v35  ;;  %v4447_v45 = vcombine.high %v167_v38, %v171_v39  ;;  %v218_v29 = vld [vmem:[#allocation3 + $0x4b0] sm:$0xff]  ;;  %v219_v30 = vld [vmem:[#allocation3 + $0x4b8] sm:$0xff] }
 0x130   :  { %3151 = vmatpush1.bf16.msra.mxu0 %v4388_v49  ;;  %3315 = vmatpush1.bf16.msra.mxu1 %v4390_v50  ;;  %v4444_v49 = vcombine.low %v166_v34, %v170_v35  ;;  %v4446_v50 = vcombine.low %v167_v38, %v171_v39  ;;  %v222_v34 = vld [vmem:[#allocation3 + $0x4d0] sm:$0xff]  ;;  %v223_v38 = vld [vmem:[#allocation3 + $0x4d8] sm:$0xff] }
 0x131   :  { %3152 = vmatprep.subr.bf16.mxu0 %v4397_v51  ;;  %3316 = vmatprep.subr.bf16.mxu1 %v4399_v52  ;;  %v4453_v51 = vcombine.high %v174_v46, %v178_v53  ;;  %v4455_v52 = vcombine.high %v175_v47, %v179_v48  ;;  %v226_v35 = vld [vmem:[#allocation3 + $0x4f0] sm:$0xff]  ;;  %v227_v39 = vld [vmem:[#allocation3 + $0x4f8] sm:$0xff] }
 0x134   :  { %3153 = vmatpush1.bf16.msra.mxu0 %v4396_v58  ;;  %3317 = vmatpush1.bf16.msra.mxu1 %v4398_v60  ;;  %v4452_v58 = vcombine.low %v174_v46, %v178_v53  ;;  %v4454_v60 = vcombine.low %v175_v47, %v179_v48  ;;  %v234_v46 = vld [vmem:[#allocation3 + $0x530] sm:$0xff]  ;;  %v231_v53 = vld [vmem:[#allocation3 + $0x518] sm:$0xff]  ;;  %v4500_v48 = vcombine.low %v222_v34, %v226_v35 }
 0x135   :  { %3154 = vmatprep.subr.bf16.mxu0 %v4405_v61  ;;  %3318 = vmatprep.subr.bf16.mxu1 %v4407_v62  ;;  %v4461_v61 = vcombine.high %v182_v54, %v186_v55  ;;  %v4463_v62 = vcombine.high %v183_v56, %v187_v57  ;;  %v235_v47 = vld [vmem:[#allocation3 + $0x538] sm:$0xff] }
 0x138   :  { %3155 = vmatpush1.bf16.msra.mxu0 %v4404_v5  ;;  %3319 = vmatpush1.bf16.msra.mxu1 %v4406_v6  ;;  %v4460_v5 = vcombine.low %v182_v54, %v186_v55  ;;  %v4462_v6 = vcombine.low %v183_v56, %v187_v57  ;;  %v239_v54 = vld [vmem:[#allocation3 + $0x558] sm:$0xff]  ;;  %v4510_v57 = vcombine.low %v231_v53, %v235_v47 }
 0x139   :  { %3156 = vmatprep.subr.bf16.mxu0 %v4413_v7  ;;  %3320 = vmatprep.subr.bf16.mxu1 %v4415_v8  ;;  %v4469_v7 = vcombine.high %v190_v0, %v194_v1  ;;  %v4471_v8 = vcombine.high %v191_v3, %v195_v4  ;;  %v243_v55 = vld [vmem:[#allocation3 + $0x578] sm:$0xff] }
 0x13c   :  { %3157 = vmatpush1.bf16.msra.mxu0 %v4412_v15  ;;  %3321 = vmatpush1.bf16.msra.mxu1 %v4414_v16  ;;  %v4468_v15 = vcombine.low %v190_v0, %v194_v1  ;;  %v4470_v16 = vcombine.low %v191_v3, %v195_v4  ;;  %v247_v0 = vld [vmem:[#allocation3 + $0x598] sm:$0xff]  ;;  %v4518_v4 = vcombine.low %v239_v54, %v243_v55 }
 0x13d   :  { %3158 = vmatprep.subr.bf16.mxu0 %v4421_v17  ;;  %3322 = vmatprep.subr.bf16.mxu1 %v4423_v18  ;;  %v4477_v17 = vcombine.high %v198_v10, %v202_v12  ;;  %v4479_v18 = vcombine.high %v199_v13, %v203_v14  ;;  %v251_v1 = vld [vmem:[#allocation3 + $0x5b8] sm:$0xff] }
 0x140   :  { %3159 = vmatpush1.bf16.msra.mxu0 %v4420_v23  ;;  %3323 = vmatpush1.bf16.msra.mxu1 %v4422_v24  ;;  %v4476_v23 = vcombine.low %v198_v10, %v202_v12  ;;  %v4478_v24 = vcombine.low %v199_v13, %v203_v14  ;;  %v255_v10 = vld [vmem:[#allocation3 + $0x5d8] sm:$0xff]  ;;  %v4526_v14 = vcombine.low %v247_v0, %v251_v1 }
 0x141   :  { %3160 = vmatprep.subr.bf16.mxu0 %v4429_v26  ;;  %3324 = vmatprep.subr.bf16.mxu1 %v4431_v27  ;;  %v4485_v26 = vcombine.high %v206_v19, %v210_v20  ;;  %v4487_v27 = vcombine.high %v207_v21, %v211_v22  ;;  %v259_v12 = vld [vmem:[#allocation3 + $0x5f8] sm:$0xff] }
 0x144   :  { %3161 = vmatpush1.bf16.msra.mxu0 %v4428_v31  ;;  %3325 = vmatpush1.bf16.msra.mxu1 %v4430_v32  ;;  %v4484_v31 = vcombine.low %v206_v19, %v210_v20  ;;  %v4486_v32 = vcombine.low %v207_v21, %v211_v22  ;;  %v263_v19 = vld [vmem:[#allocation3 + $0x618] sm:$0xff]  ;;  %v4534_v22 = vcombine.low %v255_v10, %v259_v12 }
 0x145   :  { %3162 = vmatprep.subr.bf16.mxu0 %v4437_v33  ;;  %3326 = vmatprep.subr.bf16.mxu1 %v4439_v9  ;;  %v4493_v33 = vcombine.high %v214_v28, %v218_v29  ;;  %v4495_v9 = vcombine.high %v215_v59, %v219_v30  ;;  %v267_v20 = vld [vmem:[#allocation3 + $0x638] sm:$0xff] }
 0x148   :  { %3163 = vmatpush1.bf16.msra.mxu0 %v4436_v40  ;;  %3327 = vmatpush1.bf16.msra.mxu1 %v4438_v41  ;;  %v4492_v40 = vcombine.low %v214_v28, %v218_v29  ;;  %v4501_v41 = vcombine.high %v222_v34, %v226_v35  ;;  %v271_v28 = vld [vmem:[#allocation3 + $0x658] sm:$0xff] }
 0x149   :  { %3164 = vmatprep.subr.bf16.mxu0 %v4445_v43  ;;  %3328 = vmatprep.subr.bf16.mxu1 %v4447_v45  ;;  %v4503_v43 = vcombine.high %v223_v38, %v227_v39  ;;  %v230_v45 = vld [vmem:[#allocation3 + $0x510] sm:$0xff]  ;;  %v275_v29 = vld [vmem:[#allocation3 + $0x678] sm:$0xff] }
 0x14a   :  { %v4508_v56 = vcombine.low %v230_v45, %v234_v46  ;;  %v279_v34 = vld [vmem:[#allocation3 + $0x698] sm:$0xff] }
 0x14b   :  { %v283_v35 = vld [vmem:[#allocation3 + $0x6b8] sm:$0xff] }
 0x14c   :  { %3165 = vmatpush1.bf16.msra.mxu0 %v4444_v49  ;;  %3329 = vmatpush1.bf16.msra.mxu1 %v4446_v50  ;;  %v4502_v49 = vcombine.low %v223_v38, %v227_v39  ;;  %v4509_v50 = vcombine.high %v230_v45, %v234_v46  ;;  %v4550_v39 = vcombine.low %v271_v28, %v275_v29  ;;  %v287_v45 = vld [vmem:[#allocation3 + $0x6d8] sm:$0xff] }
 0x14d   :  { %3166 = vmatprep.subr.bf16.mxu0 %v4453_v51  ;;  %3330 = vmatprep.subr.bf16.mxu1 %v4455_v52  ;;  %v238_v51 = vld [vmem:[#allocation3 + $0x550] sm:$0xff]  ;;  %v291_v46 = vld [vmem:[#allocation3 + $0x6f8] sm:$0xff] }
 0x14e   :  { %v242_v52 = vld [vmem:[#allocation3 + $0x570] sm:$0xff] }
 0x14f   :  { %v4516_v3 = vcombine.low %v238_v51, %v242_v52 }
 0x150   :  { %3167 = vmatpush1.bf16.msra.mxu0 %v4452_v58  ;;  %3331 = vmatpush1.bf16.msra.mxu1 %v4454_v60  ;;  %v4517_v58 = vcombine.high %v238_v51, %v242_v52  ;;  %v4519_v60 = vcombine.high %v239_v54, %v243_v55  ;;  %v295_v51 = vld [vmem:[#allocation3 + $0x718] sm:$0xff]  ;;  %v4566_v55 = vcombine.low %v287_v45, %v291_v46 }
 0x151   :  { %3168 = vmatprep.subr.bf16.mxu0 %v4461_v61  ;;  %3332 = vmatprep.subr.bf16.mxu1 %v4463_v62  ;;  %v246_v61 = vld [vmem:[#allocation3 + $0x590] sm:$0xff]  ;;  %v299_v52 = vld [vmem:[#allocation3 + $0x738] sm:$0xff] }
 0x152   :  { %v250_v62 = vld [vmem:[#allocation3 + $0x5b0] sm:$0xff] }
 0x153   :  { %v4524_v13 = vcombine.low %v246_v61, %v250_v62 }
 0x154   :  { %3169 = vmatpush1.bf16.msra.mxu0 %v4460_v5  ;;  %3333 = vmatpush1.bf16.msra.mxu1 %v4462_v6  ;;  %v4525_v5 = vcombine.high %v246_v61, %v250_v62  ;;  %v4527_v6 = vcombine.high %v247_v0, %v251_v1  ;;  %v303_v61 = vld [vmem:[#allocation3 + $0x758] sm:$0xff]  ;;  %v4574_v1 = vcombine.low %v295_v51, %v299_v52 }
 0x155   :  { %3170 = vmatprep.subr.bf16.mxu0 %v4469_v7  ;;  %3334 = vmatprep.subr.bf16.mxu1 %v4471_v8  ;;  %v254_v7 = vld [vmem:[#allocation3 + $0x5d0] sm:$0xff]  ;;  %v307_v62 = vld [vmem:[#allocation3 + $0x778] sm:$0xff] }
 0x156   :  { %v258_v8 = vld [vmem:[#allocation3 + $0x5f0] sm:$0xff] }
 0x157   :  { %v4532_v21 = vcombine.low %v254_v7, %v258_v8 }
 0x158   :  { %3171 = vmatpush1.bf16.msra.mxu0 %v4468_v15  ;;  %3335 = vmatpush1.bf16.msra.mxu1 %v4470_v16  ;;  %v4533_v15 = vcombine.high %v254_v7, %v258_v8  ;;  %v4535_v16 = vcombine.high %v255_v10, %v259_v12  ;;  %v311_v7 = vld [vmem:[#allocation3 + $0x798] sm:$0xff]  ;;  %v4582_v12 = vcombine.low %v303_v61, %v307_v62 }
 0x159   :  { %3181 = vmatprep.subr.bf16.mxu0 %v4477_v17  ;;  %3345 = vmatprep.subr.bf16.mxu1 %v4479_v18  ;;  %v262_v17 = vld [vmem:[#allocation3 + $0x610] sm:$0xff]  ;;  %v315_v8 = vld [vmem:[#allocation3 + $0x7b8] sm:$0xff] }
 0x15a   :  { %v266_v18 = vld [vmem:[#allocation3 + $0x630] sm:$0xff] }
 0x15b   :  { %3173 = vmatmul.mubr.bf16.vlgmr.msra.gmra.mrb[4].mxu0 %v5269_v25  ;;  %3337 = vmatmul.mubr.bf16.vlgmr.msra.gmra.mrb[4].mxu1 %v5269_v25  ;;  %v4494_v25 = vcombine.low %v215_v59, %v219_v30  ;;  %v4540_v59 = vcombine.low %v262_v17, %v266_v18  ;;  %v4542_v30 = vcombine.low %v263_v19, %v267_v20 }
 0x15c   :  { %3182 = vmatpush1.bf16.msra.mxu0 %v4476_v23  ;;  %3346 = vmatpush1.bf16.msra.mxu1 %v4478_v24  ;;  %v4541_v23 = vcombine.high %v262_v17, %v266_v18  ;;  %v4543_v24 = vcombine.high %v263_v19, %v267_v20  ;;  %v319_v17 = vld [vmem:[#allocation3 + $0x7d8] sm:$0xff]  ;;  %v4590_v20 = vcombine.low %v311_v7, %v315_v8 }
 0x15d   :  { %3183 = vmatprep.subr.bf16.mxu0 %v4485_v26  ;;  %3347 = vmatprep.subr.bf16.mxu1 %v4487_v27  ;;  %v270_v26 = vld [vmem:[#allocation3 + $0x650] sm:$0xff]  ;;  %v323_v18 = vld [vmem:[#allocation3 + $0x7f8] sm:$0xff] }
 0x15e   :  { %3213 = vmatprep.mubr.bf16.mxu0 %v5273_v36  ;;  %3377 = vmatprep.mubr.bf16.mxu1 %v5273_v36  ;;  %v4511_v36 = vcombine.high %v231_v53, %v235_v47  ;;  %v274_v27 = vld [vmem:[#allocation3 + $0x670] sm:$0xff]  ;;  %v4558_v47 = vcombine.low %v279_v34, %v283_v35 }
 0x15f   :  { %v4548_v38 = vcombine.low %v270_v26, %v274_v27 }
 0x160   :  { %3184 = vmatpush1.bf16.msra.mxu0 %v4484_v31  ;;  %3348 = vmatpush1.bf16.msra.mxu1 %v4486_v32  ;;  %v4549_v31 = vcombine.high %v270_v26, %v274_v27  ;;  %v4551_v32 = vcombine.high %v271_v28, %v275_v29  ;;  %v327_v26 = vld [vmem:[#allocation3 + $0x818] sm:$0xff]  ;;  %v4598_v29 = vcombine.low %v319_v17, %v323_v18 }
 0x161   :  { %3185 = vmatprep.subr.bf16.mxu0 %v4493_v33  ;;  %3349 = vmatprep.subr.bf16.mxu1 %v4495_v9  ;;  %v278_v33 = vld [vmem:[#allocation3 + $0x690] sm:$0xff]  ;;  %v331_v27 = vld [vmem:[#allocation3 + $0x838] sm:$0xff] }
 0x162   :  { %v282_v9 = vld [vmem:[#allocation3 + $0x6b0] sm:$0xff] }
 0x163   :  { %v4556_v53 = vcombine.low %v278_v33, %v282_v9 }
 0x164   :  { %3186 = vmatpush1.bf16.msra.mxu0 %v4492_v40  ;;  %3350 = vmatpush1.bf16.msra.mxu1 %v4494_v25  ;;  %v4557_v40 = vcombine.high %v278_v33, %v282_v9  ;;  %v4559_v25 = vcombine.high %v279_v34, %v283_v35  ;;  %v335_v33 = vld [vmem:[#allocation3 + $0x858] sm:$0xff]  ;;  %v4606_v35 = vcombine.low %v327_v26, %v331_v27 }
 0x165   :  { %3187 = vmatprep.subr.bf16.mxu0 %v4501_v41  ;;  %3351 = vmatprep.subr.bf16.mxu1 %v4503_v43  ;;  %v286_v41 = vld [vmem:[#allocation3 + $0x6d0] sm:$0xff]  ;;  %v339_v9 = vld [vmem:[#allocation3 + $0x878] sm:$0xff] }
 0x166   :  { %v290_v43 = vld [vmem:[#allocation3 + $0x6f0] sm:$0xff] }
 0x167   :  { %v4564_v54 = vcombine.low %v286_v41, %v290_v43 }
 0x168   :  { %3188 = vmatpush1.bf16.msra.mxu0 %v4500_v48  ;;  %3352 = vmatpush1.bf16.msra.mxu1 %v4502_v49  ;;  %v4565_v48 = vcombine.high %v286_v41, %v290_v43  ;;  %v4567_v49 = vcombine.high %v287_v45, %v291_v46  ;;  %v343_v41 = vld [vmem:[#allocation3 + $0x898] sm:$0xff]  ;;  %v4614_v46 = vcombine.low %v335_v33, %v339_v9 }
 0x169   :  { %3189 = vmatprep.subr.bf16.mxu0 %v4509_v50  ;;  %3353 = vmatprep.subr.bf16.mxu1 %v4511_v36  ;;  %v294_v50 = vld [vmem:[#allocation3 + $0x710] sm:$0xff]  ;;  %v347_v43 = vld [vmem:[#allocation3 + $0x8b8] sm:$0xff] }
 0x16a   :  { %v298_v36 = vld [vmem:[#allocation3 + $0x730] sm:$0xff] }
 0x16b   :  { %v4572_v0 = vcombine.low %v294_v50, %v298_v36 }
 0x16c   :  { %3190 = vmatpush1.bf16.msra.mxu0 %v4508_v56  ;;  %3354 = vmatpush1.bf16.msra.mxu1 %v4510_v57  ;;  %v4573_v56 = vcombine.high %v294_v50, %v298_v36  ;;  %v4575_v57 = vcombine.high %v295_v51, %v299_v52  ;;  %v351_v50 = vld [vmem:[#allocation3 + $0x8d8] sm:$0xff] }
 0x16d   :  { %3191 = vmatprep.subr.bf16.mxu0 %v4517_v58  ;;  %3355 = vmatprep.subr.bf16.mxu1 %v4519_v60  ;;  %v302_v58 = vld [vmem:[#allocation3 + $0x750] sm:$0xff]  ;;  %v355_v36 = vld [vmem:[#allocation3 + $0x8f8] sm:$0xff] }
 0x16e   :  { %v306_v60 = vld [vmem:[#allocation3 + $0x770] sm:$0xff] }
 0x16f   :  { %v4580_v10 = vcombine.low %v302_v58, %v306_v60 }
 0x170   :  { %3192 = vmatpush1.bf16.msra.mxu0 %v4516_v3  ;;  %3356 = vmatpush1.bf16.msra.mxu1 %v4518_v4  ;;  %v4581_v3 = vcombine.high %v302_v58, %v306_v60  ;;  %v4583_v4 = vcombine.high %v303_v61, %v307_v62  ;;  %v363_v58 = vld [vmem:[#allocation3 + $0x938] sm:$0xff]  ;;  %v4630_v61 = vcombine.low %v351_v50, %v355_v36 }
 0x171   :  { %3193 = vmatprep.subr.bf16.mxu0 %v4525_v5  ;;  %3357 = vmatprep.subr.bf16.mxu1 %v4527_v6  ;;  %v310_v5 = vld [vmem:[#allocation3 + $0x790] sm:$0xff] }
 0x172   :  { %v314_v6 = vld [vmem:[#allocation3 + $0x7b0] sm:$0xff] }
 0x173   :  { %v4588_v19 = vcombine.low %v310_v5, %v314_v6 }
 0x174   :  { %3194 = vmatpush1.bf16.msra.mxu0 %v4524_v13  ;;  %3358 = vmatpush1.bf16.msra.mxu1 %v4526_v14  ;;  %v4589_v13 = vcombine.high %v310_v5, %v314_v6  ;;  %v4591_v14 = vcombine.high %v311_v7, %v315_v8 }
 0x175   :  { %3195 = vmatprep.subr.bf16.mxu0 %v4533_v15  ;;  %3359 = vmatprep.subr.bf16.mxu1 %v4535_v16  ;;  %v318_v15 = vld [vmem:[#allocation3 + $0x7d0] sm:$0xff] }
 0x176   :  { %v322_v16 = vld [vmem:[#allocation3 + $0x7f0] sm:$0xff] }
 0x177   :  { %v4596_v28 = vcombine.low %v318_v15, %v322_v16 }
 0x178   :  { %3196 = vmatpush1.bf16.msra.mxu0 %v4532_v21  ;;  %3360 = vmatpush1.bf16.msra.mxu1 %v4534_v22  ;;  %v4597_v21 = vcombine.high %v318_v15, %v322_v16  ;;  %v4599_v22 = vcombine.high %v319_v17, %v323_v18 }
 0x179   :  { %3197 = vmatprep.subr.bf16.mxu0 %v4541_v23  ;;  %3361 = vmatprep.subr.bf16.mxu1 %v4543_v24  ;;  %v326_v23 = vld [vmem:[#allocation3 + $0x810] sm:$0xff] }
 0x17a   :  { %v330_v24 = vld [vmem:[#allocation3 + $0x830] sm:$0xff] }
 0x17b   :  { %v4604_v34 = vcombine.low %v326_v23, %v330_v24 }
 0x17c   :  { %3198 = vmatpush1.bf16.msra.mxu0 %v4540_v59  ;;  %3362 = vmatpush1.bf16.msra.mxu1 %v4542_v30  ;;  %v4605_v59 = vcombine.high %v326_v23, %v330_v24  ;;  %v4607_v30 = vcombine.high %v327_v26, %v331_v27 }
 0x17d   :  { %3199 = vmatprep.subr.bf16.mxu0 %v4549_v31  ;;  %3363 = vmatprep.subr.bf16.mxu1 %v4551_v32  ;;  %v334_v31 = vld [vmem:[#allocation3 + $0x850] sm:$0xff] }
 0x17e   :  { %v338_v32 = vld [vmem:[#allocation3 + $0x870] sm:$0xff] }
 0x17f   :  { %v4612_v45 = vcombine.low %v334_v31, %v338_v32 }
 0x180   :  { %3200 = vmatpush1.bf16.msra.mxu0 %v4548_v38  ;;  %3364 = vmatpush1.bf16.msra.mxu1 %v4550_v39  ;;  %v4613_v38 = vcombine.high %v334_v31, %v338_v32  ;;  %v4615_v39 = vcombine.high %v335_v33, %v339_v9 }
 0x181   :  { %3201 = vmatprep.subr.bf16.mxu0 %v4557_v40  ;;  %3365 = vmatprep.subr.bf16.mxu1 %v4559_v25  ;;  %v342_v40 = vld [vmem:[#allocation3 + $0x890] sm:$0xff] }
 0x182   :  { %v346_v25 = vld [vmem:[#allocation3 + $0x8b0] sm:$0xff] }
 0x183   :  { %v4620_v51 = vcombine.low %v342_v40, %v346_v25 }
 0x184   :  { %3202 = vmatpush1.bf16.msra.mxu0 %v4556_v53  ;;  %3366 = vmatpush1.bf16.msra.mxu1 %v4558_v47  ;;  %v4621_v53 = vcombine.high %v342_v40, %v346_v25  ;;  %v4623_v47 = vcombine.high %v343_v41, %v347_v43 }
 0x185   :  { %3203 = vmatprep.subr.bf16.mxu0 %v4565_v48  ;;  %3367 = vmatprep.subr.bf16.mxu1 %v4567_v49  ;;  %v350_v48 = vld [vmem:[#allocation3 + $0x8d0] sm:$0xff] }
 0x186   :  { %v354_v49 = vld [vmem:[#allocation3 + $0x8f0] sm:$0xff] }
 0x187   :  { %v4629_v52 = vcombine.high %v350_v48, %v354_v49  ;;  %v4628_v60 = vcombine.low %v350_v48, %v354_v49 }
 0x188   :  { %3204 = vmatpush1.bf16.msra.mxu0 %v4564_v54  ;;  %3368 = vmatpush1.bf16.msra.mxu1 %v4566_v55  ;;  %v4631_v54 = vcombine.high %v351_v50, %v355_v36  ;;  %v358_v55 = vld [vmem:[#allocation3 + $0x910] sm:$0xff] }
 0x189   :  { %3205 = vmatprep.subr.bf16.mxu0 %v4573_v56  ;;  %3369 = vmatprep.subr.bf16.mxu1 %v4575_v57  ;;  %v362_v56 = vld [vmem:[#allocation3 + $0x930] sm:$0xff]  ;;  %v359_v57 = vld [vmem:[#allocation3 + $0x918] sm:$0xff] }
 0x18a   :  { %v4637_v62 = vcombine.high %v358_v55, %v362_v56  ;;  %v4636_v5 = vcombine.low %v358_v55, %v362_v56  ;;  %v4638_v6 = vcombine.low %v359_v57, %v363_v58 }
 0x18c   :  { %3206 = vmatpush1.bf16.msra.mxu0 %v4572_v0  ;;  %3370 = vmatpush1.bf16.msra.mxu1 %v4574_v1  ;;  %v366_v0 = vld [vmem:[#allocation3 + $0x950] sm:$0xff] }
 0x18d   :  { %3207 = vmatprep.subr.bf16.mxu0 %v4581_v3  ;;  %3371 = vmatprep.subr.bf16.mxu1 %v4583_v4  ;;  %v370_v1 = vld [vmem:[#allocation3 + $0x970] sm:$0xff]  ;;  %v367_v3 = vld [vmem:[#allocation3 + $0x958] sm:$0xff] }
 0x18e   :  { %v371_v4 = vld [vmem:[#allocation3 + $0x978] sm:$0xff]  ;;  %v4645_v7 = vcombine.high %v366_v0, %v370_v1  ;;  %v4644_v15 = vcombine.low %v366_v0, %v370_v1 }
 0x18f   :  { %v4647_v8 = vcombine.high %v367_v3, %v371_v4  ;;  %v4646_v16 = vcombine.low %v367_v3, %v371_v4 }
 0x190   :  { %3208 = vmatpush1.bf16.msra.mxu0 %v4580_v10  ;;  %3372 = vmatpush1.bf16.msra.mxu1 %v4582_v12  ;;  %v374_v10 = vld [vmem:[#allocation3 + $0x990] sm:$0xff] }
 0x191   :  { %3209 = vmatprep.subr.bf16.mxu0 %v4589_v13  ;;  %3373 = vmatprep.subr.bf16.mxu1 %v4591_v14  ;;  %v378_v12 = vld [vmem:[#allocation3 + $0x9b0] sm:$0xff]  ;;  %v375_v13 = vld [vmem:[#allocation3 + $0x998] sm:$0xff] }
 0x192   :  { %v379_v14 = vld [vmem:[#allocation3 + $0x9b8] sm:$0xff]  ;;  %v4653_v17 = vcombine.high %v374_v10, %v378_v12  ;;  %v4652_v23 = vcombine.low %v374_v10, %v378_v12 }
 0x193   :  { %v4655_v18 = vcombine.high %v375_v13, %v379_v14  ;;  %v4654_v24 = vcombine.low %v375_v13, %v379_v14 }
 0x194   :  { %3210 = vmatpush1.bf16.msra.mxu0 %v4588_v19  ;;  %3374 = vmatpush1.bf16.msra.mxu1 %v4590_v20  ;;  %v382_v19 = vld [vmem:[#allocation3 + $0x9d0] sm:$0xff] }
 0x195   :  { %3211 = vmatprep.subr.bf16.mxu0 %v4597_v21  ;;  %3375 = vmatprep.subr.bf16.mxu1 %v4599_v22  ;;  %v386_v20 = vld [vmem:[#allocation3 + $0x9f0] sm:$0xff]  ;;  %v383_v21 = vld [vmem:[#allocation3 + $0x9d8] sm:$0xff] }
 0x196   :  { %v387_v22 = vld [vmem:[#allocation3 + $0x9f8] sm:$0xff]  ;;  %v4661_v26 = vcombine.high %v382_v19, %v386_v20  ;;  %v4660_v31 = vcombine.low %v382_v19, %v386_v20 }
 0x197   :  { %v4663_v27 = vcombine.high %v383_v21, %v387_v22  ;;  %v4662_v32 = vcombine.low %v383_v21, %v387_v22 }
 0x198   :  { %3212 = vmatpush1.bf16.msra.mxu0 %v4596_v28  ;;  %3376 = vmatpush1.bf16.msra.mxu1 %v4598_v29  ;;  %v390_v28 = vld [vmem:[#allocation3 + $0xa10] sm:$0xff] }
 0x199   :  { %3222 = vmatprep.subr.bf16.mxu0 %v4605_v59  ;;  %3386 = vmatprep.subr.bf16.mxu1 %v4607_v30  ;;  %v394_v29 = vld [vmem:[#allocation3 + $0xa30] sm:$0xff]  ;;  %v391_v59 = vld [vmem:[#allocation3 + $0xa18] sm:$0xff] }
 0x19a   :  { %v395_v30 = vld [vmem:[#allocation3 + $0xa38] sm:$0xff]  ;;  %v4669_v33 = vcombine.high %v390_v28, %v394_v29  ;;  %v4668_v40 = vcombine.low %v390_v28, %v394_v29 }
 0x19b   :  { %3214 = vmatmul.mubr.bf16.vlgmr.msra.gmra.mrb[4].mxu0 %v5287_v42  ;;  %3378 = vmatmul.mubr.bf16.vlgmr.msra.gmra.mrb[4].mxu1 %v5287_v42  ;;  %v4622_v42 = vcombine.low %v343_v41, %v347_v43  ;;  %v4671_v9 = vcombine.high %v391_v59, %v395_v30  ;;  %v4670_v25 = vcombine.low %v391_v59, %v395_v30 }
 0x19c   :  { %3223 = vmatpush1.bf16.msra.mxu0 %v4604_v34  ;;  %3387 = vmatpush1.bf16.msra.mxu1 %v4606_v35  ;;  %v398_v34 = vld [vmem:[#allocation3 + $0xa50] sm:$0xff] }
 0x19d   :  { %3224 = vmatprep.subr.bf16.mxu0 %v4613_v38  ;;  %3388 = vmatprep.subr.bf16.mxu1 %v4615_v39  ;;  %v402_v35 = vld [vmem:[#allocation3 + $0xa70] sm:$0xff]  ;;  %v399_v38 = vld [vmem:[#allocation3 + $0xa58] sm:$0xff] }
 0x19e   :  { %3254 = vmatprep.mubr.bf16.mxu0 %v5276_v63  ;;  %3418 = vmatprep.mubr.bf16.mxu1 %v5276_v63  ;;  %v4639_v63 = vcombine.high %v359_v57, %v363_v58  ;;  %v403_v39 = vld [vmem:[#allocation3 + $0xa78] sm:$0xff]  ;;  %v4677_v41 = vcombine.high %v398_v34, %v402_v35  ;;  %v4676_v48 = vcombine.low %v398_v34, %v402_v35 }
 0x19f   :  { %v4679_v43 = vcombine.high %v399_v38, %v403_v39  ;;  %v4678_v49 = vcombine.low %v399_v38, %v403_v39 }
 0x1a0   :  { %3225 = vmatpush1.bf16.msra.mxu0 %v4612_v45  ;;  %3389 = vmatpush1.bf16.msra.mxu1 %v4614_v46  ;;  %v406_v45 = vld [vmem:[#allocation3 + $0xa90] sm:$0xff] }
 0x1a1   :  { %3226 = vmatprep.subr.bf16.mxu0 %v4621_v53  ;;  %3390 = vmatprep.subr.bf16.mxu1 %v4623_v47  ;;  %v410_v46 = vld [vmem:[#allocation3 + $0xab0] sm:$0xff]  ;;  %v407_v53 = vld [vmem:[#allocation3 + $0xa98] sm:$0xff] }
 0x1a2   :  { %v411_v47 = vld [vmem:[#allocation3 + $0xab8] sm:$0xff]  ;;  %v4685_v50 = vcombine.high %v406_v45, %v410_v46  ;;  %v4684_v55 = vcombine.low %v406_v45, %v410_v46 }
 0x1a3   :  { %v4687_v36 = vcombine.high %v407_v53, %v411_v47  ;;  %v4686_v56 = vcombine.low %v407_v53, %v411_v47 }
 0x1a4   :  { %3227 = vmatpush1.bf16.msra.mxu0 %v4620_v51  ;;  %3391 = vmatpush1.bf16.msra.mxu1 %v4622_v42  ;;  %v414_v51 = vld [vmem:[#allocation3 + $0xad0] sm:$0xff] }
 0x1a5   :  { %3228 = vmatprep.subr.bf16.mxu0 %v4629_v52  ;;  %3392 = vmatprep.subr.bf16.mxu1 %v4631_v54  ;;  %v418_v42 = vld [vmem:[#allocation3 + $0xaf0] sm:$0xff]  ;;  %v415_v52 = vld [vmem:[#allocation3 + $0xad8] sm:$0xff] }
 0x1a6   :  { %v419_v54 = vld [vmem:[#allocation3 + $0xaf8] sm:$0xff]  ;;  %v4693_v57 = vcombine.high %v414_v51, %v418_v42  ;;  %v4692_v0 = vcombine.low %v414_v51, %v418_v42 }
 0x1a7   :  { %v4695_v58 = vcombine.high %v415_v52, %v419_v54  ;;  %v4694_v1 = vcombine.low %v415_v52, %v419_v54 }
 0x1a8   :  { %3229 = vmatpush1.bf16.msra.mxu0 %v4628_v60  ;;  %3393 = vmatpush1.bf16.msra.mxu1 %v4630_v61  ;;  %v422_v60 = vld [vmem:[#allocation3 + $0xb10] sm:$0xff] }
 0x1a9   :  { %3230 = vmatprep.subr.bf16.mxu0 %v4637_v62  ;;  %3394 = vmatprep.subr.bf16.mxu1 %v4639_v63  ;;  %v426_v61 = vld [vmem:[#allocation3 + $0xb30] sm:$0xff]  ;;  %v423_v62 = vld [vmem:[#allocation3 + $0xb18] sm:$0xff] }
 0x1aa   :  { %v427_v63 = vld [vmem:[#allocation3 + $0xb38] sm:$0xff]  ;;  %v4701_v3 = vcombine.high %v422_v60, %v426_v61  ;;  %v4700_v10 = vcombine.low %v422_v60, %v426_v61 }
 0x1ab   :  { %v4703_v4 = vcombine.high %v423_v62, %v427_v63  ;;  %v4702_v12 = vcombine.low %v423_v62, %v427_v63  ;;  %v486_v63 = vld [vmem:[#allocation3 + $0xd10] sm:$0xff] }
 0x1ac   :  { %3231 = vmatpush1.bf16.msra.mxu0 %v4636_v5  ;;  %3395 = vmatpush1.bf16.msra.mxu1 %v4638_v6  ;;  %v430_v5 = vld [vmem:[#allocation3 + $0xb50] sm:$0xff] }
 0x1ad   :  { %3232 = vmatprep.subr.bf16.mxu0 %v4645_v7  ;;  %3396 = vmatprep.subr.bf16.mxu1 %v4647_v8  ;;  %v434_v6 = vld [vmem:[#allocation3 + $0xb70] sm:$0xff]  ;;  %v431_v7 = vld [vmem:[#allocation3 + $0xb58] sm:$0xff] }
 0x1ae   :  { %v435_v8 = vld [vmem:[#allocation3 + $0xb78] sm:$0xff]  ;;  %v4709_v13 = vcombine.high %v430_v5, %v434_v6  ;;  %v4708_v19 = vcombine.low %v430_v5, %v434_v6  ;;  %v3525_v6 = vsub.s32 0, %v5243_v44 }
 0x1af   :  { %v4711_v14 = vcombine.high %v431_v7, %v435_v8  ;;  %v4710_v20 = vcombine.low %v431_v7, %v435_v8  ;;  %v491_v5 = vld [vmem:[#allocation3 + $0xd38] sm:$0xff]  ;;  %v3529_v7 = vsub.s32 1, %v5243_v44  ;;  %v3537_v8 = vsub.s32 3, %v5243_v44 }
 0x1b0   :  { %3233 = vmatpush1.bf16.msra.mxu0 %v4644_v15  ;;  %3397 = vmatpush1.bf16.msra.mxu1 %v4646_v16  ;;  %v438_v15 = vld [vmem:[#allocation3 + $0xb90] sm:$0xff] }
 0x1b1   :  { %3234 = vmatprep.subr.bf16.mxu0 %v4653_v17  ;;  %3398 = vmatprep.subr.bf16.mxu1 %v4655_v18  ;;  %v442_v16 = vld [vmem:[#allocation3 + $0xbb0] sm:$0xff]  ;;  %v439_v17 = vld [vmem:[#allocation3 + $0xb98] sm:$0xff] }
 0x1b2   :  { %v443_v18 = vld [vmem:[#allocation3 + $0xbb8] sm:$0xff]  ;;  %v4717_v21 = vcombine.high %v438_v15, %v442_v16  ;;  %v4716_v28 = vcombine.low %v438_v15, %v442_v16 }
 0x1b3   :  { %v4719_v22 = vcombine.high %v439_v17, %v443_v18  ;;  %v4718_v29 = vcombine.low %v439_v17, %v443_v18  ;;  %v494_v17 = vld [vmem:[#allocation3 + $0xd50] sm:$0xff] }
 0x1b4   :  { %3235 = vmatpush1.bf16.msra.mxu0 %v4652_v23  ;;  %3399 = vmatpush1.bf16.msra.mxu1 %v4654_v24  ;;  %v446_v23 = vld [vmem:[#allocation3 + $0xbd0] sm:$0xff] }
 0x1b5   :  { %3236 = vmatprep.subr.bf16.mxu0 %v4661_v26  ;;  %3400 = vmatprep.subr.bf16.mxu1 %v4663_v27  ;;  %v450_v24 = vld [vmem:[#allocation3 + $0xbf0] sm:$0xff]  ;;  %v447_v26 = vld [vmem:[#allocation3 + $0xbd8] sm:$0xff] }
 0x1b6   :  { %v451_v27 = vld [vmem:[#allocation3 + $0xbf8] sm:$0xff]  ;;  %v4725_v59 = vcombine.high %v446_v23, %v450_v24  ;;  %v4724_v34 = vcombine.low %v446_v23, %v450_v24  ;;  %v498_v18 = vld [vmem:[#allocation3 + $0xd70] sm:$0xff] }
 0x1b7   :  { %v4727_v30 = vcombine.high %v447_v26, %v451_v27  ;;  %v4726_v35 = vcombine.low %v447_v26, %v451_v27  ;;  %v495_v23 = vld [vmem:[#allocation3 + $0xd58] sm:$0xff] }
 0x1b8   :  { %3237 = vmatpush1.bf16.msra.mxu0 %v4660_v31  ;;  %3401 = vmatpush1.bf16.msra.mxu1 %v4662_v32  ;;  %v454_v31 = vld [vmem:[#allocation3 + $0xc10] sm:$0xff]  ;;  %v499_v24 = vld [vmem:[#allocation3 + $0xd78] sm:$0xff] }
 0x1b9   :  { %3238 = vmatprep.subr.bf16.mxu0 %v4669_v33  ;;  %3402 = vmatprep.subr.bf16.mxu1 %v4671_v9  ;;  %v458_v32 = vld [vmem:[#allocation3 + $0xc30] sm:$0xff]  ;;  %v455_v33 = vld [vmem:[#allocation3 + $0xc18] sm:$0xff] }
 0x1ba   :  { %v459_v9 = vld [vmem:[#allocation3 + $0xc38] sm:$0xff]  ;;  %v4733_v38 = vcombine.high %v454_v31, %v458_v32  ;;  %v4732_v45 = vcombine.low %v454_v31, %v458_v32 }
 0x1bb   :  { %v4735_v39 = vcombine.high %v455_v33, %v459_v9  ;;  %v4734_v46 = vcombine.low %v455_v33, %v459_v9  ;;  %v503_v9 = vld [vmem:[#allocation3 + $0xd98] sm:$0xff] }
 0x1bc   :  { %3239 = vmatpush1.bf16.msra.mxu0 %v4668_v40  ;;  %3403 = vmatpush1.bf16.msra.mxu1 %v4670_v25  ;;  %v462_v40 = vld [vmem:[#allocation3 + $0xc50] sm:$0xff] }
 0x1bd   :  { %3240 = vmatprep.subr.bf16.mxu0 %v4677_v41  ;;  %3404 = vmatprep.subr.bf16.mxu1 %v4679_v43  ;;  %v466_v25 = vld [vmem:[#allocation3 + $0xc70] sm:$0xff]  ;;  %v463_v41 = vld [vmem:[#allocation3 + $0xc58] sm:$0xff] }
 0x1be   :  { %v467_v43 = vld [vmem:[#allocation3 + $0xc78] sm:$0xff]  ;;  %v4741_v53 = vcombine.high %v462_v40, %v466_v25  ;;  %v4740_v51 = vcombine.low %v462_v40, %v466_v25 }
 0x1bf   :  { %v4743_v47 = vcombine.high %v463_v41, %v467_v43  ;;  %v4742_v42 = vcombine.low %v463_v41, %v467_v43  ;;  %v510_v41 = vld [vmem:[#allocation3 + $0xdd0] sm:$0xff] }
 0x1c0   :  { %3241 = vmatpush1.bf16.msra.mxu0 %v4676_v48  ;;  %3405 = vmatpush1.bf16.msra.mxu1 %v4678_v49  ;;  %v470_v48 = vld [vmem:[#allocation3 + $0xc90] sm:$0xff] }
 0x1c1   :  { %3242 = vmatprep.subr.bf16.mxu0 %v4685_v50  ;;  %3406 = vmatprep.subr.bf16.mxu1 %v4687_v36  ;;  %v474_v49 = vld [vmem:[#allocation3 + $0xcb0] sm:$0xff]  ;;  %v471_v50 = vld [vmem:[#allocation3 + $0xc98] sm:$0xff] }
 0x1c2   :  { %v475_v36 = vld [vmem:[#allocation3 + $0xcb8] sm:$0xff]  ;;  %v4749_v52 = vcombine.high %v470_v48, %v474_v49  ;;  %v4748_v60 = vcombine.low %v470_v48, %v474_v49  ;;  %v514_v43 = vld [vmem:[#allocation3 + $0xdf0] sm:$0xff] }
 0x1c3   :  { %v4751_v54 = vcombine.high %v471_v50, %v475_v36  ;;  %v511_v48 = vld [vmem:[#allocation3 + $0xdd8] sm:$0xff] }
 0x1c4   :  { %3243 = vmatpush1.bf16.msra.mxu0 %v4684_v55  ;;  %3407 = vmatpush1.bf16.msra.mxu1 %v4686_v56  ;;  %v478_v55 = vld [vmem:[#allocation3 + $0xcd0] sm:$0xff]  ;;  %v515_v49 = vld [vmem:[#allocation3 + $0xdf8] sm:$0xff] }
 0x1c5   :  { %3244 = vmatprep.subr.bf16.mxu0 %v4693_v57  ;;  %3408 = vmatprep.subr.bf16.mxu1 %v4695_v58  ;;  %v482_v56 = vld [vmem:[#allocation3 + $0xcf0] sm:$0xff]  ;;  %v479_v57 = vld [vmem:[#allocation3 + $0xcd8] sm:$0xff] }
 0x1c6   :  { %v483_v58 = vld [vmem:[#allocation3 + $0xcf8] sm:$0xff]  ;;  %v4757_v61 = vcombine.high %v478_v55, %v482_v56 }
 0x1c7   :  { %v4759_v62 = vcombine.high %v479_v57, %v483_v58 }
 0x1c8   :  { %3245 = vmatpush1.bf16.msra.mxu0 %v4692_v0  ;;  %3409 = vmatpush1.bf16.msra.mxu1 %v4694_v1  ;;  %v490_v0 = vld [vmem:[#allocation3 + $0xd30] sm:$0xff]  ;;  %v5168_v1 = vmov 1983009808  }
 0x1c9   :  { %3246 = vmatprep.subr.bf16.mxu0 %v4701_v3  ;;  %3410 = vmatprep.subr.bf16.mxu1 %v4703_v4  ;;  %v3479_v3 = vunpack.c.l.s4 %v5168_v1  ;;  %v487_v4 = vld [vmem:[#allocation3 + $0xd18] sm:$0xff]  ;;  %v4764_v26 = vcombine.low %v486_v63, %v490_v0  ;;  %v4790_v1 = vcombine.low %v511_v48, %v515_v49 }
 0x1ca   :  { %v4767_v15 = vcombine.high %v487_v4, %v491_v5  ;;  %v4766_v27 = vcombine.low %v487_v4, %v491_v5  ;;  %v5004_v4 = vld [vmem:[%s5571_s3 + $0xc0] sm:$0xff]  }
 0x1cb   :  { %v3480_v16 = vunpack.c.0.s8 %v3479_v3  ;;  %v5003_v3 = vld [vmem:[%s5571_s3 + $0x40] sm:$0xff]  }
 0x1cc   :  { %3247 = vmatpush1.bf16.msra.mxu0 %v4700_v10  ;;  %3411 = vmatpush1.bf16.msra.mxu1 %v4702_v12  ;;  %v4756_v10 = vcombine.low %v478_v55, %v482_v56  ;;  %v5321_v12 = vld [vmem:[#allocation6] sm:$0xff] }
 0x1cd   :  { %3248 = vmatprep.subr.bf16.mxu0 %v4709_v13  ;;  %3412 = vmatprep.subr.bf16.mxu1 %v4711_v14  ;;  %v4758_v13 = vcombine.low %v479_v57, %v483_v58  ;;  %v4765_v14 = vcombine.high %v486_v63, %v490_v0  ;;  %v5328_v31 = vsub.s32 %v3480_v16, %v5243_v44 }
 0x1ce   :  { %v4789_v57 = vcombine.high %v510_v41, %v514_v43  ;;  %v4788_v63 = vcombine.low %v510_v41, %v514_v43  ;;  %v5030_v41 = vld [vmem:[%s5571_s3 + $0xb0] sm:$0xff]   ;;  %v5031_v43 = vld [vmem:[%s5571_s3 + $0x78] sm:$0xff]  }
 0x1d0   :  { %3249 = vmatpush1.bf16.msra.mxu0 %v4708_v19  ;;  %3413 = vmatpush1.bf16.msra.mxu1 %v4710_v20  ;;  %v3526_v19 = vrot.slane %v5321_v12, %v3525_v6  ;;  %v3530_v20 = vrot.slane %v5321_v12, %v3529_v7  ;;  %v5005_v6 = vld [vmem:[%s5571_s3] sm:$0xff]  }
 0x1d1   :  { %3250 = vmatprep.subr.bf16.mxu0 %v4717_v21  ;;  %3414 = vmatprep.subr.bf16.mxu1 %v4719_v22  ;;  %v3538_v22 = vrot.slane %v5321_v12, %v3537_v8  ;;  %v5007_v8 = vld [vmem:[%s5571_s3 + $0x48] sm:$0xff]  }
 0x1d2   :  { %v3555_v32 = vcombine.low %v3526_v19, %v3530_v20  ;;  %v5012_v19 = vld [vmem:[%s5571_s3 + $0xd0] sm:$0xff]  }
 0x1d4   :  { %3251 = vmatpush1.bf16.msra.mxu0 %v4716_v28  ;;  %3415 = vmatpush1.bf16.msra.mxu1 %v4718_v29  ;;  %v4773_v28 = vcombine.high %v494_v17, %v498_v18  ;;  %v4775_v29 = vcombine.high %v495_v23, %v499_v24 }
 0x1d5   :  { %3252 = vmatprep.subr.bf16.mxu0 %v4725_v59  ;;  %3416 = vmatprep.subr.bf16.mxu1 %v4727_v30  ;;  %v502_v59 = vld [vmem:[#allocation3 + $0xd90] sm:$0xff] }
 0x1d6   :  { %v506_v30 = vld [vmem:[#allocation3 + $0xdb0] sm:$0xff] }
 0x1d8   :  { %3253 = vmatpush1.bf16.msra.mxu0 %v4724_v34  ;;  %3417 = vmatpush1.bf16.msra.mxu1 %v4726_v35  ;;  %v507_v34 = vld [vmem:[#allocation3 + $0xdb8] sm:$0xff]  ;;  %v4772_v35 = vcombine.low %v494_v17, %v498_v18  ;;  %v5010_v17 = vld [vmem:[%s5571_s3 + $0x88] sm:$0xff]  }
 0x1d9   :  { %3263 = vmatprep.subr.bf16.mxu0 %v4733_v38  ;;  %3427 = vmatprep.subr.bf16.mxu1 %v4735_v39  ;;  %v4774_v38 = vcombine.low %v495_v23, %v499_v24  ;;  %v4781_v39 = vcombine.high %v502_v59, %v506_v30  ;;  %v4783_v25 = vcombine.high %v503_v9, %v507_v34  ;;  %v5014_v24 = vld [vmem:[%s5571_s3 + $0x90] sm:$0xff]  }
 0x1da   :  { %v4782_v56 = vcombine.low %v503_v9, %v507_v34  ;;  %v5023_v9 = vld [vmem:[%s5571_s3 + $0x68] sm:$0xff]  }
 0x1db   :  { %3255 = vmatmul.mubr.bf16.vlgmr.msra.gmra.mrb[4].mxu0 %v5279_v37  ;;  %3419 = vmatmul.mubr.bf16.vlgmr.msra.gmra.mrb[4].mxu1 %v5279_v37  ;;  %v4750_v37 = vcombine.low %v471_v50, %v475_v36  ;;  %v5024_v34 = vld [vmem:[%s5571_s3 + $0xe8] sm:$0xff]  }
 0x1dc   :  { %3264 = vmatpush1.bf16.msra.mxu0 %v4732_v45  ;;  %3428 = vmatpush1.bf16.msra.mxu1 %v4734_v46 }
 0x1dd   :  { %3265 = vmatprep.subr.bf16.mxu0 %v4741_v53  ;;  %3429 = vmatprep.subr.bf16.mxu1 %v4743_v47  ;;  %v3563_v53 = vrot.slane %v3555_v32, %v5328_v31  ;;  %v5021_v32 = vld [vmem:[%s5571_s3 + $0x20] sm:$0xff]  }
 0x1de   :  { %3295 = vmatprep.mubr.bf16.mxu0 %v5167_v11  ;;  %3459 = vmatprep.mubr.bf16.mxu1 %v5167_v11  ;;  %v3533_v11 = vsub.s32 2, %v5243_v44 }
 0x1e0   :  { %3266 = vmatpush1.bf16.msra.mxu0 %v4740_v51  ;;  %3430 = vmatpush1.bf16.msra.mxu1 %v4742_v42  ;;  %v3534_v21 = vrot.slane %v5321_v12, %v3533_v11  ;;  %v4780_v42 = vcombine.low %v502_v59, %v506_v30  ;;  %v5006_v11 = vld [vmem:[%s5571_s3 + $0x80] sm:$0xff]  }
 0x1e1   :  { %3267 = vmatprep.subr.bf16.mxu0 %v4749_v52  ;;  %3431 = vmatprep.subr.bf16.mxu1 %v4751_v54  ;;  %v5019_v59 = vld [vmem:[%s5571_s3 + $0x60] sm:$0xff]  }
 0x1e2   :  { %v3556_v33 = vcombine.low %v3534_v21, %v3538_v22  ;;  %v5013_v22 = vld [vmem:[%s5571_s3 + $0x10] sm:$0xff]   ;;  %v5020_v30 = vld [vmem:[%s5571_s3 + $0xe0] sm:$0xff]  }
 0x1e4   :  { %3268 = vmatpush1.bf16.msra.mxu0 %v4748_v60  ;;  %3432 = vmatpush1.bf16.msra.mxu1 %v4750_v37  ;;  %v3570_v47 = vrot.slane %v3556_v33, %v5328_v31  ;;  %v4791_v37 = vcombine.high %v511_v48, %v515_v49  ;;  %v5022_v33 = vld [vmem:[%s5571_s3 + $0xa0] sm:$0xff]  }
 0x1e5   :  { %3269 = vmatprep.subr.bf16.mxu0 %v4757_v61  ;;  %3433 = vmatprep.subr.bf16.mxu1 %v4759_v62  ;;  %v5037_v48 = vld [vmem:[%s5571_s3 + $0x1c0] sm:$0xff]  }
 0x1e6   :  { %v3571_v62 = vcombine.low %v3563_v53, %v3570_v47  ;;  %v5034_v53 = vld [vmem:[%s5571_s3 + $0xb8] sm:$0xff]   ;;  %v5035_v47 = vld [vmem:[%s5571_s3 + $0x140] sm:$0xff]  }
 0x1e7   :  { %v5036_v49 = vld [vmem:[%s5571_s3 + $0x100] sm:$0xff]  }
 0x1e8   :  { %3270 = vmatpush1.bf16.msra.mxu0 %v4756_v10  ;;  %3434 = vmatpush1.bf16.msra.mxu1 %v4758_v13  ;;  %v5008_v10 = vld [vmem:[%s5571_s3 + $0xc8] sm:$0xff]  }
 0x1e9   :  { %3271 = vmatprep.subr.bf16.mxu0 %v4765_v14  ;;  %3435 = vmatprep.subr.bf16.mxu1 %v4767_v15  ;;  %v5009_v15 = vld [vmem:[%s5571_s3 + $0x8] sm:$0xff]  }
 0x1ec   :  { %3272 = vmatpush1.bf16.msra.mxu0 %v4764_v26  ;;  %3436 = vmatpush1.bf16.msra.mxu1 %v4766_v27  ;;  %v5015_v26 = vld [vmem:[%s5571_s3 + $0x58] sm:$0xff]  }
 0x1ed   :  { %3273 = vmatprep.subr.bf16.mxu0 %v4773_v28  ;;  %3437 = vmatprep.subr.bf16.mxu1 %v4775_v29  ;;  %v5016_v27 = vld [vmem:[%s5571_s3 + $0xd8] sm:$0xff]  }
 0x1ee   :  { %v2969_v40 = vpop.f32.mrb[0].mxu0  ;;  %v3133_v45 = vpop.f32.mrb[0].mxu1  ;;  %v5017_v28 = vld [vmem:[%s5571_s3 + $0x18] sm:$0xff]  }
 0x1ef   :  { %v2971_v46 = vpop.f32.mrb[1].mxu0  ;;  %v3135_v36 = vpop.f32.mrb[1].mxu1  ;;  %v5018_v29 = vld [vmem:[%s5571_s3 + $0x98] sm:$0xff]  }
 0x1f0   :  { %v3476_v50 = vcombine.low %v2969_v40, %v2971_v46  ;;  %v2973_v51 = vpop.f32.mrb[2].mxu0  ;;  %3274 = vmatpush1.bf16.msra.mxu0 %v4772_v35  ;;  %v3477_v52 = vcombine.low %v3133_v45, %v3135_v36  ;;  %v3137_v54 = vpop.f32.mrb[2].mxu1  ;;  %3438 = vmatpush1.bf16.msra.mxu1 %v4774_v38  ;;  %v5025_v35 = vld [vmem:[%s5571_s3 + $0x28] sm:$0xff]   ;;  %v5028_v40 = vld [vmem:[%s5571_s3 + $0xf0] sm:$0xff]   ;;  %v5032_v45 = vld [vmem:[%s5571_s3 + $0xf8] sm:$0xff]  }
 0x1f1   :  { %v2974_v55 = vpop.f32.mrb[3].mxu0  ;;  %3275 = vmatprep.subr.bf16.mxu0 %v4781_v39  ;;  %v3138_v60 = vpop.f32.mrb[3].mxu1  ;;  %3439 = vmatprep.subr.bf16.mxu1 %v4783_v25  ;;  %v5026_v38 = vld [vmem:[%s5571_s3 + $0xa8] sm:$0xff]   ;;  %v5027_v39 = vld [vmem:[%s5571_s3 + $0x70] sm:$0xff]   ;;  %v5033_v46 = vld [vmem:[%s5571_s3 + $0x38] sm:$0xff]  }
 0x1f2   :  { %v3484_v58 = vrot.slane %v3476_v50, %v5328_v31  ;;  %v3491_v61 = vrot.slane %v3477_v52, %v5328_v31  ;;  %v5029_v25 = vld [vmem:[%s5571_s3 + $0x30] sm:$0xff]   ;;  %v5038_v36 = vld [vmem:[%s5571_s3 + $0x180] sm:$0xff]   ;;  %v5039_v51 = vld [vmem:[%s5571_s3 + $0x148] sm:$0xff]  }
 0x1f3   :  { %v5041_v52 = vld [vmem:[%s5571_s3 + $0x1c8] sm:$0xff]   ;;  %v5046_v60 = vld [vmem:[%s5571_s3 + $0x190] sm:$0xff]  }
 0x1f4   :  { %3276 = vmatpush1.bf16.msra.mxu0 %v4780_v42  ;;  %v3492_v0 = vcombine.low %v3484_v58, %v3491_v61  ;;  %3440 = vmatpush1.bf16.msra.mxu1 %v4782_v56  ;;  %v5040_v54 = vld [vmem:[%s5571_s3 + $0x108] sm:$0xff]   ;;  %v5043_v56 = vld [vmem:[%s5571_s3 + $0x150] sm:$0xff]   ;;  %v5048_v61 = vld [vmem:[%s5571_s3 + $0x118] sm:$0xff]  }
 0x1f5   :  { %3277 = vmatprep.subr.bf16.mxu0 %v4789_v57  ;;  %3441 = vmatprep.subr.bf16.mxu1 %v4791_v37  ;;  %v5042_v55 = vld [vmem:[%s5571_s3 + $0x188] sm:$0xff]   ;;  %v5045_v57 = vld [vmem:[%s5571_s3 + $0x1d0] sm:$0xff]   ;;  %v5047_v37 = vld [vmem:[%s5571_s3 + $0x158] sm:$0xff]  }
 0x1f6   :  { %v3591_v5 = vadd.f32 %v3571_v62, %v3492_v0  ;;  %v5044_v58 = vld [vmem:[%s5571_s3 + $0x110] sm:$0xff]   ;;  %v5049_v62 = vld [vmem:[%s5571_s3 + $0x1d8] sm:$0xff]   ;;  %v5051_v0 = vld [vmem:[%s5571_s3 + $0x160] sm:$0xff]  }
 0x1f8   :  { %3278 = vmatpush1.bf16.msra.mxu0 %v4788_v63  ;;  %v3593_v7 = vmax.f32 %v3591_v5, 0.0  ;;  %3442 = vmatpush1.bf16.msra.mxu1 %v4790_v1  ;;  %v5050_v63 = vld [vmem:[%s5571_s3 + $0x198] sm:$0xff]   ;;  %v5052_v1 = vld [vmem:[%s5571_s3 + $0x120] sm:$0xff]   ;;  %v5055_v5 = vld [vmem:[%s5571_s3 + $0x168] sm:$0xff]  }
 0x1f9   :  { %4857 = vmatprep.subr.bf16.mxu0 %v5003_v3  ;;  %4879 = vmatprep.subr.bf16.mxu1 %v5004_v4  ;;  %v5053_v3 = vld [vmem:[%s5571_s3 + $0x1e0] sm:$0xff]  }
 0x1fa   :  { %v5354_v13 = vrot.slane %v3593_v7, %v5328_v31  ;;  %v3597_v14 = vcombine.high %v3593_v7, %v3593_v7  ;;  %v5054_v4 = vld [vmem:[%s5571_s3 + $0x1a0] sm:$0xff]   ;;  %v5057_v7 = vld [vmem:[%s5571_s3 + $0x1e8] sm:$0xff]  }
 0x1fb   :  { %3296 = vmatmul.mubr.bf16.vlgmr.msra.gmra.mrb[4].mxu0 %v5299_v2  ;;  %3460 = vmatmul.mubr.bf16.vlgmr.msra.gmra.mrb[4].mxu1 %v5299_v2  ;;  %v5011_v2 = vld [vmem:[%s5571_s3 + $0x50] sm:$0xff]  }
 0x1fc   :  { %4858 = vmatpush3.bf16.msra.mxu0 %v5005_v6  ;;  %4880 = vmatpush3.bf16.msra.mxu1 %v5006_v11  ;;  %v3612_v16 = vcombine.high %v5354_v13, %v5354_v13  ;;  %v5366_v18 = vrot.slane %v3597_v14, %v5328_v31  ;;  %v3639_v50 = vpack.c.bf16 %v5354_v13, %v5354_v13  ;;  %v5056_v6 = vld [vmem:[%s5571_s3 + $0x128] sm:$0xff]   ;;  %v5061_v13 = vld [vmem:[%s5571_s3 + $0x1f0] sm:$0xff]  }
 0x1fd   :  { %4859 = vmatprep.subr.bf16.mxu0 %v5007_v8  ;;  %4881 = vmatprep.subr.bf16.mxu1 %v5008_v10  ;;  %v5058_v11 = vld [vmem:[%s5571_s3 + $0x1a8] sm:$0xff]   ;;  %v5059_v8 = vld [vmem:[%s5571_s3 + $0x170] sm:$0xff]  }
 0x1fe   :  { %v3640_v20 = vpack.c.bf16 %v3612_v16, %v3612_v16  ;;  %v3613_v21 = vcombine.high %v5366_v18, %v5366_v18  ;;  %v3641_v42 = vpack.c.bf16 %v5366_v18, %v5366_v18  ;;  %v5060_v10 = vld [vmem:[%s5571_s3 + $0x130] sm:$0xff]   ;;  %v5065_v16 = vld [vmem:[%s5571_s3 + $0x1f8] sm:$0xff]  }
 0x1ff   :  { %v5062_v14 = vld [vmem:[%s5571_s3 + $0x1b0] sm:$0xff]   ;;  %v5066_v18 = vld [vmem:[%s5571_s3 + $0x1b8] sm:$0xff]  }
 0x200   :  { %4860 = vmatpush3.bf16.msra.mxu0 %v5009_v15  ;;  %4198 = vmatprep.mubr.bf16.mxu0 %v3640_v20  ;;  %v3642_v23 = vpack.c.bf16 %v3613_v21, %v3613_v21  ;;  %v5063_v15 = vld [vmem:[%s5571_s3 + $0x178] sm:$0xff]   ;;  %v3549_v20 = vsub.s32 6, %v5243_v44  ;;  %v3553_v21 = vsub.s32 7, %v5243_v44 }
 0x201   :  { %4882 = vmatpush3.bf16.msra.mxu1 %v5010_v17  ;;  %4861 = vmatprep.subr.bf16.mxu0 %v5011_v2  ;;  %v5064_v17 = vld [vmem:[%s5571_s3 + $0x138] sm:$0xff]   ;;  %v3541_v2 = vsub.s32 4, %v5243_v44  ;;  %s5169_s3 = smov [#allocation9]  }
 0x202   :  { %4883 = vmatprep.subr.bf16.mxu1 %v5012_v19  ;;  %4238 = vmatprep.mubr.bf16.mxu1 %v3642_v23  ;;  %v3545_v19 = vsub.s32 5, %v5243_v44  ;;  %s4334_s16 = sshll.u32 %s5169_s3, 4  ;;  %s4335_s16 = int_to_ptr.vmem [resolvable:$true] %s4334_s16 }
 0x203   :  { %s5133_s17 = scalar_lea.vmem %s4335_s16, 32  ;;  %p5138_p11 = scmp.lt.s32.totalorder %s4335_s16, %s4335_s16 }
 0x204   :  { %4862 = vmatpush3.bf16.msra.mxu0 %v5013_v22  ;;  %v3542_v22 = vrot.slane %v5321_v12, %v3541_v2  ;;  %v3546_v23 = vrot.slane %v5321_v12, %v3545_v19  ;;  %p5134_p10 = scmp.ne.s32.totalorder %s4335_s16, %s5133_s17  ;;  %p5139_p12 = scmp.lt.s32.totalorder %s5133_s17, %s5133_s17 }
 0x205   :  { %4884 = vmatpush3.bf16.msra.mxu1 %v5014_v24  ;;  %4863 = vmatprep.subr.bf16.mxu0 %v5015_v26  ;;  %v3550_v24 = vrot.slane %v5321_v12, %v3549_v20  ;;  %v3554_v26 = vrot.slane %v5321_v12, %v3553_v21 }
 0x206   :  { %4885 = vmatprep.subr.bf16.mxu1 %v5016_v27  ;;  %v3572_v27 = vcombine.low %v3542_v22, %v3546_v23  ;;  %p5140_p13 = por %p5139_p12, %p5138_p11 }
 0x208   :  { %4864 = vmatpush3.bf16.msra.mxu0 %v5017_v28  ;;  %v3573_v28 = vcombine.low %v3550_v24, %v3554_v26  ;;  %p5141_p0 = pnand %p5140_p13, %p5134_p10 }
 0x209   :  { %4886 = vmatpush3.bf16.msra.mxu1 %v5018_v29  ;;  %4865 = vmatprep.subr.bf16.mxu0 %v5019_v59 }
 0x20a   :  { %4887 = vmatprep.subr.bf16.mxu1 %v5020_v30 }
 0x20c   :  { %4866 = vmatpush3.bf16.msra.mxu0 %v5021_v32  ;;  %v3580_v32 = vrot.slane %v3572_v27, %v5328_v31 }
 0x20d   :  { %4888 = vmatpush3.bf16.msra.mxu1 %v5022_v33  ;;  %4867 = vmatprep.subr.bf16.mxu0 %v5023_v9  ;;  %v3587_v33 = vrot.slane %v3573_v28, %v5328_v31 }
 0x20e   :  { %4889 = vmatprep.subr.bf16.mxu1 %v5024_v34 }
 0x210   :  { %4868 = vmatpush3.bf16.msra.mxu0 %v5025_v35 }
 0x211   :  { %4890 = vmatpush3.bf16.msra.mxu1 %v5026_v38  ;;  %4869 = vmatprep.subr.bf16.mxu0 %v5027_v39 }
 0x212   :  { %4891 = vmatprep.subr.bf16.mxu1 %v5028_v40 }
 0x214   :  { %4870 = vmatpush3.bf16.msra.mxu0 %v5029_v25 }
 0x215   :  { %4892 = vmatpush3.bf16.msra.mxu1 %v5030_v41  ;;  %4871 = vmatprep.subr.bf16.mxu0 %v5031_v43  ;;  %v3588_v41 = vcombine.low %v3580_v32, %v3587_v33 }
 0x216   :  { %4893 = vmatprep.subr.bf16.mxu1 %v5032_v45 }
 0x218   :  { %4872 = vmatpush3.bf16.msra.mxu0 %v5033_v46 }
 0x219   :  { %4894 = vmatpush3.bf16.msra.mxu1 %v5034_v53  ;;  %4901 = vmatprep.subr.bf16.mxu0 %v5035_v47 }
 0x21a   :  { %4923 = vmatprep.subr.bf16.mxu1 %v5037_v48 }
 0x21b   :  { %4199 = vmatmul.mubr.bf16.vlgmr.msra.gmra.mrb[8].mxu0 %v3639_v50 }
 0x21c   :  { %4239 = vmatmul.mubr.bf16.vlgmr.msra.gmra.mrb[8].mxu1 %v3641_v42  ;;  %4902 = vmatpush3.bf16.msra.mxu0 %v5036_v49 }
 0x21d   :  { %4924 = vmatpush3.bf16.msra.mxu1 %v5038_v36  ;;  %4903 = vmatprep.subr.bf16.mxu0 %v5039_v51 }
 0x21e   :  { %4925 = vmatprep.subr.bf16.mxu1 %v5041_v52 }
 0x220   :  { %4904 = vmatpush3.bf16.msra.mxu0 %v5040_v54 }
 0x221   :  { %4926 = vmatpush3.bf16.msra.mxu1 %v5042_v55  ;;  %4905 = vmatprep.subr.bf16.mxu0 %v5043_v56  ;;  %v4792_v56 = vld [vmem:[#allocation8] ss:$0 sm:$0xff] }
 0x222   :  { %4927 = vmatprep.subr.bf16.mxu1 %v5045_v57 }
 0x224   :  { %4906 = vmatpush3.bf16.msra.mxu0 %v5044_v58 }
 0x225   :  { %4928 = vmatpush3.bf16.msra.mxu1 %v5046_v60  ;;  %4907 = vmatprep.subr.bf16.mxu0 %v5047_v37 }
 0x226   :  { %4929 = vmatprep.subr.bf16.mxu1 %v5049_v62 }
 0x228   :  { %4908 = vmatpush3.bf16.msra.mxu0 %v5048_v61 }
 0x229   :  { %4930 = vmatpush3.bf16.msra.mxu1 %v5050_v63  ;;  %4909 = vmatprep.subr.bf16.mxu0 %v5051_v0 }
 0x22a   :  { %4931 = vmatprep.subr.bf16.mxu1 %v5053_v3 }
 0x22c   :  { %4910 = vmatpush3.bf16.msra.mxu0 %v5052_v1 }
 0x22d   :  { %4932 = vmatpush3.bf16.msra.mxu1 %v5054_v4  ;;  %4911 = vmatprep.subr.bf16.mxu0 %v5055_v5 }
 0x22e   :  { %4933 = vmatprep.subr.bf16.mxu1 %v5057_v7 }
 0x230   :  { %4912 = vmatpush3.bf16.msra.mxu0 %v5056_v6 }
 0x231   :  { %4934 = vmatpush3.bf16.msra.mxu1 %v5058_v11  ;;  %4913 = vmatprep.subr.bf16.mxu0 %v5059_v8 }
 0x232   :  { %4935 = vmatprep.subr.bf16.mxu1 %v5061_v13 }
 0x234   :  { %4914 = vmatpush3.bf16.msra.mxu0 %v5060_v10 }
 0x235   :  { %4915 = vmatprep.subr.bf16.mxu0 %v5063_v15  ;;  %4936 = vmatpush3.bf16.msra.mxu1 %v5062_v14 }
 0x236   :  { %4937 = vmatprep.subr.bf16.mxu1 %v5065_v16 }
 0x238   :  { %4916 = vmatpush3.bf16.msra.mxu0 %v5064_v17 }
 0x239   :  { %4938 = vmatpush3.bf16.msra.mxu1 %v5066_v18 }
 0x2ce   :  { %v3297_v29 = vpop.f32.mrb[4].mxu0  ;;  %v3461_v59 = vpop.f32.mrb[4].mxu1 }
 0x2cf   :  { %v3299_v30 = vpop.f32.mrb[5].mxu0  ;;  %v3463_v34 = vpop.f32.mrb[5].mxu1 }
 0x2d0   :  { %v3493_v9 = vcombine.low %v3297_v29, %v3299_v30  ;;  %v3301_v44 = vpop.f32.mrb[6].mxu0  ;;  %v3494_v35 = vcombine.low %v3461_v59, %v3463_v34  ;;  %v3465_v38 = vpop.f32.mrb[6].mxu1 }
 0x2d1   :  { %v3302_v39 = vpop.f32.mrb[7].mxu0  ;;  %v3466_v25 = vpop.f32.mrb[7].mxu1 }
 0x2d2   :  { %v3501_v40 = vrot.slane %v3493_v9, %v5328_v31  ;;  %v3508_v12 = vrot.slane %v3494_v35, %v5328_v31 }
 0x2d4   :  { %v3509_v43 = vcombine.low %v3501_v40, %v3508_v12 }
 0x2d6   :  { %v3592_v45 = vadd.f32 %v3588_v41, %v3509_v43 }
 0x2d8   :  { %v3594_v46 = vmax.f32 %v3592_v45, 0.0 }
 0x2da   :  { %v3621_v53 = vrot.slane %v3594_v46, %v5328_v31  ;;  %v3614_v47 = vcombine.high %v3594_v46, %v3594_v46 }
 0x2dc   :  { %v3629_v48 = vcombine.high %v3621_v53, %v3621_v53  ;;  %v3628_v49 = vrot.slane %v3614_v47, %v5328_v31  ;;  %v3643_v51 = vpack.c.bf16 %v3621_v53, %v3621_v53 }
 0x2de   :  { %v3644_v50 = vpack.c.bf16 %v3629_v48, %v3629_v48  ;;  %v3630_v36 = vcombine.high %v3628_v49, %v3628_v49  ;;  %v3645_v52 = vpack.c.bf16 %v3628_v49, %v3628_v49 }
 0x2e0   :  { %4278 = vmatprep.mubr.bf16.mxu0 %v3644_v50  ;;  %v3646_v42 = vpack.c.bf16 %v3630_v36, %v3630_v36 }
 0x2e1   :  { %4279 = vmatmul.mubr.bf16.vlgmr.msra.gmra.mrb[12].mxu0 %v3643_v51 }
 0x2e2   :  { %4318 = vmatprep.mubr.bf16.mxu1 %v3646_v42 }
 0x2e3   :  { %4319 = vmatmul.mubr.bf16.vlgmr.msra.gmra.mrb[12].mxu1 %v3645_v52 }
 0x2ee   :  { %v4873_v54 = vpop.f32.mrb[8].mxu0 }
 0x2ef   :  { %v4895_v55 = vpop.f32.mrb[8].mxu1  ;;  %v4874_v57 = vpop.f32.mrb[9].mxu0 }
 0x2f0   :  { %v4875_v58 = vadd.f32 %v4874_v57, %v4873_v54  ;;  %v4896_v60 = vpop.f32.mrb[9].mxu1  ;;  %v4876_v37 = vpop.f32.mrb[10].mxu0 }
 0x2f1   :  { %v4897_v61 = vadd.f32 %v4896_v60, %v4895_v55  ;;  %v4898_v62 = vpop.f32.mrb[10].mxu1  ;;  %v4877_v63 = vpop.f32.mrb[11].mxu0 }
 0x2f2   :  { %v4201_v31 = vadd.f32 %v4875_v58, %v4792_v56  ;;  %v4899_v0 = vpop.f32.mrb[11].mxu1 }
 0x2f4   :  { %v4241_v1 = vadd.f32 %v4897_v61, %v4201_v31 }
 0x3b4   :  { %v4917_v3 = vpop.f32.mrb[12].mxu0 }
 0x3b5   :  { %v4918_v4 = vpop.f32.mrb[13].mxu0 }
 0x3b6   :  { %v4919_v5 = vadd.f32 %v4918_v4, %v4917_v3  ;;  %v4920_v6 = vpop.f32.mrb[14].mxu0  ;;  %v4939_v7 = vpop.f32.mrb[12].mxu1 }
 0x3b7   :  { %v4921_v11 = vpop.f32.mrb[15].mxu0  ;;  %v4940_v8 = vpop.f32.mrb[13].mxu1 }
 0x3b8   :  { %v4281_v10 = vadd.f32 %v4919_v5, %v4241_v1  ;;  %v4941_v13 = vadd.f32 %v4940_v8, %v4939_v7  ;;  %v4942_v14 = vpop.f32.mrb[14].mxu1 }
 0x3b9   :  { %v4943_v15 = vpop.f32.mrb[15].mxu1 }
 0x3ba   :  { %v4321_v16 = vadd.f32 %v4941_v13, %v4281_v10 }
 0x3bc   :  { %4327 = vst.msk [vmem:[#allocation9] sm:$0x3] %vm4326_vm0, %v4321_v16 }
 0x3bd   :  { %5144 = shalt.err (!%p5141_p0)
}
 0x3be   :  { %s5145_s20 = scalar_lea.hbm %s5573_s5, 32 }
 0x3bf   :  { %p5146_p1 = scmp.ne.s32.totalorder %s5573_s5, %s5145_s20  ;;  %p5149_p2 = scmp.lt.u32.totalorder %s5145_s20, %s5573_s5 }
 0x3c1   :  { %p5151_p3 = pnand %p5149_p2, %p5146_p1 }
 0x3c3   :  { %5154 = shalt.err (!%p5151_p3)
}
 0x3c4   :  { %4337 = dma.vmem_to_hbm [thread:$0]  %s4335_s16, 32, %s5573_s5, [#allocation5]  }
 0x3c5   :  { %5159 = dma.done.wait [#allocation5], 32  }
 0x3c6   :  { %5160 = vsyncadd [#allocation5], 4294967264 }
 0x3c7   :  { %4341 = vsyncpa [#allocation4], 1 }
 0x3c8   :  { %4342 = vsyncpa [#allocation7], 1 }
 0x3c9   :  { %4343 = vsyncpa [#allocation5], 1 }

// kernel: sgn_branch_forward.2
= control target key start
LH: loop header
LB: loop body
LE: loop exit
PB: predicated region body
PF: predicated region fallthrough
CT: control target
= control target key end

     0   :  { %16 = vsyncpa [#allocation5], 0  ;;  %s6630_s0 = inlined_call_operand.vmem [shape: bf16[2,16,10], index: 0, kind: input, shape index: {}]   ;;  %s6631_s1 = inlined_call_operand.hbm [shape: bf16[10,128], index: 1, kind: input, shape index: {}]   ;;  %s6632_s2 = inlined_call_operand.hbm [shape: f32[1,128], index: 2, kind: input, shape index: {}]   ;;  %s6633_s3 = inlined_call_operand.hbm [shape: bf16[8,128,128], index: 3, kind: input, shape index: {}]   ;;  %s6634_s4 = inlined_call_operand.hbm [shape: f32[1,128], index: 4, kind: input, shape index: {}]   ;;  %s6635_s5 = inlined_call_operand.hbm [shape: bf16[6,128,128], index: 5, kind: input, shape index: {}]   ;;  %s6636_s6 = inlined_call_operand.hbm [shape: f32[1,128], index: 6, kind: input, shape index: {}]   ;;  %s6637_s7 = inlined_call_operand.hbm [shape: bf16[5,128,128], index: 7, kind: input, shape index: {}]   ;;  %s6638_s8 = inlined_call_operand.hbm [shape: f32[1,128], index: 8, kind: input, shape index: {}]   ;;  %s6639_s9 = inlined_call_operand.hbm [shape: bf16[5,128,128], index: 9, kind: input, shape index: {}]   ;;  %s6640_s10 = inlined_call_operand.hbm [shape: f32[1,128], index: 10, kind: input, shape index: {}]   ;;  %s6641_s11 = inlined_call_operand.vmem [shape: bf16[2,16,50], index: 11, kind: output, shape index: {}]  }
   0x1   :  { %17 = vsyncpa [#allocation7], 0 }
   0x2   :  { %18 = vsyncpa [#allocation10], 0 }
   0x3   :  { %19 = vsyncpa [#allocation13], 0 }
   0x4   :  { %20 = vsyncpa [#allocation16], 0 }
   0x5   :  { %21 = vsyncpa [#allocation19], 0  ;;  %s5885_s17 = smov [#allocation6]   ;;  %s5886_s19 = smov [#allocation9]  }
   0x6   :  { %s42_s18 = sshll.u32 %s5885_s17, 4  ;;  %s64_s20 = sshll.u32 %s5886_s19, 4  ;;  %s43_s18 = int_to_ptr.vmem [resolvable:$true] %s42_s18  ;;  %s65_s20 = int_to_ptr.vmem [resolvable:$true] %s64_s20 }
   0x7   :  { %s5653_s23 = scalar_lea.hbm %s6632_s2, 16 }
   0x8   :  { %p5654_p0 = scmp.ne.s32.totalorder %s6632_s2, %s5653_s23  ;;  %p5657_p1 = scmp.lt.u32.totalorder %s5653_s23, %s6632_s2 }
   0xa   :  { %p5659_p2 = pnand %p5657_p1, %p5654_p0 }
   0xc   :  { %5662 = shalt.err (!%p5659_p2)
}
   0xd   :  { %s5663_s28 = scalar_lea.vmem %s43_s18, 16  ;;  %s5667_s29 = scalar_lea.vmem %s43_s18, 32 }
   0xe   :  { %p5664_p3 = scmp.ne.s32.totalorder %s43_s18, %s5663_s28  ;;  %p5668_p4 = scmp.lt.s32.totalorder %s43_s18, %s43_s18 }
   0xf   :  { %p5669_p5 = scmp.lt.s32.totalorder %s5667_s29, %s5663_s28 }
  0x11   :  { %p5670_p6 = por %p5669_p5, %p5668_p4 }
  0x13   :  { %p5671_p7 = pnand %p5670_p6, %p5664_p3 }
  0x15   :  { %5674 = shalt.err (!%p5671_p7)
}
  0x16   :  { %45 = dma.hbm_to_vmem [thread:$0]  %s6632_s2, 16, %s43_s18, [#allocation7]  }
  0x17   :  { %s5675_s15 = scalar_lea.hbm %s6634_s4, 16 }
  0x18   :  { %p5676_p8 = scmp.ne.s32.totalorder %s6634_s4, %s5675_s15  ;;  %p5679_p9 = scmp.lt.u32.totalorder %s5675_s15, %s6634_s4 }
  0x1a   :  { %p5681_p10 = pnand %p5679_p9, %p5676_p8 }
  0x1c   :  { %5684 = shalt.err (!%p5681_p10)
}
  0x1d   :  { %s5685_s22 = scalar_lea.vmem %s65_s20, 16  ;;  %s5689_s23 = scalar_lea.vmem %s65_s20, 32 }
  0x1e   :  { %p5686_p11 = scmp.ne.s32.totalorder %s65_s20, %s5685_s22  ;;  %p5690_p12 = scmp.lt.s32.totalorder %s65_s20, %s65_s20 }
  0x1f   :  { %p5691_p13 = scmp.lt.s32.totalorder %s5689_s23, %s5685_s22 }
  0x21   :  { %p5692_p0 = por %p5691_p13, %p5690_p12 }
  0x23   :  { %p5693_p1 = pnand %p5692_p0, %p5686_p11 }
  0x25   :  { %5696 = shalt.err (!%p5693_p1)
}
  0x26   :  { %67 = dma.hbm_to_vmem [thread:$0]  %s6634_s4, 16, %s65_s20, [#allocation10]  }
  0x27   :  { %s5887_s24 = smov [#allocation12]   ;;  %s5888_s26 = smov [#allocation15]  }
  0x28   :  { %s86_s25 = sshll.u32 %s5887_s24, 4  ;;  %s108_s27 = sshll.u32 %s5888_s26, 4  ;;  %s87_s25 = int_to_ptr.vmem [resolvable:$true] %s86_s25  ;;  %s109_s27 = int_to_ptr.vmem [resolvable:$true] %s108_s27 }
  0x29   :  { %s5697_s30 = scalar_lea.hbm %s6636_s6, 16 }
  0x2a   :  { %p5698_p2 = scmp.ne.s32.totalorder %s6636_s6, %s5697_s30  ;;  %p5701_p3 = scmp.lt.u32.totalorder %s5697_s30, %s6636_s6 }
  0x2c   :  { %p5703_p4 = pnand %p5701_p3, %p5698_p2 }
  0x2e   :  { %5706 = shalt.err (!%p5703_p4)
}
  0x2f   :  { %s5707_s4 = scalar_lea.vmem %s87_s25, 16  ;;  %s5711_s20 = scalar_lea.vmem %s87_s25, 32 }
  0x30   :  { %p5708_p5 = scmp.ne.s32.totalorder %s87_s25, %s5707_s4  ;;  %p5712_p6 = scmp.lt.s32.totalorder %s87_s25, %s87_s25 }
  0x31   :  { %p5713_p7 = scmp.lt.s32.totalorder %s5711_s20, %s5707_s4 }
  0x33   :  { %p5714_p8 = por %p5713_p7, %p5712_p6 }
  0x35   :  { %p5715_p9 = pnand %p5714_p8, %p5708_p5 }
  0x37   :  { %5718 = shalt.err (!%p5715_p9)
}
  0x38   :  { %89 = dma.hbm_to_vmem [thread:$0]  %s6636_s6, 16, %s87_s25, [#allocation13]  }
  0x39   :  { %s5719_s22 = scalar_lea.hbm %s6638_s8, 16 }
  0x3a   :  { %p5720_p10 = scmp.ne.s32.totalorder %s6638_s8, %s5719_s22  ;;  %p5723_p11 = scmp.lt.u32.totalorder %s5719_s22, %s6638_s8 }
  0x3c   :  { %p5725_p12 = pnand %p5723_p11, %p5720_p10 }
  0x3e   :  { %5728 = shalt.err (!%p5725_p12)
}
  0x3f   :  { %s5729_s26 = scalar_lea.vmem %s109_s27, 16  ;;  %s5733_s28 = scalar_lea.vmem %s109_s27, 32 }
  0x40   :  { %p5730_p13 = scmp.ne.s32.totalorder %s109_s27, %s5729_s26  ;;  %p5734_p0 = scmp.lt.s32.totalorder %s109_s27, %s109_s27 }
  0x41   :  { %p5735_p1 = scmp.lt.s32.totalorder %s5733_s28, %s5729_s26 }
  0x43   :  { %p5736_p2 = por %p5735_p1, %p5734_p0 }
  0x45   :  { %p5737_p3 = pnand %p5736_p2, %p5730_p13 }
  0x47   :  { %5740 = shalt.err (!%p5737_p3)
}
  0x48   :  { %111 = dma.hbm_to_vmem [thread:$0]  %s6638_s8, 16, %s109_s27, [#allocation16]  }
  0x49   :  { %s5889_s29 = smov [#allocation4]   ;;  %s5741_s14 = scalar_lea.hbm %s6631_s1, 128 }
  0x4a   :  { %s29_s30 = sshll.u32 %s5889_s29, 4  ;;  %p5742_p4 = scmp.ne.s32.totalorder %s6631_s1, %s5741_s14  ;;  %s30_s30 = int_to_ptr.vmem [resolvable:$true] %s29_s30 }
  0x4b   :  { %p5745_p5 = scmp.lt.u32.totalorder %s5741_s14, %s6631_s1 }
  0x4d   :  { %p5747_p6 = pnand %p5745_p5, %p5742_p4 }
  0x4f   :  { %5750 = shalt.err (!%p5747_p6)
}
  0x50   :  { %s5751_s17 = scalar_lea.vmem %s30_s30, 128  ;;  %p5756_p8 = scmp.lt.s32.totalorder %s30_s30, %s30_s30 }
  0x51   :  { %p5752_p7 = scmp.ne.s32.totalorder %s30_s30, %s5751_s17  ;;  %p5757_p9 = scmp.lt.s32.totalorder %s5751_s17, %s5751_s17 }
  0x53   :  { %p5758_p10 = por %p5757_p9, %p5756_p8 }
  0x55   :  { %p5759_p11 = pnand %p5758_p10, %p5752_p7 }
  0x57   :  { %5762 = shalt.err (!%p5759_p11)
}
  0x58   :  { %s5890_s8 = smov 64   ;;  %s5891_s27 = smov 4  }
  0x59   :  { %35 = dma.hbm_to_vmem [thread:$0]  %s6631_s1, 128, %s30_s30, [#allocation5], %s5890_s8, %s5890_s8, %s5891_s27  }
  0x5a   :  { %s5892_s22 = smov [#allocation8]   ;;  %s5893_s2 = smov [#allocation11]  }
  0x5b   :  { %s51_s23 = sshll.u32 %s5892_s22, 4  ;;  %s73_s18 = sshll.u32 %s5893_s2, 4  ;;  %s52_s23 = int_to_ptr.vmem [resolvable:$true] %s51_s23  ;;  %s74_s18 = int_to_ptr.vmem [resolvable:$true] %s73_s18 }
  0x5c   :  { %s5763_s28 = scalar_lea.hbm %s6633_s3, 8192 }
  0x5d   :  { %p5764_p12 = scmp.ne.s32.totalorder %s6633_s3, %s5763_s28  ;;  %p5767_p13 = scmp.lt.u32.totalorder %s5763_s28, %s6633_s3 }
  0x5f   :  { %p5769_p0 = pnand %p5767_p13, %p5764_p12 }
  0x61   :  { %5772 = shalt.err (!%p5769_p0)
}
  0x62   :  { %s5773_s1 = scalar_lea.vmem %s52_s23, 8192  ;;  %p5778_p2 = scmp.lt.s32.totalorder %s52_s23, %s52_s23 }
  0x63   :  { %p5774_p1 = scmp.ne.s32.totalorder %s52_s23, %s5773_s1  ;;  %p5779_p3 = scmp.lt.s32.totalorder %s5773_s1, %s5773_s1 }
  0x65   :  { %p5780_p4 = por %p5779_p3, %p5778_p2 }
  0x67   :  { %p5781_p5 = pnand %p5780_p4, %p5774_p1 }
  0x69   :  { %5784 = shalt.err (!%p5781_p5)
}
  0x6a   :  { %57 = dma.hbm_to_vmem [thread:$0]  %s6633_s3, 8192, %s52_s23, [#allocation7], %s5890_s8, %s5890_s8, %s5891_s27  }
  0x6b   :  { %s5785_s4 = scalar_lea.hbm %s6635_s5, 6144 }
  0x6c   :  { %p5786_p6 = scmp.ne.s32.totalorder %s6635_s5, %s5785_s4  ;;  %p5789_p7 = scmp.lt.u32.totalorder %s5785_s4, %s6635_s5 }
  0x6e   :  { %p5791_p8 = pnand %p5789_p7, %p5786_p6 }
  0x70   :  { %5794 = shalt.err (!%p5791_p8)
}
  0x71   :  { %s5795_s21 = scalar_lea.vmem %s74_s18, 6144  ;;  %p5800_p10 = scmp.lt.s32.totalorder %s74_s18, %s74_s18 }
  0x72   :  { %p5796_p9 = scmp.ne.s32.totalorder %s74_s18, %s5795_s21  ;;  %p5801_p11 = scmp.lt.s32.totalorder %s5795_s21, %s5795_s21 }
  0x74   :  { %p5802_p12 = por %p5801_p11, %p5800_p10 }
  0x76   :  { %p5803_p13 = pnand %p5802_p12, %p5796_p9 }
  0x78   :  { %5806 = shalt.err (!%p5803_p13)
}
  0x79   :  { %79 = dma.hbm_to_vmem [thread:$0]  %s6635_s5, 6144, %s74_s18, [#allocation10], %s5890_s8, %s5890_s8, %s5891_s27  }
  0x7a   :  { %s5894_s23 = smov [#allocation14]   ;;  %s5895_s24 = smov [#allocation17]  }
  0x7b   :  { %s95_s2 = sshll.u32 %s5894_s23, 4  ;;  %s117_s26 = sshll.u32 %s5895_s24, 4  ;;  %s96_s2 = int_to_ptr.vmem [resolvable:$true] %s95_s2  ;;  %s118_s26 = int_to_ptr.vmem [resolvable:$true] %s117_s26 }
  0x7c   :  { %s5807_s25 = scalar_lea.hbm %s6637_s7, 5120 }
  0x7d   :  { %p5808_p0 = scmp.ne.s32.totalorder %s6637_s7, %s5807_s25  ;;  %p5811_p1 = scmp.lt.u32.totalorder %s5807_s25, %s6637_s7 }
  0x7f   :  { %p5813_p2 = pnand %p5811_p1, %p5808_p0 }
  0x81   :  { %5816 = shalt.err (!%p5813_p2)
}
  0x82   :  { %s5817_s5 = scalar_lea.vmem %s96_s2, 5120  ;;  %p5822_p4 = scmp.lt.s32.totalorder %s96_s2, %s96_s2 }
  0x83   :  { %p5818_p3 = scmp.ne.s32.totalorder %s96_s2, %s5817_s5  ;;  %p5823_p5 = scmp.lt.s32.totalorder %s5817_s5, %s5817_s5 }
  0x85   :  { %p5824_p6 = por %p5823_p5, %p5822_p4 }
  0x87   :  { %p5825_p7 = pnand %p5824_p6, %p5818_p3 }
  0x89   :  { %5828 = shalt.err (!%p5825_p7)
}
  0x8a   :  { %101 = dma.hbm_to_vmem [thread:$0]  %s6637_s7, 5120, %s96_s2, [#allocation13], %s5890_s8, %s5890_s8, %s5891_s27  }
  0x8b   :  { %s5829_s4 = scalar_lea.hbm %s6639_s9, 5120 }
  0x8c   :  { %p5830_p8 = scmp.ne.s32.totalorder %s6639_s9, %s5829_s4  ;;  %p5833_p9 = scmp.lt.u32.totalorder %s5829_s4, %s6639_s9 }
  0x8e   :  { %p5835_p10 = pnand %p5833_p9, %p5830_p8 }
  0x90   :  { %5838 = shalt.err (!%p5835_p10)
}
  0x91   :  { %s5839_s21 = scalar_lea.vmem %s118_s26, 5120  ;;  %p5844_p12 = scmp.lt.s32.totalorder %s118_s26, %s118_s26 }
  0x92   :  { %p5840_p11 = scmp.ne.s32.totalorder %s118_s26, %s5839_s21  ;;  %p5845_p13 = scmp.lt.s32.totalorder %s5839_s21, %s5839_s21 }
  0x94   :  { %p5846_p0 = por %p5845_p13, %p5844_p12 }
  0x96   :  { %p5847_p1 = pnand %p5846_p0, %p5840_p11 }
  0x98   :  { %5850 = shalt.err (!%p5847_p1)
}
  0x99   :  { %123 = dma.hbm_to_vmem [thread:$0]  %s6639_s9, 5120, %s118_s26, [#allocation16], %s5890_s8, %s5890_s8, %s5891_s27  }
  0x9a   :  { %s5896_s22 = smov [#allocation18]   ;;  %s5851_s28 = scalar_lea.hbm %s6640_s10, 16 }
  0x9b   :  { %s130_s23 = sshll.u32 %s5896_s22, 4  ;;  %p5852_p2 = scmp.ne.s32.totalorder %s6640_s10, %s5851_s28  ;;  %s131_s23 = int_to_ptr.vmem [resolvable:$true] %s130_s23 }
  0x9c   :  { %p5855_p3 = scmp.lt.u32.totalorder %s5851_s28, %s6640_s10 }
  0x9e   :  { %p5857_p4 = pnand %p5855_p3, %p5852_p2 }
  0xa0   :  { %5860 = shalt.err (!%p5857_p4)
}
  0xa1   :  { %s5861_s1 = scalar_lea.vmem %s131_s23, 16  ;;  %s5865_s9 = scalar_lea.vmem %s131_s23, 32 }
  0xa2   :  { %p5862_p5 = scmp.ne.s32.totalorder %s131_s23, %s5861_s1  ;;  %p5866_p6 = scmp.lt.s32.totalorder %s131_s23, %s131_s23 }
  0xa3   :  { %p5867_p7 = scmp.lt.s32.totalorder %s5865_s9, %s5861_s1 }
  0xa5   :  { %p5868_p8 = por %p5867_p7, %p5866_p6 }
  0xa7   :  { %p5869_p9 = pnand %p5868_p8, %p5862_p5 }
  0xa9   :  { %5872 = shalt.err (!%p5869_p9)
}
  0xaa   :  { %133 = dma.hbm_to_vmem [thread:$0]  %s6640_s10, 16, %s131_s23, [#allocation19]  }
  0xab   :  { %5873 = dma.done.wait [#allocation5], 128  }
  0xac   :  { %5874 = vsyncadd [#allocation5], 4294967168 }
  0xad   :  { %5875 = dma.done.wait [#allocation7], 8208  }
  0xae   :  { %5876 = vsyncadd [#allocation7], 4294959088 }
  0xaf   :  { %5877 = dma.done.wait [#allocation10], 6160  }
  0xb0   :  { %5878 = vsyncadd [#allocation10], 4294961136 }
  0xb1   :  { %5879 = dma.done.wait [#allocation13], 5136  }
  0xb2   :  { %5880 = vsyncadd [#allocation13], 4294962160 }
  0xb3   :  { %5881 = dma.done.wait [#allocation16], 5136  }
  0xb4   :  { %5882 = vsyncadd [#allocation16], 4294962160 }
  0xb5   :  { %5883 = dma.done.wait [#allocation19], 16  }
  0xb6   :  { %5884 = vsyncadd [#allocation19], 4294967280  ;;  %vm200_vm0 = vcmask 1044480   ;;  %vm193_vm1 = vcmask 80896   ;;  %v5450_v0 = vld [vmem:[#allocation4] sm:$0x1f]  }
  0xb7   :  { %v5451_v1 = vld [vmem:[%s6630_s0] sm:$0xff]   ;;  %5436 = vmatprep.subr.msk.bf16.mxu0 %vm200_vm0, %v5450_v0  ;;  %v202_v2 = vsel %vm200_vm0, %v5450_v0, 0  ;;  %v5452_v3 = vld [vmem:[%s6630_s0 + $0x8] sm:$0xff]   ;;  %vm257_vm2 = vcmask 1041408   ;;  %vm258_vm3 = vsmask.f32 1280 }
  0xb8   :  { %4871 = vmatpush3.bf16.msra.mxu0 %v202_v2  ;;  %4872 = vmatprep.mubr.msk.bf16.mxu0 %vm193_vm1, %v5451_v1  ;;  %v5453_v4 = vld [vmem:[#allocation8] sm:$0xff]   ;;  %v5454_v5 = vld [vmem:[#allocation8 + $0x8] sm:$0xff]   ;;  %v5455_v6 = vld [vmem:[#allocation8 + $0x10] sm:$0xff]   ;;  %v5897_v25 = vmov 0   ;;  %vm324_vm5 = vcmask 1043457   ;;  %vm663_vm10 = vcmask 1042432  }
  0xb9   :  { %4896 = vmatprep.subr.bf16.mxu1 %v5453_v4  ;;  %vm6101_vm4 = vmand %vm257_vm2, %vm258_vm3  ;;  %v263_v8 = vld [vmem:[#allocation2 + $0xc] sm:$0x3]  ;;  %v5456_v9 = vld [vmem:[#allocation8 + $0x40] sm:$0xff]   ;;  %1634 = vst [vmem:[#allocation3] sm:$0x1] %v5897_v25  ;;  %vm664_vm11 = vcmask 1046532  }
  0xba   :  { %4897 = vmatpush3.bf16.msra.mxu1 %v5453_v4  ;;  %v264_v10 = vsel %vm6101_vm4, 0, %v263_v8  ;;  %v260_v11 = vld [vmem:[#allocation2] sm:$0x3]  ;;  %v5457_v12 = vld [vmem:[#allocation8 + $0x18] sm:$0xff]   ;;  %4876 = vmatprep.subr.bf16.mxu0 %v5456_v9  ;;  %v5458_v14 = vld [vmem:[#allocation8 + $0x48] sm:$0xff]  }
  0xbb   :  { %4873 = vmatmul.mubr.msk.bf16.vlgmr.msra.gmra.mrb[0].mxu0 %vm193_vm1, %v5452_v3  ;;  %4898 = vmatprep.subr.bf16.mxu1 %v5454_v5  ;;  %265 = vst [vmem:[#allocation2 + $0xc] sm:$0x3] %v264_v10  ;;  %v261_v13 = vsel %vm6101_vm4, 0, %v260_v11  ;;  %v5459_v15 = vld [vmem:[#allocation8 + $0x20] sm:$0xff]   ;;  %v5460_v16 = vld [vmem:[#allocation8 + $0x50] sm:$0xff]   ;;  %v5461_v17 = vld [vmem:[#allocation8 + $0x28] sm:$0xff]  }
  0xbc   :  { %262 = vst [vmem:[#allocation2] sm:$0x3] %v261_v13  ;;  %4877 = vmatpush3.bf16.msra.mxu0 %v5456_v9  ;;  %v5462_v18 = vld [vmem:[#allocation8 + $0x58] sm:$0xff]   ;;  %v5463_v19 = vld [vmem:[#allocation8 + $0x30] sm:$0xff]   ;;  %v5464_v20 = vld [vmem:[#allocation8 + $0x60] sm:$0xff]  }
  0xbd   :  { %4878 = vmatprep.subr.bf16.mxu0 %v5458_v14  ;;  %v5465_v21 = vld [vmem:[#allocation8 + $0x38] sm:$0xff]   ;;  %v5466_v22 = vld [vmem:[#allocation8 + $0x68] sm:$0xff]   ;;  %v6109_v23 = vld [vmem:[#allocation8 + $0x80] sm:$0xff]   ;;  %1635 = vst [vmem:[#allocation3 + $0xc] sm:$0x1] %v5897_v25 }
  0xbe   :  { %4899 = vmatpush3.bf16.msra.mxu1 %v5454_v5  ;;  %v5470_v24 = vld [vmem:[#allocation8 + $0x70] sm:$0xff]   ;;  %1670 = vst [vmem:[#allocation3 + $0x8] sm:$0xe] %v5897_v25  ;;  %1671 = vst [vmem:[#allocation3 + $0x14] sm:$0xe] %v5897_v25  ;;  %v5472_v26 = vld [vmem:[#allocation8 + $0x78] sm:$0xff]  }
  0xbf   :  { %4900 = vmatprep.subr.bf16.mxu1 %v5455_v6  ;;  %v4317_v27 = vld [vmem:[#allocation6] ss:$0 sm:$0xff]  ;;  %vm325_vm6 = vsmask.f32 7942  ;;  %vm278_vm7 = vsmask.f32 5392  ;;  %vm6141_vm14 = vmor %vm663_vm10, %vm664_vm11 }
  0xc0   :  { %4879 = vmatpush3.bf16.msra.mxu0 %v5458_v14  ;;  %vm6117_vm8 = vmand %vm324_vm5, %vm325_vm6  ;;  %v338_v8 = vld [vmem:[#allocation2 + $0x14] sm:$0x3]  ;;  %vm373_vm12 = vsmask.f32 3328  ;;  %vm374_vm13 = vsmask.f32 7440 }
  0xc1   :  { %4880 = vmatprep.subr.bf16.mxu0 %v5460_v16  ;;  %vm6123_vm9 = vmor %vm258_vm3, %vm278_vm7  ;;  %vm808_vm0 = vsmask.f32 2304  ;;  %vm809_vm1 = vsmask.f32 6416  ;;  %vm1457_vm5 = vsmask.f32 4368 }
  0xc2   :  { %4901 = vmatpush3.bf16.msra.mxu1 %v5455_v6  ;;  %v334_v53 = vld [vmem:[#allocation2 + $0xc] sm:$0xe]  ;;  %vm6177_vm15 = vmor %vm373_vm12, %vm374_vm13  ;;  %vm989_vm7 = vcmask 1045508   ;;  %vm1312_vm10 = vcmask 1044484  }
  0xc3   :  { %4902 = vmatprep.subr.bf16.mxu1 %v5457_v12  ;;  %v327_v59 = vld [vmem:[#allocation2] sm:$0xe]  ;;  %vm6228_vm3 = vmor %vm808_vm0, %vm809_vm1  ;;  %v5575_v62 = vld [vmem:[#allocation14 + $0x70] sm:$0xff]  }
  0xc4   :  { %4881 = vmatpush3.bf16.msra.mxu0 %v5460_v16 }
  0xc5   :  { %4882 = vmatprep.subr.bf16.mxu0 %v5462_v18 }
  0xc6   :  { %4903 = vmatpush3.bf16.msra.mxu1 %v5457_v12  ;;  %v331_v12 = vld [vmem:[#allocation2 + $0x8] sm:$0x3] }
  0xc7   :  { %4904 = vmatprep.subr.bf16.mxu1 %v5459_v15 }
  0xc8   :  { %4883 = vmatpush3.bf16.msra.mxu0 %v5462_v18 }
  0xc9   :  { %4884 = vmatprep.subr.bf16.mxu0 %v5464_v20 }
  0xca   :  { %4905 = vmatpush3.bf16.msra.mxu1 %v5459_v15 }
  0xcb   :  { %4906 = vmatprep.subr.bf16.mxu1 %v5461_v17 }
  0xcc   :  { %4885 = vmatpush3.bf16.msra.mxu0 %v5464_v20 }
  0xcd   :  { %4886 = vmatprep.subr.bf16.mxu0 %v5466_v22 }
  0xce   :  { %4907 = vmatpush3.bf16.msra.mxu1 %v5461_v17 }
  0xcf   :  { %4908 = vmatprep.subr.bf16.mxu1 %v5463_v19 }
  0xd0   :  { %4887 = vmatpush3.bf16.msra.mxu0 %v5466_v22 }
  0xd1   :  { %4888 = vmatprep.subr.bf16.mxu0 %v5470_v24 }
  0xd2   :  { %4909 = vmatpush3.bf16.msra.mxu1 %v5463_v19 }
  0xd3   :  { %4910 = vmatprep.subr.bf16.mxu1 %v5465_v21 }
  0xd4   :  { %4889 = vmatpush3.bf16.msra.mxu0 %v5470_v24 }
  0xd5   :  { %4890 = vmatprep.subr.bf16.mxu0 %v5472_v26 }
  0xd6   :  { %4911 = vmatpush3.bf16.msra.mxu1 %v5465_v21  ;;  %v5471_v21 = vld [vmem:[#allocation8 + $0x88] sm:$0xff]  }
  0xd7   :  { %4916 = vmatprep.subr.bf16.mxu1 %v6109_v23 }
  0xd8   :  { %4891 = vmatpush3.bf16.msra.mxu0 %v5472_v26 }
 0x18e   :  { %v4874_v28 = vpop.f32.mrb[0].mxu0 }
 0x18f   :  { %v247_v29 = vadd.f32 %v4874_v28, %v4317_v27  ;;  %v238_v30 = vpop.f32.mrb[1].mxu0 }
 0x190   :  { %v239_v31 = vadd.f32 %v4317_v27, %v238_v30  ;;  %v4875_v32 = vpop.f32.mrb[2].mxu0 }
 0x191   :  { %v255_v33 = vmax.f32 %v247_v29, 0.0  ;;  %v250_v34 = vadd.f32 %v4875_v32, %v4317_v27  ;;  %v241_v35 = vpop.f32.mrb[3].mxu0 }
 0x192   :  { %v253_v36 = vmax.f32 %v239_v31, 0.0  ;;  %v242_v37 = vadd.f32 %v4317_v27, %v241_v35 }
 0x193   :  { %v4609_v38 = vpack.c.bf16 %v255_v33, %v255_v33  ;;  %v256_v39 = vmax.f32 %v250_v34, 0.0 }
 0x194   :  { %v4607_v40 = vpack.c.bf16 %v253_v36, %v253_v36  ;;  %v254_v41 = vmax.f32 %v242_v37, 0.0 }
 0x195   :  { %v300_v42 = vshrl.u32 %v4609_v38, 16  ;;  %v303_v43 = vshll.u32 %v4609_v38, 16  ;;  %v4610_v44 = vpack.c.bf16 %v256_v39, %v256_v39 }
 0x196   :  { %v281_v45 = vshrl.u32 %v4607_v40, 16  ;;  %v284_v46 = vshll.u32 %v4607_v40, 16  ;;  %v4608_v47 = vpack.c.bf16 %v254_v41, %v254_v41 }
 0x197   :  { %v302_v48 = vrot.slane %v300_v42, 6  ;;  %v305_v49 = vrot.slane %v303_v43, 7  ;;  %v309_v50 = vshrl.u32 %v4610_v44, 16  ;;  %v312_v51 = vshll.u32 %v4610_v44, 16 }
 0x198   :  { %v283_v54 = vrot.slane %v281_v45, 6  ;;  %v286_v55 = vrot.slane %v284_v46, 7  ;;  %v290_v56 = vshrl.u32 %v4608_v47, 16  ;;  %v293_v57 = vshll.u32 %v4608_v47, 16 }
 0x199   :  { %v306_v58 = vor.u32 %v305_v49, %v302_v48  ;;  %v311_v60 = vrot.slane %v309_v50, 6  ;;  %v314_v61 = vrot.slane %v312_v51, 7  ;;  %v5473_v49 = vld [vmem:[#allocation8 + $0x90] sm:$0xff]  }
 0x19a   :  { %v287_v63 = vor.u32 %v286_v55, %v283_v54  ;;  %v292_v0 = vrot.slane %v290_v56, 6  ;;  %v295_v1 = vrot.slane %v293_v57, 7 }
 0x19b   :  { %v307_v2 = vrot.slane %v306_v58, 4  ;;  %v335_v3 = vsel %vm6117_vm8, %v306_v58, %v334_v53  ;;  %v315_v4 = vor.u32 %v314_v61, %v311_v60 }
 0x19c   :  { %336 = vst [vmem:[#allocation2 + $0xc] sm:$0xe] %v335_v3  ;;  %v288_v5 = vrot.slane %v287_v63, 4  ;;  %v328_v6 = vsel %vm6117_vm8, %v287_v63, %v327_v59  ;;  %v296_v9 = vor.u32 %v295_v1, %v292_v0 }
 0x19d   :  { %329 = vst [vmem:[#allocation2] sm:$0xe] %v328_v6  ;;  %v316_v10 = vsel %vm6123_vm9, %v307_v2, %v315_v4  ;;  %v317_v11 = vrot.slane %v315_v4, 4  ;;  %v5474_v2 = vld [vmem:[#allocation8 + $0x98] sm:$0xff]  }
 0x19e   :  { %337 = vst [vmem:[#allocation2 + $0x10] sm:$0xf] %v316_v10  ;;  %v297_v13 = vsel %vm6123_vm9, %v288_v5, %v296_v9  ;;  %v298_v14 = vrot.slane %v296_v9, 4  ;;  %v5475_v9 = vld [vmem:[#allocation8 + $0xa0] sm:$0xff]  }
 0x19f   :  { %v339_v15 = vsel %vm6101_vm4, %v317_v11, %v338_v8  ;;  %330 = vst [vmem:[#allocation2 + $0x4] sm:$0xf] %v297_v13 }
 0x1a0   :  { %340 = vst [vmem:[#allocation2 + $0x14] sm:$0x3] %v339_v15  ;;  %v332_v16 = vsel %vm6101_vm4, %v298_v14, %v331_v12  ;;  %vm1456_vm4 = vsmask.f32 256 }
 0x1a1   :  { %333 = vst [vmem:[#allocation2 + $0x8] sm:$0x3] %v332_v16  ;;  %vm6249_vm6 = vmor %vm1456_vm4, %vm1457_vm5 }
 0x1a3   :  { %v370_v17 = vld [vmem:[#allocation2 + $0xc] sm:$0xf] }
 0x1a4   :  { %v367_v18 = vld [vmem:[#allocation2] sm:$0xf]  ;;  %v401_v29 = vshrl.u32 %v370_v17, 16  ;;  %v404_v51 = vshll.u32 %v370_v17, 16 }
 0x1a5   :  { %v6139_v19 = vld [vmem:[#allocation2] sm:$0xe]  ;;  %v5469_v20 = vld [vmem:[#allocation2 + $0xc] sm:$0xff]   ;;  %v377_v26 = vshrl.u32 %v367_v18, 16  ;;  %v380_v7 = vshll.u32 %v367_v18, 16 }
 0x1a6   :  { %v4347_v24 = vrot.slane %v6139_v19, 9  ;;  %v5467_v27 = vld [vmem:[#allocation2] sm:$0xff]   ;;  %2635 = vst [vmem:[#allocation2 + $0xc] sm:$0x1] %v5897_v25  ;;  %v6163_v43 = vld [vmem:[#allocation2 + $0x10] sm:$0xf] }
 0x1a7   :  { %v6147_v28 = vld [vmem:[#allocation2 + $0x4] sm:$0xf]  ;;  %v344_v30 = vld [vmem:[#allocation2 + $0x14] sm:$0xe]  ;;  %2634 = vst [vmem:[#allocation2] sm:$0x1] %v5897_v25  ;;  %4912 = vmatprep.mubr.bf16.mxu1 %v5467_v27 }
 0x1a8   :  { %v668_v31 = vrot.slane %v6147_v28, 5  ;;  %v379_v32 = vrot.slane %v377_v26, 4  ;;  %v382_v33 = vrot.slane %v380_v7, 5  ;;  %v6152_v34 = vshll.u32 %v6147_v28, 16  ;;  %v341_v36 = vld [vmem:[#allocation2 + $0x8] sm:$0xe]  ;;  %4913 = vmatmul.mubr.bf16.vlgmr.msra.gmra.mrb[0].mxu1 %v5469_v20 }
 0x1a9   :  { %v345_v35 = vsel %vm6117_vm8, 0, %v344_v30  ;;  %v369_v37 = vld [vmem:[#allocation2 + $0x8] sm:$0x1]  ;;  %v6157_v38 = vshrl.u32 %v6147_v28, 16  ;;  %v342_v39 = vsel %vm6117_vm8, 0, %v341_v36  ;;  %4917 = vmatpush3.bf16.msra.mxu1 %v6109_v23  ;;  %v403_v50 = vrot.slane %v401_v29, 4  ;;  %vm6279_vm8 = vmor %vm257_vm2, %vm989_vm7 }
 0x1aa   :  { %346 = vst [vmem:[#allocation2 + $0x14] sm:$0xe] %v345_v35  ;;  %v669_v40 = vsel %vm6141_vm14, %v4347_v24, %v668_v31  ;;  %v670_v41 = vrot.slane %v668_v31, 4  ;;  %v671_v42 = vrot.slane %v369_v37, 5  ;;  %343 = vst [vmem:[#allocation2 + $0x8] sm:$0xe] %v342_v39  ;;  %v383_v44 = vor.u32 %v382_v33, %v379_v32  ;;  %4918 = vmatprep.subr.bf16.mxu1 %v5471_v21 }
 0x1ab   :  { %v388_v45 = vrot.slane %v6152_v34, 5  ;;  %v392_v46 = vrot.slane %v6157_v38, 4  ;;  %v396_v47 = vshll.u32 %v369_v37, 16  ;;  %v6171_v52 = vshll.u32 %v6163_v43, 16  ;;  %v6173_v23 = vld [vmem:[#allocation2 + $0x14] sm:$0x1] }
 0x1ac   :  { %v672_v48 = vsel %vm6141_vm14, %v670_v41, %v671_v42  ;;  %v384_v54 = vrot.slane %v383_v44, 4  ;;  %v406_v57 = vrot.slane %v404_v51, 5  ;;  %v6183_v59 = vshrl.u32 %v6163_v43, 16  ;;  %v5476_v24 = vld [vmem:[#allocation8 + $0xa8] sm:$0xff]   ;;  %v5477_v30 = vld [vmem:[#allocation8 + $0xb0] sm:$0xff]   ;;  %v5479_v51 = vld [vmem:[#allocation8 + $0xc0] sm:$0xff]  }
 0x1ad   :  { %v4349_v53 = vcombine.low %v669_v40, %v672_v48  ;;  %v393_v55 = vor.u32 %v392_v46, %v388_v45  ;;  %v412_v58 = vrot.slane %v6171_v52, 5  ;;  %4919 = vmatpush3.bf16.msra.mxu1 %v5471_v21  ;;  %v398_v61 = vrot.slane %v396_v47, 5  ;;  %v6219_v47 = vld [vmem:[#allocation2 + $0xc] sm:$0xe] }
 0x1ae   :  { %4920 = vmatprep.subr.bf16.mxu1 %v5473_v49  ;;  %v407_v63 = vor.u32 %v406_v57, %v403_v50  ;;  %v416_v0 = vrot.slane %v6183_v59, 4  ;;  %v420_v1 = vshll.u32 %v6173_v23, 16  ;;  %v389_v3 = vsel %vm6177_vm15, %v384_v54, %v388_v45 }
 0x1af   :  { %4932 = vmatprep.mubr.bf16.mxu1 %v4349_v53  ;;  %v394_v60 = vrot.slane %v393_v55, 4  ;;  %v812_v26 = vshrl.u32 %v6139_v19, 16  ;;  %v815_v7 = vshll.u32 %v6139_v19, 16  ;;  %v820_v33 = vrot.slane %v6157_v38, 5  ;;  %v5478_v19 = vld [vmem:[#allocation8 + $0xb8] sm:$0xff]  }
 0x1b0   :  { %v408_v6 = vrot.slane %v407_v63, 4  ;;  %v417_v8 = vor.u32 %v416_v0, %v412_v58  ;;  %v422_v15 = vrot.slane %v420_v1, 5  ;;  %v821_v35 = vrot.slane %v6152_v34, 6 }
 0x1b1   :  { %v399_v4 = vsel %vm6177_vm15, %v394_v60, %v398_v61  ;;  %v6191_v10 = vld [vmem:[#allocation2 + $0x14] sm:$0x3]  ;;  %4921 = vmatpush3.bf16.msra.mxu1 %v5473_v49  ;;  %v6193_v11 = vld [vmem:[#allocation2 + $0x8] sm:$0x3]  ;;  %v814_v31 = vrot.slane %v812_v26, 5  ;;  %v817_v32 = vrot.slane %v815_v7, 6 }
 0x1b2   :  { %v4327_v5 = vcombine.low %v389_v3, %v399_v4  ;;  %v6195_v12 = vld [vmem:[#allocation2 + $0x8] sm:$0x7]  ;;  %v418_v14 = vrot.slane %v417_v8, 4  ;;  %4922 = vmatprep.subr.bf16.mxu1 %v5474_v2  ;;  %v6199_v16 = vld [vmem:[#allocation2 + $0x14] sm:$0x7]  ;;  %v413_v18 = vsel %vm6177_vm15, %v408_v6, %v412_v58  ;;  %v826_v27 = vshrl.u32 %v6193_v11, 16 }
 0x1b3   :  { %v6197_v13 = vld [vmem:[#allocation2 + $0x8] sm:$0xf]  ;;  %v6202_v17 = vld [vmem:[#allocation2 + $0x14] sm:$0xf]  ;;  %v829_v29 = vshll.u32 %v6193_v11, 16  ;;  %v675_v36 = vrot.slane %v6163_v43, 5  ;;  %v818_v40 = vor.u32 %v817_v32, %v814_v31  ;;  %v822_v41 = vor.u32 %v821_v35, %v820_v33 }
 0x1b4   :  { %4892 = vmatprep.mubr.bf16.mxu0 %v4327_v5  ;;  %2670 = vst [vmem:[#allocation2 + $0x8] sm:$0xe] %v5897_v25  ;;  %2671 = vst [vmem:[#allocation2 + $0x14] sm:$0xe] %v5897_v25  ;;  %v423_v20 = vsel %vm6177_vm15, %v418_v14, %v422_v15  ;;  %v828_v37 = vrot.slane %v826_v27, 5  ;;  %v678_v44 = vrot.slane %v6173_v23, 5 }
 0x1b5   :  { %v4328_v21 = vcombine.low %v413_v18, %v423_v20  ;;  %4923 = vmatpush3.bf16.msra.mxu1 %v5474_v2  ;;  %v831_v39 = vrot.slane %v829_v29, 6  ;;  %v677_v42 = vrot.slane %v675_v36, 4  ;;  %v1142_v45 = vrot.slane %v6157_v38, 6  ;;  %v5480_v2 = vld [vmem:[#allocation8 + $0xc8] sm:$0xff]   ;;  %v5481_v8 = vld [vmem:[#allocation8 + $0xd0] sm:$0xff]   ;;  %v5482_v7 = vld [vmem:[#allocation8 + $0xd8] sm:$0xff]  }
 0x1b6   :  { %4924 = vmatprep.subr.bf16.mxu1 %v5475_v9  ;;  %v1143_v46 = vrot.slane %v6152_v34, 7  ;;  %v1165_v50 = vrot.slane %v6183_v59, 6  ;;  %v819_v53 = vrot.slane %v818_v40, 4  ;;  %v824_v54 = vrot.slane %v822_v41, 4  ;;  %v6240_v4 = vld [vmem:[#allocation2] sm:$0x8] }
 0x1b7   :  { %4893 = vmatmul.mubr.bf16.vlgmr.msra.gmra.mrb[4].mxu0 %v4328_v21  ;;  %v832_v48 = vor.u32 %v831_v39, %v828_v37  ;;  %v1166_v55 = vrot.slane %v6171_v52, 7  ;;  %v4348_v23 = vrot.slane %v6219_v47, 9  ;;  %v679_v57 = vsel %vm6141_vm14, %v677_v42, %v678_v44  ;;  %v5650_v58 = vld [vmem:[#allocation17 + $0x128] sm:$0xff]  }
 0x1b8   :  { %v6221_v49 = vor.u32 %v1143_v46, %v1142_v45  ;;  %v823_v1 = vsel %vm6228_vm3, %v819_v53, %v822_v41  ;;  %v1464_v5 = vrot.slane %v6157_v38, 7  ;;  %v1469_v6 = vshrl.u32 %v6197_v13, 16  ;;  %v5484_v45 = vld [vmem:[#allocation8 + $0xe8] sm:$0xff]  }
 0x1b9   :  { %4925 = vmatpush3.bf16.msra.mxu1 %v5475_v9  ;;  %v833_v60 = vsel %vm6228_vm3, %v824_v54, %v832_v48  ;;  %v6234_v61 = vor.u32 %v1166_v55, %v1165_v50  ;;  %v676_v63 = vsel %vm6141_vm14, %v4348_v23, %v675_v36  ;;  %v6244_v9 = vld [vmem:[#allocation2 + $0xc] sm:$0x8]  ;;  %v1460_v14 = vshrl.u32 %v6240_v4, 16 }
 0x1ba   :  { %4926 = vmatprep.subr.bf16.mxu1 %v5476_v24  ;;  %v4350_v0 = vcombine.low %v676_v63, %v679_v57  ;;  %v4359_v3 = vcombine.low %v823_v1, %v833_v60  ;;  %v1465_v15 = vor.u32 %v1464_v5, %v6152_v34  ;;  %v1471_v18 = vrot.slane %v1469_v6, 7  ;;  %v5485_v55 = vld [vmem:[#allocation8 + $0xf0] sm:$0xff]   ;;  %v5486_v63 = vld [vmem:[#allocation8 + $0xf8] sm:$0xff]  }
 0x1bb   :  { %v1472_v20 = vshll.u32 %v6197_v13, 16  ;;  %v1477_v38 = vshrl.u32 %v6244_v9, 16  ;;  %v1486_v26 = vshrl.u32 %v6202_v17, 16  ;;  %v4403_v27 = vrot.slane %v1460_v14, 11 }
 0x1bc   :  { %v1467_v29 = vrot.slane %v1464_v5, 4  ;;  %v1489_v13 = vshll.u32 %v6202_v17, 16  ;;  %v835_v42 = vshrl.u32 %v6219_v47, 16  ;;  %v838_v44 = vshll.u32 %v6219_v47, 16  ;;  %v983_v5 = vld [vmem:[#allocation2] sm:$0xc] }
 0x1bd   :  { %4927 = vmatpush3.bf16.msra.mxu1 %v5476_v24  ;;  %v1481_v24 = vrot.slane %v6183_v59, 7  ;;  %v1488_v31 = vrot.slane %v1486_v26, 7  ;;  %v1466_v32 = vsel %vm6249_vm6, %v4403_v27, %v1465_v15  ;;  %v4404_v36 = vrot.slane %v1477_v38, 11  ;;  %v5488_v38 = vld [vmem:[#allocation8 + $0x108] sm:$0xff]   ;;  %v5489_v26 = vld [vmem:[#allocation8 + $0x110] sm:$0xff]   ;;  %v5491_v27 = vld [vmem:[#allocation8 + $0x120] sm:$0xff]  }
 0x1be   :  { %4928 = vmatprep.subr.bf16.mxu1 %v5477_v30  ;;  %v849_v46 = vshrl.u32 %v6191_v10, 16  ;;  %v852_v48 = vshll.u32 %v6191_v10, 16  ;;  %v837_v50 = vrot.slane %v835_v42, 5  ;;  %v843_v53 = vrot.slane %v6183_v59, 5 }
 0x1bf   :  { %v1482_v34 = vor.u32 %v1481_v24, %v6171_v52  ;;  %v1484_v37 = vrot.slane %v1481_v24, 4  ;;  %v1491_v39 = vor.u32 %v1489_v13, %v1488_v31  ;;  %v844_v54 = vrot.slane %v6171_v52, 6  ;;  %v5487_v52 = vld [vmem:[#allocation8 + $0x100] sm:$0xff]  }
 0x1c0   :  { %v851_v23 = vrot.slane %v849_v46, 5  ;;  %v854_v57 = vrot.slane %v852_v48, 6  ;;  %v4369_v15 = vrot.slane %v983_v5, 10  ;;  %v1148_v31 = vshrl.u32 %v6195_v12, 16  ;;  %v5495_v48 = vld [vmem:[#allocation8 + $0x140] sm:$0xff]  }
 0x1c1   :  { %4929 = vmatpush3.bf16.msra.mxu1 %v5477_v30  ;;  %v1474_v30 = vor.u32 %v1472_v20, %v1471_v18  ;;  %v1483_v40 = vsel %vm6249_vm6, %v4404_v36, %v1482_v34  ;;  %v1492_v17 = vsel %vm6249_vm6, %v1484_v37, %v1491_v39  ;;  %v845_v47 = vor.u32 %v844_v54, %v843_v53 }
 0x1c2   :  { %4930 = vmatprep.subr.bf16.mxu1 %v5478_v19  ;;  %v6268_v41 = vcombine.low %v1483_v40, %v1492_v17  ;;  %v855_v1 = vor.u32 %v854_v57, %v851_v23  ;;  %v1137_v34 = vshll.u32 %v983_v5, 16  ;;  %v1151_v13 = vshll.u32 %v6195_v12, 16  ;;  %v5494_v40 = vld [vmem:[#allocation8 + $0x138] sm:$0xff]  }
 0x1c3   :  { %v1475_v33 = vsel %vm6249_vm6, %v1467_v29, %v1474_v30  ;;  %v847_v59 = vrot.slane %v845_v47, 4  ;;  %v5492_v29 = vld [vmem:[#allocation8 + $0x128] sm:$0xff]   ;;  %v1134_v30 = vshrl.u32 %v983_v5, 16  ;;  %v1150_v37 = vrot.slane %v1148_v31, 6 }
 0x1c4   :  { %v6262_v35 = vcombine.low %v1466_v32, %v1475_v33  ;;  %v5493_v32 = vld [vmem:[#allocation8 + $0x130] sm:$0xff]   ;;  %v1139_v36 = vrot.slane %v1137_v34, 7  ;;  %v1153_v39 = vrot.slane %v1151_v13, 7  ;;  %v1003_v42 = vrot.slane %v6191_v10, 6 }
 0x1c5   :  { %4931 = vmatpush3.bf16.msra.mxu1 %v5478_v19  ;;  %v5483_v19 = vld [vmem:[#allocation8 + $0xe0] sm:$0xff]   ;;  %v856_v14 = vsel %vm6228_vm3, %v847_v59, %v855_v1  ;;  %v1136_v33 = vrot.slane %v1134_v30, 6  ;;  %v5500_v59 = vld [vmem:[#allocation8 + $0x168] sm:$0xff]   ;;  %v1174_v5 = vshll.u32 %v6199_v16, 16  ;;  %vm1311_vm2 = vcmask 1040384  }
 0x1c6   :  { %4936 = vmatprep.subr.bf16.mxu1 %v5479_v51  ;;  %v5499_v1 = vld [vmem:[#allocation8 + $0x160] sm:$0xff]   ;;  %vm6312_vm11 = vmor %vm1311_vm2, %vm1312_vm10 }
 0x1c7   :  { %v1140_v17 = vor.u32 %v1139_v36, %v1136_v33  ;;  %v5504_v33 = vld [vmem:[#allocation8 + $0x188] sm:$0xff]  }
 0x1c8   :  { %4933 = vmatmul.mubr.bf16.vlgmr.msra.gmra.mrb[0].mxu1 %v4350_v0  ;;  %v993_v0 = vrot.slane %v6147_v28, 6 }
 0x1c9   :  { %4937 = vmatpush3.bf16.msra.mxu1 %v5479_v51  ;;  %4952 = vmatprep.mubr.bf16.mxu1 %v4359_v3  ;;  %v840_v51 = vrot.slane %v838_v44, 6  ;;  %v984_v44 = vld [vmem:[#allocation2 + $0xc] sm:$0xc] }
 0x1ca   :  { %4938 = vmatprep.subr.bf16.mxu1 %v5480_v2  ;;  %v995_v6 = vrot.slane %v993_v0, 4  ;;  %v994_v21 = vsel %vm6279_vm8, %v4369_v15, %v993_v0  ;;  %v4370_v53 = vrot.slane %v984_v44, 10  ;;  %v5498_v0 = vld [vmem:[#allocation8 + $0x158] sm:$0xff]  }
 0x1cb   :  { %v841_v60 = vor.u32 %v840_v51, %v837_v50  ;;  %v1141_v50 = vrot.slane %v1140_v17, 4  ;;  %v1146_v51 = vrot.slane %v6221_v49, 4  ;;  %v5510_v17 = vld [vmem:[#allocation8 + $0x1b8] sm:$0xff]  }
 0x1cd   :  { %4939 = vmatpush3.bf16.msra.mxu1 %v5480_v2  ;;  %v996_v2 = vrot.slane %v6193_v11, 6  ;;  %v842_v3 = vrot.slane %v841_v60, 4  ;;  %v1145_v57 = vsel %vm6123_vm9, %v1141_v50, %v6221_v49  ;;  %v5496_v60 = vld [vmem:[#allocation8 + $0x148] sm:$0xff]   ;;  %v1171_v49 = vshrl.u32 %v6199_v16, 16 }
 0x1ce   :  { %4940 = vmatprep.subr.bf16.mxu1 %v5481_v8 }
 0x1cf   :  { %v997_v18 = vsel %vm6279_vm8, %v995_v6, %v996_v2  ;;  %v846_v11 = vsel %vm6228_vm3, %v842_v3, %v845_v47  ;;  %v1157_v2 = vshrl.u32 %v984_v44, 16  ;;  %v1160_v3 = vshll.u32 %v984_v44, 16 }
 0x1d0   :  { %v4360_v20 = vcombine.low %v846_v11, %v856_v14  ;;  %v4371_v24 = vcombine.low %v994_v21, %v997_v18  ;;  %v5501_v14 = vld [vmem:[#allocation8 + $0x170] sm:$0xff]   ;;  %v1173_v15 = vrot.slane %v1171_v49, 6  ;;  %v1176_v18 = vrot.slane %v1174_v5, 7  ;;  %v6333_v49 = vld [vmem:[#allocation11] sm:$0xff]  }
 0x1d1   :  { %4941 = vmatpush3.bf16.msra.mxu1 %v5481_v8  ;;  %v1162_v6 = vrot.slane %v1160_v3, 7  ;;  %v1316_v21 = vrot.slane %v6147_v28, 7  ;;  %v4391_v28 = vrot.slane %v6240_v4, 11  ;;  %v5505_v4 = vld [vmem:[#allocation8 + $0x190] sm:$0xff]  }
 0x1d2   :  { %4942 = vmatprep.subr.bf16.mxu1 %v5482_v7  ;;  %v5524_v3 = vld [vmem:[#allocation11 + $0x68] sm:$0xff]  }
 0x1d5   :  { %4943 = vmatpush3.bf16.msra.mxu1 %v5482_v7  ;;  %v5490_v7 = vld [vmem:[#allocation8 + $0x118] sm:$0xff]  }
 0x1d6   :  { %4944 = vmatprep.subr.bf16.mxu1 %v5483_v19 }
 0x1d9   :  { %4945 = vmatpush3.bf16.msra.mxu1 %v5483_v19  ;;  %v1000_v19 = vrot.slane %v6163_v43, 6 }
 0x1da   :  { %4946 = vmatprep.subr.bf16.mxu1 %v5484_v45 }
 0x1db   :  { %v1002_v46 = vrot.slane %v1000_v19, 4  ;;  %v1001_v10 = vsel %vm6279_vm8, %v4370_v53, %v1000_v19  ;;  %v5509_v19 = vld [vmem:[#allocation8 + $0x1b0] sm:$0xff]   ;;  %v5514_v53 = vld [vmem:[#allocation8 + $0x1d8] sm:$0xff]  }
 0x1dd   :  { %4947 = vmatpush3.bf16.msra.mxu1 %v5484_v45  ;;  %v1154_v45 = vor.u32 %v1153_v39, %v1150_v37  ;;  %v1004_v54 = vsel %vm6279_vm8, %v1002_v46, %v1003_v42  ;;  %v5506_v37 = vld [vmem:[#allocation8 + $0x198] sm:$0xff]   ;;  %v5507_v39 = vld [vmem:[#allocation8 + $0x1a0] sm:$0xff]   ;;  %v1326_v42 = vrot.slane %v6199_v16, 7  ;;  %v4392_v46 = vrot.slane %v6244_v9, 11  ;;  %v5513_v16 = vld [vmem:[#allocation8 + $0x1d0] sm:$0xff]  }
 0x1de   :  { %4948 = vmatprep.subr.bf16.mxu1 %v5485_v55  ;;  %v4372_v23 = vcombine.low %v1001_v10, %v1004_v54  ;;  %v5515_v9 = vld [vmem:[#allocation8 + $0x1e0] sm:$0xff]   ;;  %v5516_v54 = vld [vmem:[#allocation8 + $0x1e8] sm:$0xff]   ;;  %v5518_v10 = vld [vmem:[#allocation8 + $0x1f8] sm:$0xff]  }
 0x1e1   :  { %4949 = vmatpush3.bf16.msra.mxu1 %v5485_v55  ;;  %v1155_v55 = vsel %vm6123_vm9, %v1146_v51, %v1154_v45  ;;  %v5511_v45 = vld [vmem:[#allocation8 + $0x1c0] sm:$0xff]  }
 0x1e2   :  { %4950 = vmatprep.subr.bf16.mxu1 %v5486_v63  ;;  %v4381_v47 = vcombine.low %v1145_v57, %v1155_v55  ;;  %v5517_v55 = vld [vmem:[#allocation8 + $0x1f0] sm:$0xff]  }
 0x1e5   :  { %4951 = vmatpush3.bf16.msra.mxu1 %v5486_v63  ;;  %v5497_v63 = vld [vmem:[#allocation8 + $0x150] sm:$0xff]  }
 0x1e6   :  { %4956 = vmatprep.subr.bf16.mxu1 %v5487_v52 }
 0x1e8   :  { %4953 = vmatmul.mubr.bf16.vlgmr.msra.gmra.mrb[0].mxu1 %v4360_v20  ;;  %v5502_v20 = vld [vmem:[#allocation8 + $0x178] sm:$0xff]  }
 0x1e9   :  { %4957 = vmatpush3.bf16.msra.mxu1 %v5487_v52  ;;  %4972 = vmatprep.mubr.bf16.mxu1 %v4371_v24  ;;  %v1159_v52 = vrot.slane %v1157_v2, 6  ;;  %v1319_v24 = vrot.slane %v6195_v12, 7  ;;  %v5523_v2 = vld [vmem:[#allocation11 + $0x60] sm:$0xff]  }
 0x1ea   :  { %4958 = vmatprep.subr.bf16.mxu1 %v5488_v38 }
 0x1eb   :  { %v1163_v11 = vor.u32 %v1162_v6, %v1159_v52  ;;  %v4415_v52 = vld [vmem:[#allocation9] ss:$0 sm:$0xff] }
 0x1ed   :  { %4959 = vmatpush3.bf16.msra.mxu1 %v5488_v38  ;;  %v1177_v38 = vor.u32 %v1176_v18, %v1173_v15 }
 0x1ee   :  { %4960 = vmatprep.subr.bf16.mxu1 %v5489_v26 }
 0x1f1   :  { %4961 = vmatpush3.bf16.msra.mxu1 %v5489_v26  ;;  %v1164_v26 = vrot.slane %v1163_v11, 4 }
 0x1f2   :  { %4962 = vmatprep.subr.bf16.mxu1 %v5490_v7 }
 0x1f3   :  { %v1168_v12 = vsel %vm6123_vm9, %v1164_v26, %v6234_v61 }
 0x1f5   :  { %4963 = vmatpush3.bf16.msra.mxu1 %v5490_v7  ;;  %v1169_v7 = vrot.slane %v6234_v61, 4  ;;  %v5508_v61 = vld [vmem:[#allocation8 + $0x1a8] sm:$0xff]  }
 0x1f6   :  { %4964 = vmatprep.subr.bf16.mxu1 %v5491_v27 }
 0x1f7   :  { %v1178_v30 = vsel %vm6123_vm9, %v1169_v7, %v1177_v38 }
 0x1f8   :  { %v4382_v13 = vcombine.low %v1168_v12, %v1178_v30 }
 0x1f9   :  { %4965 = vmatpush3.bf16.msra.mxu1 %v5491_v27  ;;  %v5503_v27 = vld [vmem:[#allocation8 + $0x180] sm:$0xff]  }
 0x1fa   :  { %4966 = vmatprep.subr.bf16.mxu1 %v5492_v29 }
 0x1fd   :  { %4967 = vmatpush3.bf16.msra.mxu1 %v5492_v29  ;;  %v1318_v29 = vrot.slane %v1316_v21, 4 }
 0x1fe   :  { %4968 = vmatprep.subr.bf16.mxu1 %v5493_v32 }
 0x1ff   :  { %v1320_v31 = vsel %vm6312_vm11, %v1318_v29, %v1319_v24 }
 0x201   :  { %4969 = vmatpush3.bf16.msra.mxu1 %v5493_v32  ;;  %v1317_v32 = vsel %vm6312_vm11, %v4391_v28, %v1316_v21 }
 0x202   :  { %4970 = vmatprep.subr.bf16.mxu1 %v5494_v40  ;;  %v4393_v36 = vcombine.low %v1317_v32, %v1320_v31 }
 0x205   :  { %4971 = vmatpush3.bf16.msra.mxu1 %v5494_v40  ;;  %v1323_v40 = vrot.slane %v6163_v43, 7  ;;  %v5512_v43 = vld [vmem:[#allocation8 + $0x1c8] sm:$0xff]  }
 0x206   :  { %4976 = vmatprep.subr.bf16.mxu1 %v5495_v48 }
 0x207   :  { %v1325_v44 = vrot.slane %v1323_v40, 4  ;;  %v1324_v50 = vsel %vm6312_vm11, %v4392_v46, %v1323_v40 }
 0x208   :  { %4973 = vmatmul.mubr.bf16.vlgmr.msra.gmra.mrb[0].mxu1 %v4372_v23 }
 0x209   :  { %4977 = vmatpush3.bf16.msra.mxu1 %v5495_v48  ;;  %4992 = vmatprep.mubr.bf16.mxu1 %v4381_v47  ;;  %v1327_v48 = vsel %vm6312_vm11, %v1325_v44, %v1326_v42  ;;  %v5519_v47 = vld [vmem:[#allocation11 + $0x40] sm:$0xff]  }
 0x20a   :  { %4978 = vmatprep.subr.bf16.mxu1 %v5496_v60  ;;  %v4394_v51 = vcombine.low %v1324_v50, %v1327_v48  ;;  %5036 = vmatprep.subr.bf16.mxu0 %v5519_v47 }
 0x20b   :  { %5037 = vmatpush3.bf16.msra.mxu0 %v5519_v47 }
 0x20d   :  { %4979 = vmatpush3.bf16.msra.mxu1 %v5496_v60 }
 0x20e   :  { %4980 = vmatprep.subr.bf16.mxu1 %v5497_v63 }
 0x211   :  { %4981 = vmatpush3.bf16.msra.mxu1 %v5497_v63  ;;  %v5520_v63 = vld [vmem:[#allocation11 + $0x48] sm:$0xff]  }
 0x212   :  { %4982 = vmatprep.subr.bf16.mxu1 %v5498_v0  ;;  %5038 = vmatprep.subr.bf16.mxu0 %v5520_v63 }
 0x213   :  { %5039 = vmatpush3.bf16.msra.mxu0 %v5520_v63 }
 0x215   :  { %4983 = vmatpush3.bf16.msra.mxu1 %v5498_v0  ;;  %v5521_v0 = vld [vmem:[#allocation11 + $0x50] sm:$0xff]  }
 0x216   :  { %4984 = vmatprep.subr.bf16.mxu1 %v5499_v1  ;;  %5040 = vmatprep.subr.bf16.mxu0 %v5521_v0 }
 0x217   :  { %5041 = vmatpush3.bf16.msra.mxu0 %v5521_v0 }
 0x219   :  { %4985 = vmatpush3.bf16.msra.mxu1 %v5499_v1  ;;  %v5522_v1 = vld [vmem:[#allocation11 + $0x58] sm:$0xff]  }
 0x21a   :  { %4986 = vmatprep.subr.bf16.mxu1 %v5500_v59  ;;  %5042 = vmatprep.subr.bf16.mxu0 %v5522_v1 }
 0x21b   :  { %5043 = vmatpush3.bf16.msra.mxu0 %v5522_v1 }
 0x21c   :  { %5044 = vmatprep.subr.bf16.mxu0 %v5523_v2 }
 0x21d   :  { %4987 = vmatpush3.bf16.msra.mxu1 %v5500_v59  ;;  %v5526_v59 = vld [vmem:[#allocation11 + $0x78] sm:$0xff]  }
 0x21e   :  { %4988 = vmatprep.subr.bf16.mxu1 %v5501_v14 }
 0x21f   :  { %5045 = vmatpush3.bf16.msra.mxu0 %v5523_v2 }
 0x220   :  { %5046 = vmatprep.subr.bf16.mxu0 %v5524_v3 }
 0x221   :  { %4989 = vmatpush3.bf16.msra.mxu1 %v5501_v14 }
 0x222   :  { %4990 = vmatprep.subr.bf16.mxu1 %v5502_v20 }
 0x223   :  { %5047 = vmatpush3.bf16.msra.mxu0 %v5524_v3 }
 0x225   :  { %4991 = vmatpush3.bf16.msra.mxu1 %v5502_v20 }
 0x226   :  { %4996 = vmatprep.subr.bf16.mxu1 %v5503_v27 }
 0x228   :  { %4993 = vmatmul.mubr.bf16.vlgmr.msra.gmra.mrb[0].mxu1 %v4382_v13 }
 0x229   :  { %4997 = vmatpush3.bf16.msra.mxu1 %v5503_v27  ;;  %5012 = vmatprep.mubr.bf16.mxu1 %v4393_v36 }
 0x22a   :  { %4998 = vmatprep.subr.bf16.mxu1 %v5504_v33 }
 0x22d   :  { %4999 = vmatpush3.bf16.msra.mxu1 %v5504_v33 }
 0x22e   :  { %5000 = vmatprep.subr.bf16.mxu1 %v5505_v4 }
 0x231   :  { %5001 = vmatpush3.bf16.msra.mxu1 %v5505_v4 }
 0x232   :  { %5002 = vmatprep.subr.bf16.mxu1 %v5506_v37 }
 0x235   :  { %5003 = vmatpush3.bf16.msra.mxu1 %v5506_v37 }
 0x236   :  { %5004 = vmatprep.subr.bf16.mxu1 %v5507_v39 }
 0x239   :  { %5005 = vmatpush3.bf16.msra.mxu1 %v5507_v39 }
 0x23a   :  { %5006 = vmatprep.subr.bf16.mxu1 %v5508_v61 }
 0x23d   :  { %5007 = vmatpush3.bf16.msra.mxu1 %v5508_v61 }
 0x23e   :  { %5008 = vmatprep.subr.bf16.mxu1 %v5509_v19 }
 0x241   :  { %5009 = vmatpush3.bf16.msra.mxu1 %v5509_v19 }
 0x242   :  { %5010 = vmatprep.subr.bf16.mxu1 %v5510_v17 }
 0x245   :  { %5011 = vmatpush3.bf16.msra.mxu1 %v5510_v17 }
 0x246   :  { %5016 = vmatprep.subr.bf16.mxu1 %v5511_v45 }
 0x248   :  { %5013 = vmatmul.mubr.bf16.vlgmr.msra.gmra.mrb[0].mxu1 %v4394_v51 }
 0x249   :  { %5017 = vmatpush3.bf16.msra.mxu1 %v5511_v45  ;;  %5032 = vmatprep.mubr.bf16.mxu1 %v6262_v35 }
 0x24a   :  { %5018 = vmatprep.subr.bf16.mxu1 %v5512_v43 }
 0x24d   :  { %5019 = vmatpush3.bf16.msra.mxu1 %v5512_v43 }
 0x24e   :  { %5020 = vmatprep.subr.bf16.mxu1 %v5513_v16 }
 0x251   :  { %5021 = vmatpush3.bf16.msra.mxu1 %v5513_v16 }
 0x252   :  { %5022 = vmatprep.subr.bf16.mxu1 %v5514_v53 }
 0x255   :  { %5023 = vmatpush3.bf16.msra.mxu1 %v5514_v53 }
 0x256   :  { %5024 = vmatprep.subr.bf16.mxu1 %v5515_v9 }
 0x259   :  { %5025 = vmatpush3.bf16.msra.mxu1 %v5515_v9 }
 0x25a   :  { %5026 = vmatprep.subr.bf16.mxu1 %v5516_v54 }
 0x25d   :  { %5027 = vmatpush3.bf16.msra.mxu1 %v5516_v54 }
 0x25e   :  { %5028 = vmatprep.subr.bf16.mxu1 %v5517_v55 }
 0x261   :  { %5029 = vmatpush3.bf16.msra.mxu1 %v5517_v55 }
 0x262   :  { %5030 = vmatprep.subr.bf16.mxu1 %v5518_v10 }
 0x265   :  { %5031 = vmatpush3.bf16.msra.mxu1 %v5518_v10 }
 0x268   :  { %5033 = vmatmul.mubr.bf16.vlgmr.msra.gmra.mrb[0].mxu1 %v6268_v41  ;;  %v5525_v41 = vld [vmem:[#allocation11 + $0x70] sm:$0xff]  }
 0x269   :  { %5048 = vmatprep.subr.bf16.mxu0 %v5525_v41 }
 0x26a   :  { %5049 = vmatpush3.bf16.msra.mxu0 %v5525_v41 }
 0x26b   :  { %5050 = vmatprep.subr.bf16.mxu0 %v5526_v59 }
 0x26e   :  { %5051 = vmatpush3.bf16.msra.mxu0 %v5526_v59 }
 0x26f   :  { %5056 = vmatprep.subr.bf16.mxu0 %v6333_v49 }
 0x28a   :  { %v4894_v35 = vpop.f32.mrb[4].mxu0 }
 0x28b   :  { %v531_v23 = vpop.f32.mrb[5].mxu0 }
 0x28c   :  { %v4895_v57 = vpop.f32.mrb[6].mxu0 }
 0x28d   :  { %v534_v60 = vpop.f32.mrb[7].mxu0 }
 0x33b   :  { %v5034_v5 = vpop.f32.mrb[0].mxu1 }
 0x33c   :  { %v5356_v6 = vadd.f32 %v5034_v5, %v4894_v35  ;;  %v1600_v14 = vpop.f32.mrb[1].mxu1 }
 0x33d   :  { %v5357_v15 = vadd.f32 %v1600_v14, %v531_v23  ;;  %v5035_v18 = vpop.f32.mrb[2].mxu1 }
 0x33e   :  { %v1628_v11 = vadd.f32 %v5356_v6, %v4415_v52  ;;  %v5358_v20 = vadd.f32 %v5035_v18, %v4895_v57  ;;  %v1603_v21 = vpop.f32.mrb[3].mxu1 }
 0x33f   :  { %v1626_v38 = vadd.f32 %v5357_v15, %v4415_v52  ;;  %v5359_v24 = vadd.f32 %v1603_v21, %v534_v60 }
 0x340   :  { %v1632_v26 = vmax.f32 %v1628_v11, 0.0  ;;  %v1629_v7 = vadd.f32 %v5358_v20, %v4415_v52 }
 0x341   :  { %v1630_v27 = vmax.f32 %v1626_v38, 0.0  ;;  %v1627_v29 = vadd.f32 %v5359_v24, %v4415_v52 }
 0x342   :  { %v4613_v30 = vpack.c.bf16 %v1632_v26, %v1632_v26  ;;  %v1633_v28 = vmax.f32 %v1629_v7, 0.0 }
 0x343   :  { %v4611_v31 = vpack.c.bf16 %v1630_v27, %v1630_v27  ;;  %v1631_v12 = vmax.f32 %v1627_v29, 0.0 }
 0x344   :  { %v1653_v13 = vrot.slane %v4613_v30, 7  ;;  %v4614_v32 = vpack.c.bf16 %v1633_v28, %v1633_v28 }
 0x345   :  { %v1648_v33 = vrot.slane %v4611_v31, 7  ;;  %v4612_v36 = vpack.c.bf16 %v1631_v12, %v1631_v12 }
 0x346   :  { %v1654_v4 = vrot.slane %v1653_v13, 4  ;;  %1667 = vst [vmem:[#allocation3 + $0xc] sm:$0xe] %v1653_v13  ;;  %v1655_v37 = vrot.slane %v4614_v32, 7 }
 0x347   :  { %v1649_v39 = vrot.slane %v1648_v33, 4  ;;  %1664 = vst [vmem:[#allocation3] sm:$0xe] %v1648_v33  ;;  %v1650_v61 = vrot.slane %v4612_v36, 7  ;;  %v5529_v36 = vld [vmem:[#allocation11 + $0x8] sm:$0xff]  }
 0x348   :  { %v1656_v19 = vsel %vm6312_vm11, %v1654_v4, %v1655_v37  ;;  %v1657_v40 = vrot.slane %v1655_v37, 4 }
 0x349   :  { %1668 = vst [vmem:[#allocation3 + $0x10] sm:$0xf] %v1656_v19  ;;  %v1651_v17 = vsel %vm6312_vm11, %v1649_v39, %v1650_v61  ;;  %v1652_v42 = vrot.slane %v1650_v61, 4 }
 0x34a   :  { %1669 = vst [vmem:[#allocation3 + $0x14] sm:$0x1] %v1657_v40  ;;  %1665 = vst [vmem:[#allocation3 + $0x4] sm:$0xf] %v1651_v17  ;;  %v5531_v40 = vld [vmem:[#allocation11 + $0x18] sm:$0xff]   ;;  %v5532_v17 = vld [vmem:[#allocation11 + $0x20] sm:$0xff]  }
 0x34b   :  { %1666 = vst [vmem:[#allocation3 + $0x8] sm:$0x1] %v1652_v42 }
 0x34d   :  { %v1695_v44 = vld [vmem:[#allocation3 + $0xc] sm:$0xf] }
 0x34e   :  { %v1692_v45 = vld [vmem:[#allocation3] sm:$0xf]  ;;  %v1723_v46 = vshrl.u32 %v1695_v44, 16  ;;  %v1726_v48 = vshll.u32 %v1695_v44, 16 }
 0x34f   :  { %v1699_v50 = vshrl.u32 %v1692_v45, 16  ;;  %v1702_v51 = vshll.u32 %v1692_v45, 16 }
 0x350   :  { %v6340_v43 = vld [vmem:[#allocation3 + $0x10] sm:$0xf]  ;;  %v1725_v16 = vrot.slane %v1723_v46, 4  ;;  %v1728_v53 = vrot.slane %v1726_v48, 5 }
 0x351   :  { %v6342_v9 = vld [vmem:[#allocation3 + $0x4] sm:$0xf]  ;;  %v1701_v54 = vrot.slane %v1699_v50, 4  ;;  %v1704_v55 = vrot.slane %v1702_v51, 5  ;;  %v6344_v10 = vld [vmem:[#allocation3 + $0x14] sm:$0x1] }
 0x352   :  { %v6346_v35 = vld [vmem:[#allocation3 + $0x8] sm:$0x1]  ;;  %v1708_v23 = vshll.u32 %v6342_v9, 16  ;;  %v1712_v57 = vshrl.u32 %v6342_v9, 16  ;;  %v1732_v60 = vshll.u32 %v6340_v43, 16  ;;  %v5528_v47 = vld [vmem:[#allocation3] sm:$0xff]   ;;  %v1729_v0 = vor.u32 %v1728_v53, %v1725_v16 }
 0x353   :  { %v1705_v63 = vor.u32 %v1704_v55, %v1701_v54  ;;  %v1736_v1 = vshrl.u32 %v6340_v43, 16  ;;  %3460 = vst [vmem:[#allocation3] sm:$0x1] %v5897_v25  ;;  %v6353_v2 = vld [vmem:[#allocation3 + $0xc] sm:$0xff]   ;;  %v1718_v59 = vshll.u32 %v6346_v35, 16  ;;  %v1742_v6 = vshll.u32 %v6344_v10, 16 }
 0x354   :  { %v1710_v3 = vrot.slane %v1708_v23, 5  ;;  %v1714_v41 = vrot.slane %v1712_v57, 4  ;;  %v1734_v5 = vrot.slane %v1732_v60, 5  ;;  %3461 = vst [vmem:[#allocation3 + $0xc] sm:$0x1] %v5897_v25  ;;  %v1730_v18 = vrot.slane %v1729_v0, 4 }
 0x355   :  { %v1738_v52 = vrot.slane %v1736_v1, 4  ;;  %v1706_v14 = vrot.slane %v1705_v63, 4  ;;  %v1720_v21 = vrot.slane %v1718_v59, 5  ;;  %v6358_v38 = vld [vmem:[#allocation3 + $0x8] sm:$0x3]  ;;  %v1744_v7 = vrot.slane %v1742_v6, 5 }
 0x356   :  { %v1715_v15 = vor.u32 %v1714_v41, %v1710_v3  ;;  %v6360_v24 = vld [vmem:[#allocation3 + $0x8] sm:$0x7]  ;;  %v6362_v27 = vld [vmem:[#allocation3 + $0x14] sm:$0x3]  ;;  %v1735_v12 = vsel %vm6177_vm15, %v1730_v18, %v1734_v5  ;;  %v2136_v32 = vrot.slane %v1712_v57, 5  ;;  %v2137_v4 = vrot.slane %v1708_v23, 6 }
 0x357   :  { %v1739_v11 = vor.u32 %v1738_v52, %v1734_v5  ;;  %3496 = vst [vmem:[#allocation3 + $0x8] sm:$0xe] %v5897_v25  ;;  %v6365_v29 = vld [vmem:[#allocation3 + $0x14] sm:$0x7]  ;;  %v1711_v30 = vsel %vm6177_vm15, %v1706_v14, %v1710_v3  ;;  %v2159_v37 = vrot.slane %v1736_v1, 5  ;;  %v2160_v39 = vrot.slane %v1732_v60, 6 }
 0x358   :  { %v1716_v20 = vrot.slane %v1715_v15, 4  ;;  %3497 = vst [vmem:[#allocation3 + $0x14] sm:$0xe] %v5897_v25  ;;  %v6377_v61 = vor.u32 %v2137_v4, %v2136_v32  ;;  %v5530_v25 = vld [vmem:[#allocation11 + $0x10] sm:$0xff]   ;;  %v2456_v42 = vrot.slane %v1712_v57, 6  ;;  %v2457_v44 = vrot.slane %v1708_v23, 7 }
 0x359   :  { %v1740_v26 = vrot.slane %v1739_v11, 4  ;;  %v6379_v19 = vor.u32 %v2160_v39, %v2159_v37  ;;  %v2479_v46 = vrot.slane %v1736_v1, 6  ;;  %v5533_v48 = vld [vmem:[#allocation11 + $0x28] sm:$0xff]   ;;  %v5534_v51 = vld [vmem:[#allocation11 + $0x30] sm:$0xff]   ;;  %v1987_v16 = vrot.slane %v6342_v9, 5  ;;  %v5535_v53 = vld [vmem:[#allocation11 + $0x38] sm:$0xff]  }
 0x35a   :  { %v1721_v28 = vsel %vm6177_vm15, %v1716_v20, %v1720_v21  ;;  %v6381_v45 = vor.u32 %v2457_v44, %v2456_v42  ;;  %v1990_v55 = vrot.slane %v6346_v35, 5  ;;  %v1977_v23 = vld [vmem:[#allocation3] sm:$0xe]  ;;  %v5537_v57 = vld [vmem:[#allocation11 + $0x80] sm:$0xff]   ;;  %v5538_v0 = vld [vmem:[#allocation11 + $0x88] sm:$0xff]   ;;  %v2142_v6 = vshrl.u32 %v6358_v38, 16 }
 0x35b   :  { %v4420_v31 = vcombine.low %v1711_v30, %v1721_v28  ;;  %v1745_v13 = vsel %vm6177_vm15, %v1740_v26, %v1744_v7  ;;  %v1989_v54 = vrot.slane %v1987_v16, 4  ;;  %v5539_v35 = vld [vmem:[#allocation11 + $0x90] sm:$0xff]   ;;  %v5540_v3 = vld [vmem:[#allocation11 + $0x98] sm:$0xff]   ;;  %v5541_v41 = vld [vmem:[#allocation11 + $0xa0] sm:$0xff]   ;;  %v2128_v5 = vshrl.u32 %v1977_v23, 16 }
 0x35c   :  { %v4421_v33 = vcombine.low %v1735_v12, %v1745_v13  ;;  %v5542_v59 = vld [vmem:[#allocation11 + $0xa8] sm:$0xff]   ;;  %v2131_v52 = vshll.u32 %v1977_v23, 16  ;;  %v2145_v14 = vshll.u32 %v6358_v38, 16  ;;  %v1994_v11 = vrot.slane %v6340_v43, 5  ;;  %v5544_v26 = vld [vmem:[#allocation11 + $0xb8] sm:$0xff]   ;;  %v5545_v32 = vld [vmem:[#allocation11 + $0xc0] sm:$0xff]  }
 0x35d   :  { %5052 = vmatprep.mubr.bf16.mxu0 %v4420_v31  ;;  %v2130_v15 = vrot.slane %v2128_v5, 5  ;;  %v2144_v20 = vrot.slane %v2142_v6, 5  ;;  %v1997_v28 = vrot.slane %v6344_v10, 5  ;;  %v1978_v31 = vld [vmem:[#allocation3 + $0xc] sm:$0xe]  ;;  %v2140_v12 = vrot.slane %v6377_v61, 4 }
 0x35e   :  { %5053 = vmatmul.mubr.bf16.vlgmr.msra.gmra.mrb[8].mxu0 %v4421_v33  ;;  %v2133_v18 = vrot.slane %v2131_v52, 6  ;;  %v2147_v21 = vrot.slane %v2145_v14, 6  ;;  %v1996_v30 = vrot.slane %v1994_v11, 4  ;;  %v5547_v42 = vld [vmem:[#allocation11 + $0xd0] sm:$0xff]   ;;  %v5548_v44 = vld [vmem:[#allocation11 + $0xd8] sm:$0xff]   ;;  %v5553_v5 = vld [vmem:[#allocation11 + $0x100] sm:$0xff]  }
 0x35f   :  { %5057 = vmatpush3.bf16.msra.mxu0 %v6333_v49  ;;  %5072 = vmatprep.mubr.bf16.mxu0 %v5528_v47  ;;  %v2480_v49 = vrot.slane %v1732_v60, 7  ;;  %v4440_v60 = vrot.slane %v1977_v23, 9  ;;  %v1991_v47 = vsel %vm6141_vm14, %v1989_v54, %v1990_v55  ;;  %v5551_v55 = vld [vmem:[#allocation11 + $0xf0] sm:$0xff]  }
 0x360   :  { %5058 = vmatprep.subr.bf16.mxu0 %v5529_v36  ;;  %v2134_v7 = vor.u32 %v2133_v18, %v2130_v15  ;;  %v2148_v13 = vor.u32 %v2147_v21, %v2144_v20  ;;  %v1998_v4 = vsel %vm6141_vm14, %v1996_v30, %v1997_v28  ;;  %v5554_v15 = vld [vmem:[#allocation11 + $0x108] sm:$0xff]   ;;  %v5556_v20 = vld [vmem:[#allocation11 + $0x118] sm:$0xff]   ;;  %v5557_v21 = vld [vmem:[#allocation11 + $0x120] sm:$0xff]   ;;  %v2462_v30 = vshrl.u32 %v6360_v24, 16 }
 0x361   :  { %v6383_v50 = vor.u32 %v2480_v49, %v2479_v46  ;;  %v1988_v63 = vsel %vm6141_vm14, %v4440_v60, %v1987_v16  ;;  %v5549_v46 = vld [vmem:[#allocation11 + $0xe0] sm:$0xff]   ;;  %v2151_v49 = vshrl.u32 %v1978_v31, 16  ;;  %v2168_v16 = vshll.u32 %v6362_v27, 16 }
 0x362   :  { %v4442_v1 = vcombine.low %v1988_v63, %v1991_v47  ;;  %v2135_v33 = vrot.slane %v2134_v7, 4  ;;  %v2149_v37 = vsel %vm6228_vm3, %v2140_v12, %v2148_v13  ;;  %v2307_v60 = vrot.slane %v6342_v9, 6  ;;  %v5552_v63 = vld [vmem:[#allocation11 + $0xf8] sm:$0xff]  }
 0x363   :  { %5059 = vmatpush3.bf16.msra.mxu0 %v5529_v36  ;;  %v4441_v36 = vrot.slane %v1978_v31, 9  ;;  %v2465_v28 = vshll.u32 %v6360_v24, 16 }
 0x364   :  { %5060 = vmatprep.subr.bf16.mxu0 %v5530_v25 }
 0x365   :  { %v1995_v39 = vsel %vm6141_vm14, %v4441_v36, %v1994_v11  ;;  %v5555_v11 = vld [vmem:[#allocation11 + $0x110] sm:$0xff]   ;;  %v2467_v36 = vrot.slane %v2465_v28, 7 }
 0x366   :  { %v4443_v10 = vcombine.low %v1995_v39, %v1998_v4  ;;  %v5560_v4 = vld [vmem:[#allocation11 + $0x138] sm:$0xff]  }
 0x367   :  { %5061 = vmatpush3.bf16.msra.mxu0 %v5530_v25  ;;  %v2139_v25 = vsel %vm6228_vm3, %v2135_v33, %v6377_v61  ;;  %v2165_v61 = vshrl.u32 %v6362_v27, 16  ;;  %v2464_v33 = vrot.slane %v2462_v30, 6 }
 0x368   :  { %5062 = vmatprep.subr.bf16.mxu0 %v5531_v40 }
 0x369   :  { %v2167_v23 = vrot.slane %v2165_v61, 5  ;;  %v2468_v24 = vor.u32 %v2467_v36, %v2464_v33 }
 0x36b   :  { %5063 = vmatpush3.bf16.msra.mxu0 %v5531_v40  ;;  %v5546_v40 = vld [vmem:[#allocation11 + $0xc8] sm:$0xff]  }
 0x36c   :  { %5064 = vmatprep.subr.bf16.mxu0 %v5532_v17 }
 0x36f   :  { %5065 = vmatpush3.bf16.msra.mxu0 %v5532_v17  ;;  %v4452_v17 = vcombine.low %v2139_v25, %v2149_v37  ;;  %v2300_v25 = vld [vmem:[#allocation3 + $0xc] sm:$0xc] }
 0x370   :  { %5066 = vmatprep.subr.bf16.mxu0 %v5533_v48 }
 0x373   :  { %5067 = vmatpush3.bf16.msra.mxu0 %v5533_v48  ;;  %v2154_v48 = vshll.u32 %v1978_v31, 16  ;;  %v5559_v31 = vld [vmem:[#allocation11 + $0x130] sm:$0xff]  }
 0x374   :  { %5068 = vmatprep.subr.bf16.mxu0 %v5534_v51 }
 0x375   :  { %v2156_v54 = vrot.slane %v2154_v48, 6 }
 0x377   :  { %5069 = vmatpush3.bf16.msra.mxu0 %v5534_v51  ;;  %v5550_v51 = vld [vmem:[#allocation11 + $0xe8] sm:$0xff]  }
 0x378   :  { %5070 = vmatprep.subr.bf16.mxu0 %v5535_v53 }
 0x37b   :  { %5071 = vmatpush3.bf16.msra.mxu0 %v5535_v53  ;;  %v2153_v53 = vrot.slane %v2151_v49, 5 }
 0x37c   :  { %5076 = vmatprep.subr.bf16.mxu0 %v5537_v57 }
 0x37d   :  { %v2157_v47 = vor.u32 %v2156_v54, %v2153_v53  ;;  %v5564_v53 = vld [vmem:[#allocation11 + $0x158] sm:$0xff]   ;;  %v5565_v54 = vld [vmem:[#allocation11 + $0x160] sm:$0xff]  }
 0x37e   :  { %5073 = vmatmul.mubr.bf16.vlgmr.msra.gmra.mrb[8].mxu0 %v6353_v2  ;;  %v5543_v2 = vld [vmem:[#allocation11 + $0xb0] sm:$0xff]  }
 0x37f   :  { %5077 = vmatpush3.bf16.msra.mxu0 %v5537_v57  ;;  %5092 = vmatprep.mubr.bf16.mxu0 %v4442_v1  ;;  %v2170_v57 = vrot.slane %v2168_v16, 6  ;;  %v5563_v16 = vld [vmem:[#allocation11 + $0x150] sm:$0xff]  }
 0x380   :  { %5078 = vmatprep.subr.bf16.mxu0 %v5538_v0 }
 0x381   :  { %v2171_v1 = vor.u32 %v2170_v57, %v2167_v23  ;;  %v2474_v23 = vshll.u32 %v2300_v25, 16  ;;  %v5566_v57 = vld [vmem:[#allocation11 + $0x168] sm:$0xff]  }
 0x383   :  { %5079 = vmatpush3.bf16.msra.mxu0 %v5538_v0  ;;  %v2163_v0 = vrot.slane %v6379_v19, 4 }
 0x384   :  { %5080 = vmatprep.subr.bf16.mxu0 %v5539_v35 }
 0x385   :  { %v2172_v52 = vsel %vm6228_vm3, %v2163_v0, %v2171_v1  ;;  %v5567_v0 = vld [vmem:[#allocation11 + $0x170] sm:$0xff]  }
 0x387   :  { %5081 = vmatpush3.bf16.msra.mxu0 %v5539_v35  ;;  %v2309_v35 = vrot.slane %v2307_v60, 4 }
 0x388   :  { %5082 = vmatprep.subr.bf16.mxu0 %v5540_v3 }
 0x38b   :  { %5083 = vmatpush3.bf16.msra.mxu0 %v5540_v3  ;;  %v2310_v3 = vrot.slane %v6358_v38, 6 }
 0x38c   :  { %5084 = vmatprep.subr.bf16.mxu0 %v5541_v41 }
 0x38d   :  { %v2311_v9 = vsel %vm6279_vm8, %v2309_v35, %v2310_v3 }
 0x38f   :  { %5085 = vmatpush3.bf16.msra.mxu0 %v5541_v41  ;;  %v2158_v41 = vrot.slane %v2157_v47, 4 }
 0x390   :  { %5086 = vmatprep.subr.bf16.mxu0 %v5542_v59 }
 0x391   :  { %v2162_v14 = vsel %vm6228_vm3, %v2158_v41, %v6379_v19  ;;  %v5558_v19 = vld [vmem:[#allocation11 + $0x128] sm:$0xff]   ;;  %v5568_v41 = vld [vmem:[#allocation11 + $0x178] sm:$0xff]  }
 0x393   :  { %5087 = vmatpush3.bf16.msra.mxu0 %v5542_v59  ;;  %v2299_v59 = vld [vmem:[#allocation3] sm:$0xc] }
 0x394   :  { %5088 = vmatprep.subr.bf16.mxu0 %v5543_v2  ;;  %v4462_v6 = vrot.slane %v2299_v59, 10  ;;  %v2451_v7 = vshll.u32 %v2299_v59, 16 }
 0x396   :  { %v2308_v38 = vsel %vm6279_vm8, %v4462_v6, %v2307_v60  ;;  %v2453_v13 = vrot.slane %v2451_v7, 7  ;;  %v2488_v60 = vshll.u32 %v6365_v29, 16 }
 0x397   :  { %5089 = vmatpush3.bf16.msra.mxu0 %v5543_v2  ;;  %v4453_v2 = vcombine.low %v2162_v14, %v2172_v52  ;;  %v4464_v18 = vcombine.low %v2308_v38, %v2311_v9  ;;  %v5569_v14 = vld [vmem:[#allocation14 + $0x40] sm:$0xff]   ;;  %v5571_v38 = vld [vmem:[#allocation14 + $0x50] sm:$0xff]  }
 0x398   :  { %5090 = vmatprep.subr.bf16.mxu0 %v5544_v26  ;;  %v2490_v35 = vrot.slane %v2488_v60, 7 }
 0x39b   :  { %5091 = vmatpush3.bf16.msra.mxu0 %v5544_v26  ;;  %v2448_v26 = vshrl.u32 %v2299_v59, 16  ;;  %v2483_v59 = vrot.slane %v6383_v50, 4 }
 0x39c   :  { %5096 = vmatprep.subr.bf16.mxu0 %v5545_v32 }
 0x39d   :  { %v2450_v12 = vrot.slane %v2448_v26, 6 }
 0x39e   :  { %5093 = vmatmul.mubr.bf16.vlgmr.msra.gmra.mrb[8].mxu0 %v4443_v10  ;;  %v2317_v10 = vrot.slane %v6362_v27, 6 }
 0x39f   :  { %5097 = vmatpush3.bf16.msra.mxu0 %v5545_v32  ;;  %5112 = vmatprep.mubr.bf16.mxu0 %v4452_v17  ;;  %v2314_v32 = vrot.slane %v6340_v43, 6  ;;  %v2454_v37 = vor.u32 %v2453_v13, %v2450_v12  ;;  %v5561_v17 = vld [vmem:[#allocation11 + $0x140] sm:$0xff]  }
 0x3a0   :  { %5098 = vmatprep.subr.bf16.mxu0 %v5546_v40 }
 0x3a1   :  { %v2316_v39 = vrot.slane %v2314_v32, 4 }
 0x3a3   :  { %5099 = vmatpush3.bf16.msra.mxu0 %v5546_v40  ;;  %v2460_v40 = vrot.slane %v6381_v45, 4  ;;  %v2318_v43 = vsel %vm6279_vm8, %v2316_v39, %v2317_v10 }
 0x3a4   :  { %5100 = vmatprep.subr.bf16.mxu0 %v5547_v42 }
 0x3a7   :  { %5101 = vmatpush3.bf16.msra.mxu0 %v5547_v42  ;;  %v2455_v42 = vrot.slane %v2454_v37, 4 }
 0x3a8   :  { %5102 = vmatprep.subr.bf16.mxu0 %v5548_v44 }
 0x3a9   :  { %v2459_v48 = vsel %vm6123_vm9, %v2455_v42, %v6381_v45  ;;  %v2485_v45 = vshrl.u32 %v6365_v29, 16 }
 0x3ab   :  { %5103 = vmatpush3.bf16.msra.mxu0 %v5548_v44  ;;  %v4463_v44 = vrot.slane %v2300_v25, 10  ;;  %v2487_v1 = vrot.slane %v2485_v45, 6 }
 0x3ac   :  { %5104 = vmatprep.subr.bf16.mxu0 %v5549_v46 }
 0x3ad   :  { %v2315_v49 = vsel %vm6279_vm8, %v4463_v44, %v2314_v32 }
 0x3ae   :  { %v4465_v27 = vcombine.low %v2315_v49, %v2318_v43 }
 0x3af   :  { %5105 = vmatpush3.bf16.msra.mxu0 %v5549_v46  ;;  %v2469_v46 = vsel %vm6123_vm9, %v2460_v40, %v2468_v24 }
 0x3b0   :  { %5106 = vmatprep.subr.bf16.mxu0 %v5550_v51  ;;  %v4474_v61 = vcombine.low %v2459_v48, %v2469_v46 }
 0x3b3   :  { %5107 = vmatpush3.bf16.msra.mxu0 %v5550_v51  ;;  %v5562_v51 = vld [vmem:[#allocation11 + $0x148] sm:$0xff]  }
 0x3b4   :  { %5108 = vmatprep.subr.bf16.mxu0 %v5551_v55 }
 0x3b7   :  { %5109 = vmatpush3.bf16.msra.mxu0 %v5551_v55  ;;  %v2471_v55 = vshrl.u32 %v2300_v25, 16 }
 0x3b8   :  { %5110 = vmatprep.subr.bf16.mxu0 %v5552_v63 }
 0x3b9   :  { %v2473_v47 = vrot.slane %v2471_v55, 6 }
 0x3bb   :  { %5111 = vmatpush3.bf16.msra.mxu0 %v5552_v63  ;;  %v2476_v63 = vrot.slane %v2474_v23, 7 }
 0x3bc   :  { %5116 = vmatprep.subr.bf16.mxu0 %v5553_v5 }
 0x3bd   :  { %v2477_v3 = vor.u32 %v2476_v63, %v2473_v47 }
 0x3be   :  { %5113 = vmatmul.mubr.bf16.vlgmr.msra.gmra.mrb[8].mxu0 %v4453_v2  ;;  %v5570_v2 = vld [vmem:[#allocation14 + $0x48] sm:$0xff]  }
 0x3bf   :  { %5117 = vmatpush3.bf16.msra.mxu0 %v5553_v5  ;;  %5132 = vmatprep.mubr.bf16.mxu0 %v4464_v18  ;;  %v2491_v5 = vor.u32 %v2490_v35, %v2487_v1  ;;  %v2478_v52 = vrot.slane %v2477_v3, 4  ;;  %v5573_v18 = vld [vmem:[#allocation14 + $0x60] sm:$0xff]  }
 0x3c0   :  { %5118 = vmatprep.subr.bf16.mxu0 %v5554_v15 }
 0x3c1   :  { %v2492_v29 = vsel %vm6123_vm9, %v2483_v59, %v2491_v5  ;;  %v2482_v6 = vsel %vm6123_vm9, %v2478_v52, %v6383_v50  ;;  %v5576_v50 = vld [vmem:[#allocation14 + $0x78] sm:$0xff]   ;;  %vm4302_vm9 = vcmask 404480  }
 0x3c2   :  { %v4475_v9 = vcombine.low %v2482_v6, %v2492_v29 }
 0x3c3   :  { %5119 = vmatpush3.bf16.msra.mxu0 %v5554_v15  ;;  %v5572_v15 = vld [vmem:[#allocation14 + $0x58] sm:$0xff]  }
 0x3c4   :  { %5120 = vmatprep.subr.bf16.mxu0 %v5555_v11 }
 0x3c7   :  { %5121 = vmatpush3.bf16.msra.mxu0 %v5555_v11  ;;  %v5574_v11 = vld [vmem:[#allocation14 + $0x68] sm:$0xff]  }
 0x3c8   :  { %5122 = vmatprep.subr.bf16.mxu0 %v5556_v20 }
 0x3cb   :  { %5123 = vmatpush3.bf16.msra.mxu0 %v5556_v20  ;;  %v6442_v20 = vld [vmem:[#allocation14] sm:$0xff]  }
 0x3cc   :  { %5124 = vmatprep.subr.bf16.mxu0 %v5557_v21 }
 0x3cf   :  { %5125 = vmatpush3.bf16.msra.mxu0 %v5557_v21  ;;  %v4484_v21 = vld [vmem:[#allocation12] ss:$0 sm:$0xff] }
 0x3d0   :  { %5126 = vmatprep.subr.bf16.mxu0 %v5558_v19 }
 0x3d3   :  { %5127 = vmatpush3.bf16.msra.mxu0 %v5558_v19 }
 0x3d4   :  { %5128 = vmatprep.subr.bf16.mxu0 %v5559_v31 }
 0x3d7   :  { %5129 = vmatpush3.bf16.msra.mxu0 %v5559_v31 }
 0x3d8   :  { %5130 = vmatprep.subr.bf16.mxu0 %v5560_v4 }
 0x3db   :  { %5131 = vmatpush3.bf16.msra.mxu0 %v5560_v4 }
 0x3dc   :  { %5136 = vmatprep.subr.bf16.mxu0 %v5561_v17 }
 0x3de   :  { %5133 = vmatmul.mubr.bf16.vlgmr.msra.gmra.mrb[8].mxu0 %v4465_v27 }
 0x3df   :  { %5137 = vmatpush3.bf16.msra.mxu0 %v5561_v17  ;;  %5152 = vmatprep.mubr.bf16.mxu0 %v4474_v61 }
 0x3e0   :  { %5138 = vmatprep.subr.bf16.mxu0 %v5562_v51 }
 0x3e3   :  { %5139 = vmatpush3.bf16.msra.mxu0 %v5562_v51 }
 0x3e4   :  { %5140 = vmatprep.subr.bf16.mxu0 %v5563_v16 }
 0x3e7   :  { %5141 = vmatpush3.bf16.msra.mxu0 %v5563_v16 }
 0x3e8   :  { %5142 = vmatprep.subr.bf16.mxu0 %v5564_v53 }
 0x3eb   :  { %5143 = vmatpush3.bf16.msra.mxu0 %v5564_v53 }
 0x3ec   :  { %5144 = vmatprep.subr.bf16.mxu0 %v5565_v54 }
 0x3ef   :  { %5145 = vmatpush3.bf16.msra.mxu0 %v5565_v54 }
 0x3f0   :  { %5146 = vmatprep.subr.bf16.mxu0 %v5566_v57 }
 0x3f3   :  { %5147 = vmatpush3.bf16.msra.mxu0 %v5566_v57 }
 0x3f4   :  { %5148 = vmatprep.subr.bf16.mxu0 %v5567_v0 }
 0x3f7   :  { %5149 = vmatpush3.bf16.msra.mxu0 %v5567_v0 }
 0x3f8   :  { %5150 = vmatprep.subr.bf16.mxu0 %v5568_v41 }
 0x3fb   :  { %5151 = vmatpush3.bf16.msra.mxu0 %v5568_v41 }
 0x3fc   :  { %5156 = vmatprep.subr.bf16.mxu0 %v5569_v14 }
 0x3fe   :  { %5153 = vmatmul.mubr.bf16.vlgmr.msra.gmra.mrb[8].mxu0 %v4475_v9 }
 0x3ff   :  { %5157 = vmatpush3.bf16.msra.mxu0 %v5569_v14 }
 0x400   :  { %5158 = vmatprep.subr.bf16.mxu0 %v5570_v2 }
 0x403   :  { %5159 = vmatpush3.bf16.msra.mxu0 %v5570_v2 }
 0x404   :  { %5160 = vmatprep.subr.bf16.mxu0 %v5571_v38 }
 0x407   :  { %5161 = vmatpush3.bf16.msra.mxu0 %v5571_v38 }
 0x408   :  { %5162 = vmatprep.subr.bf16.mxu0 %v5572_v15 }
 0x40b   :  { %5163 = vmatpush3.bf16.msra.mxu0 %v5572_v15 }
 0x40c   :  { %5164 = vmatprep.subr.bf16.mxu0 %v5573_v18 }
 0x40f   :  { %5165 = vmatpush3.bf16.msra.mxu0 %v5573_v18 }
 0x410   :  { %5166 = vmatprep.subr.bf16.mxu0 %v5574_v11 }
 0x413   :  { %5167 = vmatpush3.bf16.msra.mxu0 %v5574_v11 }
 0x414   :  { %5168 = vmatprep.subr.bf16.mxu0 %v5575_v62 }
 0x417   :  { %5169 = vmatpush3.bf16.msra.mxu0 %v5575_v62 }
 0x418   :  { %5170 = vmatprep.subr.bf16.mxu0 %v5576_v50 }
 0x41b   :  { %5171 = vmatpush3.bf16.msra.mxu0 %v5576_v50 }
 0x41c   :  { %5176 = vmatprep.subr.bf16.mxu0 %v6442_v20 }
 0x4d1   :  { %v5154_v19 = vpop.f32.mrb[8].mxu0 }
 0x4d2   :  { %v2628_v26 = vadd.f32 %v5154_v19, %v4484_v21  ;;  %v2600_v7 = vpop.f32.mrb[9].mxu0 }
 0x4d3   :  { %v2626_v30 = vadd.f32 %v4484_v21, %v2600_v7  ;;  %v5155_v28 = vpop.f32.mrb[10].mxu0 }
 0x4d4   :  { %v2632_v31 = vmax.f32 %v2628_v26, 0.0  ;;  %v2629_v12 = vadd.f32 %v5155_v28, %v4484_v21  ;;  %v2603_v13 = vpop.f32.mrb[11].mxu0 }
 0x4d5   :  { %v2630_v32 = vmax.f32 %v2626_v30, 0.0  ;;  %v2627_v33 = vadd.f32 %v4484_v21, %v2603_v13 }
 0x4d6   :  { %v4617_v36 = vpack.c.bf16 %v2632_v31, %v2632_v31  ;;  %v2633_v4 = vmax.f32 %v2629_v12, 0.0 }
 0x4d7   :  { %v4615_v37 = vpack.c.bf16 %v2630_v32, %v2630_v32  ;;  %v2631_v39 = vmax.f32 %v2627_v33, 0.0 }
 0x4d8   :  { %v2653_v10 = vrot.slane %v4617_v36, 7  ;;  %v4618_v25 = vpack.c.bf16 %v2633_v4, %v2633_v4 }
 0x4d9   :  { %v2648_v40 = vrot.slane %v4615_v37, 7  ;;  %v4616_v24 = vpack.c.bf16 %v2631_v39, %v2631_v39 }
 0x4da   :  { %v2654_v17 = vrot.slane %v2653_v10, 4  ;;  %2667 = vst [vmem:[#allocation2 + $0xc] sm:$0xe] %v2653_v10  ;;  %v2655_v42 = vrot.slane %v4618_v25, 7 }
 0x4db   :  { %v2649_v44 = vrot.slane %v2648_v40, 4  ;;  %2664 = vst [vmem:[#allocation2] sm:$0xe] %v2648_v40  ;;  %v2650_v43 = vrot.slane %v4616_v24, 7  ;;  %v5579_v40 = vld [vmem:[#allocation14 + $0x8] sm:$0xff]  }
 0x4dc   :  { %v2656_v46 = vsel %vm6312_vm11, %v2654_v17, %v2655_v42  ;;  %v2657_v49 = vrot.slane %v2655_v42, 4 }
 0x4dd   :  { %2668 = vst [vmem:[#allocation2 + $0x10] sm:$0xf] %v2656_v46  ;;  %v2651_v27 = vsel %vm6312_vm11, %v2649_v44, %v2650_v43  ;;  %v2652_v48 = vrot.slane %v2650_v43, 4 }
 0x4de   :  { %2669 = vst [vmem:[#allocation2 + $0x14] sm:$0x1] %v2657_v49  ;;  %2665 = vst [vmem:[#allocation2 + $0x4] sm:$0xf] %v2651_v27  ;;  %v5580_v49 = vld [vmem:[#allocation14 + $0x10] sm:$0xff]  }
 0x4df   :  { %2666 = vst [vmem:[#allocation2 + $0x8] sm:$0x1] %v2652_v48  ;;  %v5581_v48 = vld [vmem:[#allocation14 + $0x18] sm:$0xff]  }
 0x4e1   :  { %v2695_v51 = vld [vmem:[#allocation2 + $0xc] sm:$0xf] }
 0x4e2   :  { %v2692_v61 = vld [vmem:[#allocation2] sm:$0xf]  ;;  %v2723_v16 = vshrl.u32 %v2695_v51, 16  ;;  %v2726_v53 = vshll.u32 %v2695_v51, 16  ;;  %v6460_v15 = vld [vmem:[#allocation2 + $0xc] sm:$0xe] }
 0x4e3   :  { %v2699_v54 = vshrl.u32 %v2692_v61, 16  ;;  %v2702_v55 = vshll.u32 %v2692_v61, 16  ;;  %v4510_v7 = vrot.slane %v6460_v15, 9  ;;  %v5582_v51 = vld [vmem:[#allocation14 + $0x20] sm:$0xff]   ;;  %v5583_v61 = vld [vmem:[#allocation14 + $0x28] sm:$0xff]  }
 0x4e4   :  { %v6449_v23 = vld [vmem:[#allocation2 + $0x10] sm:$0xf]  ;;  %v2725_v57 = vrot.slane %v2723_v16, 4  ;;  %v2728_v45 = vrot.slane %v2726_v53, 5  ;;  %v5585_v53 = vld [vmem:[#allocation14 + $0x38] sm:$0xff]  }
 0x4e5   :  { %v6451_v60 = vld [vmem:[#allocation2 + $0x4] sm:$0xf]  ;;  %v2701_v47 = vrot.slane %v2699_v54, 4  ;;  %v2704_v63 = vrot.slane %v2702_v55, 5  ;;  %v2697_v0 = vld [vmem:[#allocation2 + $0x14] sm:$0x1] }
 0x4e6   :  { %v6453_v1 = vld [vmem:[#allocation2 + $0x8] sm:$0x1]  ;;  %v2708_v35 = vshll.u32 %v6451_v60, 16  ;;  %v2712_v3 = vshrl.u32 %v6451_v60, 16  ;;  %v2729_v41 = vor.u32 %v2728_v45, %v2725_v57  ;;  %v2732_v59 = vshll.u32 %v6449_v23, 16  ;;  %v5578_v17 = vld [vmem:[#allocation2] sm:$0xff]  }
 0x4e7   :  { %v2705_v5 = vor.u32 %v2704_v63, %v2701_v47  ;;  %v2736_v52 = vshrl.u32 %v6449_v23, 16  ;;  %v2718_v9 = vshll.u32 %v6453_v1, 16  ;;  %v2742_v38 = vshll.u32 %v2697_v0, 16  ;;  %v5584_v16 = vld [vmem:[#allocation14 + $0x30] sm:$0xff]   ;;  %v2977_v57 = vld [vmem:[#allocation2] sm:$0xe] }
 0x4e8   :  { %v2710_v29 = vrot.slane %v2708_v35, 5  ;;  %v2714_v6 = vrot.slane %v2712_v3, 4  ;;  %v2734_v14 = vrot.slane %v2732_v59, 5  ;;  %v2730_v62 = vrot.slane %v2729_v41, 4  ;;  %v5587_v45 = vld [vmem:[#allocation14 + $0x80] sm:$0xff]  }
 0x4e9   :  { %v2738_v2 = vrot.slane %v2736_v52, 4  ;;  %v2706_v18 = vrot.slane %v2705_v5, 4  ;;  %v2994_v21 = vrot.slane %v6449_v23, 5  ;;  %v2720_v26 = vrot.slane %v2718_v9, 5  ;;  %v5591_v5 = vld [vmem:[#allocation14 + $0xa0] sm:$0xff]  }
 0x4ea   :  { %v2715_v11 = vor.u32 %v2714_v6, %v2710_v29  ;;  %v2997_v30 = vrot.slane %v2697_v0, 5  ;;  %v2744_v31 = vrot.slane %v2742_v38, 5  ;;  %v2735_v33 = vsel %vm6177_vm15, %v2730_v62, %v2734_v14  ;;  %v5586_v0 = vld [vmem:[#allocation2 + $0xc] sm:$0xff]  }
 0x4eb   :  { %v2739_v50 = vor.u32 %v2738_v2, %v2734_v14  ;;  %v2996_v12 = vrot.slane %v2994_v21, 4  ;;  %v2711_v13 = vsel %vm6177_vm15, %v2706_v18, %v2710_v29  ;;  %v6472_v36 = vsel %vm6141_vm14, %v4510_v7, %v2994_v21  ;;  %v5592_v29 = vld [vmem:[#allocation14 + $0xa8] sm:$0xff]   ;;  %v5593_v38 = vld [vmem:[#allocation14 + $0xb0] sm:$0xff]   ;;  %v5594_v21 = vld [vmem:[#allocation14 + $0xb8] sm:$0xff]  }
 0x4ec   :  { %v2716_v19 = vrot.slane %v2715_v11, 4  ;;  %v3136_v10 = vrot.slane %v2712_v3, 5  ;;  %v3137_v42 = vrot.slane %v2708_v35, 6  ;;  %v3159_v44 = vrot.slane %v2736_v52, 5  ;;  %v5588_v3 = vld [vmem:[#allocation14 + $0x88] sm:$0xff]  }
 0x4ed   :  { %v2740_v28 = vrot.slane %v2739_v50, 4  ;;  %v6478_v39 = vsel %vm6141_vm14, %v2996_v12, %v2997_v30  ;;  %v3160_v43 = vrot.slane %v2732_v59, 6  ;;  %v2990_v55 = vrot.slane %v6453_v1, 5  ;;  %v5589_v1 = vld [vmem:[#allocation14 + $0x90] sm:$0xff]   ;;  %v5590_v59 = vld [vmem:[#allocation14 + $0x98] sm:$0xff]   ;;  %v5595_v30 = vld [vmem:[#allocation14 + $0xc0] sm:$0xff]  }
 0x4ee   :  { %v2721_v32 = vsel %vm6177_vm15, %v2716_v19, %v2720_v26  ;;  %v4512_v24 = vcombine.low %v6472_v36, %v6478_v39  ;;  %v6483_v46 = vor.u32 %v3137_v42, %v3136_v10  ;;  %v4509_v47 = vrot.slane %v2977_v57, 9  ;;  %v6493_v52 = vld [vmem:[#allocation2 + $0x8] sm:$0x3]  ;;  %v6506_v10 = vld [vmem:[#allocation2 + $0x14] sm:$0x3] }
 0x4ef   :  { %v4489_v4 = vcombine.low %v2711_v13, %v2721_v32  ;;  %v2745_v37 = vsel %vm6177_vm15, %v2740_v28, %v2744_v31  ;;  %v6485_v27 = vor.u32 %v3160_v43, %v3159_v44  ;;  %v3128_v6 = vshrl.u32 %v2977_v57, 16  ;;  %v5596_v13 = vld [vmem:[#allocation14 + $0xc8] sm:$0xff]   ;;  %v5601_v44 = vld [vmem:[#allocation14 + $0xf0] sm:$0xff]  }
 0x4f0   :  { %v4490_v25 = vcombine.low %v2735_v33, %v2745_v37  ;;  %v3131_v9 = vshll.u32 %v2977_v57, 16  ;;  %v3142_v14 = vshrl.u32 %v6493_v52, 16  ;;  %v3145_v2 = vshll.u32 %v6493_v52, 16  ;;  %v5597_v33 = vld [vmem:[#allocation14 + $0xd0] sm:$0xff]   ;;  %v5599_v37 = vld [vmem:[#allocation14 + $0xe0] sm:$0xff]   ;;  %v5600_v36 = vld [vmem:[#allocation14 + $0xe8] sm:$0xff]  }
 0x4f1   :  { %5172 = vmatprep.mubr.bf16.mxu0 %v4489_v4  ;;  %v3130_v18 = vrot.slane %v3128_v6, 5  ;;  %v3140_v26 = vrot.slane %v6483_v46, 4  ;;  %v5598_v4 = vld [vmem:[#allocation14 + $0xd8] sm:$0xff]   ;;  %v3165_v39 = vshrl.u32 %v6506_v10, 16 }
 0x4f2   :  { %5173 = vmatmul.mubr.bf16.vlgmr.msra.gmra.mrb[12].mxu0 %v4490_v25  ;;  %v3133_v11 = vrot.slane %v3131_v9, 6  ;;  %v3144_v62 = vrot.slane %v3142_v14, 5  ;;  %v3147_v50 = vrot.slane %v3145_v2, 6  ;;  %v3151_v25 = vshrl.u32 %v6460_v15, 16  ;;  %v3300_v14 = vld [vmem:[#allocation2 + $0xc] sm:$0xc] }
 0x4f3   :  { %5177 = vmatpush3.bf16.msra.mxu0 %v6442_v20  ;;  %5192 = vmatprep.mubr.bf16.mxu0 %v5578_v17  ;;  %v2987_v20 = vrot.slane %v6451_v60, 5  ;;  %v3167_v43 = vrot.slane %v3165_v39, 5  ;;  %v3317_v9 = vrot.slane %v6506_v10, 6  ;;  %v4532_v2 = vrot.slane %v3300_v14, 10 }
 0x4f4   :  { %5178 = vmatprep.subr.bf16.mxu0 %v5579_v40  ;;  %v3134_v19 = vor.u32 %v3133_v11, %v3130_v18  ;;  %v3148_v7 = vor.u32 %v3147_v50, %v3144_v62  ;;  %v3153_v17 = vrot.slane %v3151_v25, 5  ;;  %v5612_v62 = vld [vmem:[#allocation17 + $0x48] sm:$0xff]   ;;  %v5613_v50 = vld [vmem:[#allocation17 + $0x50] sm:$0xff]  }
 0x4f5   :  { %v2989_v54 = vrot.slane %v2987_v20, 4  ;;  %v2988_v35 = vsel %vm6141_vm14, %v4509_v47, %v2987_v20  ;;  %v3310_v20 = vrot.slane %v6493_v52, 6  ;;  %v3314_v52 = vrot.slane %v6449_v23, 6  ;;  %v5611_v23 = vld [vmem:[#allocation17 + $0x40] sm:$0xff]  }
 0x4f6   :  { %v3135_v28 = vrot.slane %v3134_v19, 4  ;;  %v3149_v31 = vsel %vm6228_vm3, %v3140_v26, %v3148_v7  ;;  %5256 = vmatprep.subr.bf16.mxu1 %v5611_v23  ;;  %v5615_v19 = vld [vmem:[#allocation17 + $0x60] sm:$0xff]   ;;  %v5616_v26 = vld [vmem:[#allocation17 + $0x68] sm:$0xff]   ;;  %v5617_v7 = vld [vmem:[#allocation17 + $0x70] sm:$0xff]  }
 0x4f7   :  { %5179 = vmatpush3.bf16.msra.mxu0 %v5579_v40  ;;  %v2991_v63 = vsel %vm6141_vm14, %v2989_v54, %v2990_v55  ;;  %v3154_v40 = vshll.u32 %v6460_v15, 16  ;;  %v3163_v15 = vrot.slane %v6485_v27, 4  ;;  %v3299_v54 = vld [vmem:[#allocation2] sm:$0xc]  ;;  %v3316_v6 = vrot.slane %v3314_v52, 4  ;;  %5257 = vmatpush3.bf16.msra.mxu1 %v5611_v23 }
 0x4f8   :  { %5180 = vmatprep.subr.bf16.mxu0 %v5580_v49  ;;  %v4511_v41 = vcombine.low %v2988_v35, %v2991_v63  ;;  %v3139_v12 = vsel %vm6228_vm3, %v3135_v28, %v6483_v46  ;;  %v5603_v55 = vld [vmem:[#allocation14 + $0x100] sm:$0xff]   ;;  %v5604_v35 = vld [vmem:[#allocation14 + $0x108] sm:$0xff]   ;;  %v3315_v18 = vsel %vm6279_vm8, %v4532_v2, %v3314_v52  ;;  %5258 = vmatprep.subr.bf16.mxu1 %v5612_v62 }
 0x4f9   :  { %v4521_v32 = vcombine.low %v3139_v12, %v3149_v31  ;;  %v3156_v42 = vrot.slane %v3154_v40, 6  ;;  %v6530_v28 = vld [vmem:[#allocation17] sm:$0xff]   ;;  %v4543_v31 = vld [vmem:[#allocation15] ss:$0 sm:$0xff] }
 0x4fb   :  { %5181 = vmatpush3.bf16.msra.mxu0 %v5580_v49  ;;  %v3307_v49 = vrot.slane %v6451_v60, 6  ;;  %5259 = vmatpush3.bf16.msra.mxu1 %v5612_v62 }
 0x4fc   :  { %5182 = vmatprep.subr.bf16.mxu0 %v5581_v48  ;;  %5260 = vmatprep.subr.bf16.mxu1 %v5613_v50 }
 0x4ff   :  { %5183 = vmatpush3.bf16.msra.mxu0 %v5581_v48  ;;  %v3157_v48 = vor.u32 %v3156_v42, %v3153_v17  ;;  %5261 = vmatpush3.bf16.msra.mxu1 %v5613_v50 }
 0x500   :  { %5184 = vmatprep.subr.bf16.mxu0 %v5582_v51 }
 0x503   :  { %5185 = vmatpush3.bf16.msra.mxu0 %v5582_v51  ;;  %v5602_v51 = vld [vmem:[#allocation14 + $0xf8] sm:$0xff]  }
 0x504   :  { %5186 = vmatprep.subr.bf16.mxu0 %v5583_v61 }
 0x507   :  { %5187 = vmatpush3.bf16.msra.mxu0 %v5583_v61 }
 0x508   :  { %5188 = vmatprep.subr.bf16.mxu0 %v5584_v16 }
 0x50b   :  { %5189 = vmatpush3.bf16.msra.mxu0 %v5584_v16  ;;  %v3309_v16 = vrot.slane %v3307_v49, 4 }
 0x50c   :  { %5190 = vmatprep.subr.bf16.mxu0 %v5585_v53 }
 0x50d   :  { %v3311_v60 = vsel %vm6279_vm8, %v3309_v16, %v3310_v20 }
 0x50f   :  { %5191 = vmatpush3.bf16.msra.mxu0 %v5585_v53  ;;  %v3158_v53 = vrot.slane %v3157_v48, 4 }
 0x510   :  { %5196 = vmatprep.subr.bf16.mxu0 %v5587_v45 }
 0x511   :  { %v3162_v47 = vsel %vm6228_vm3, %v3158_v53, %v6485_v27  ;;  %v5608_v27 = vld [vmem:[#allocation14 + $0x128] sm:$0xff]  }
 0x512   :  { %5193 = vmatmul.mubr.bf16.vlgmr.msra.gmra.mrb[12].mxu0 %v5586_v0 }
 0x513   :  { %5197 = vmatpush3.bf16.msra.mxu0 %v5587_v45  ;;  %5212 = vmatprep.mubr.bf16.mxu0 %v4511_v41  ;;  %v4531_v45 = vrot.slane %v3299_v54, 10  ;;  %v5605_v41 = vld [vmem:[#allocation14 + $0x110] sm:$0xff]  }
 0x514   :  { %5198 = vmatprep.subr.bf16.mxu0 %v5588_v3 }
 0x515   :  { %v3308_v0 = vsel %vm6279_vm8, %v4531_v45, %v3307_v49 }
 0x517   :  { %5199 = vmatpush3.bf16.msra.mxu0 %v5588_v3  ;;  %v4533_v3 = vcombine.low %v3308_v0, %v3311_v60 }
 0x518   :  { %5200 = vmatprep.subr.bf16.mxu0 %v5589_v1 }
 0x51b   :  { %5201 = vmatpush3.bf16.msra.mxu0 %v5589_v1  ;;  %v5606_v1 = vld [vmem:[#allocation14 + $0x118] sm:$0xff]  }
 0x51c   :  { %5202 = vmatprep.subr.bf16.mxu0 %v5590_v59 }
 0x51f   :  { %5203 = vmatpush3.bf16.msra.mxu0 %v5590_v59  ;;  %v5607_v59 = vld [vmem:[#allocation14 + $0x120] sm:$0xff]  }
 0x520   :  { %5204 = vmatprep.subr.bf16.mxu0 %v5591_v5 }
 0x523   :  { %5205 = vmatpush3.bf16.msra.mxu0 %v5591_v5  ;;  %v5609_v5 = vld [vmem:[#allocation14 + $0x130] sm:$0xff]  }
 0x524   :  { %5206 = vmatprep.subr.bf16.mxu0 %v5592_v29 }
 0x527   :  { %5207 = vmatpush3.bf16.msra.mxu0 %v5592_v29  ;;  %v5610_v29 = vld [vmem:[#allocation14 + $0x138] sm:$0xff]  }
 0x528   :  { %5208 = vmatprep.subr.bf16.mxu0 %v5593_v38 }
 0x52b   :  { %5209 = vmatpush3.bf16.msra.mxu0 %v5593_v38  ;;  %v3318_v38 = vsel %vm6279_vm8, %v3316_v6, %v3317_v9 }
 0x52c   :  { %5210 = vmatprep.subr.bf16.mxu0 %v5594_v21  ;;  %v4534_v11 = vcombine.low %v3315_v18, %v3318_v38 }
 0x52f   :  { %5211 = vmatpush3.bf16.msra.mxu0 %v5594_v21  ;;  %v5614_v21 = vld [vmem:[#allocation17 + $0x58] sm:$0xff]  }
 0x530   :  { %5216 = vmatprep.subr.bf16.mxu0 %v5595_v30  ;;  %5262 = vmatprep.subr.bf16.mxu1 %v5614_v21 }
 0x531   :  { %5263 = vmatpush3.bf16.msra.mxu1 %v5614_v21 }
 0x532   :  { %5213 = vmatmul.mubr.bf16.vlgmr.msra.gmra.mrb[12].mxu0 %v4512_v24  ;;  %v3168_v24 = vshll.u32 %v6506_v10, 16  ;;  %5264 = vmatprep.subr.bf16.mxu1 %v5615_v19 }
 0x533   :  { %5217 = vmatpush3.bf16.msra.mxu0 %v5595_v30  ;;  %5232 = vmatprep.mubr.bf16.mxu0 %v4521_v32  ;;  %v5618_v30 = vld [vmem:[#allocation17 + $0x78] sm:$0xff]  }
 0x534   :  { %5218 = vmatprep.subr.bf16.mxu0 %v5596_v13  ;;  %v3170_v46 = vrot.slane %v3168_v24, 6 }
 0x535   :  { %5265 = vmatpush3.bf16.msra.mxu1 %v5615_v19 }
 0x536   :  { %v3171_v61 = vor.u32 %v3170_v46, %v3167_v43  ;;  %5266 = vmatprep.subr.bf16.mxu1 %v5616_v26 }
 0x537   :  { %5219 = vmatpush3.bf16.msra.mxu0 %v5596_v13 }
 0x538   :  { %5220 = vmatprep.subr.bf16.mxu0 %v5597_v33  ;;  %v3172_v57 = vsel %vm6228_vm3, %v3163_v15, %v3171_v61 }
 0x539   :  { %v4522_v63 = vcombine.low %v3162_v47, %v3172_v57  ;;  %5267 = vmatpush3.bf16.msra.mxu1 %v5616_v26 }
 0x53a   :  { %5268 = vmatprep.subr.bf16.mxu1 %v5617_v7 }
 0x53b   :  { %5221 = vmatpush3.bf16.msra.mxu0 %v5597_v33 }
 0x53c   :  { %5222 = vmatprep.subr.bf16.mxu0 %v5598_v4 }
 0x53d   :  { %5269 = vmatpush3.bf16.msra.mxu1 %v5617_v7 }
 0x53e   :  { %5270 = vmatprep.subr.bf16.mxu1 %v5618_v30 }
 0x53f   :  { %5223 = vmatpush3.bf16.msra.mxu0 %v5598_v4 }
 0x540   :  { %5224 = vmatprep.subr.bf16.mxu0 %v5599_v37 }
 0x541   :  { %5271 = vmatpush3.bf16.msra.mxu1 %v5618_v30 }
 0x542   :  { %5276 = vmatprep.subr.bf16.mxu1 %v6530_v28 }
 0x543   :  { %5225 = vmatpush3.bf16.msra.mxu0 %v5599_v37 }
 0x544   :  { %5226 = vmatprep.subr.bf16.mxu0 %v5600_v36 }
 0x547   :  { %5227 = vmatpush3.bf16.msra.mxu0 %v5600_v36 }
 0x548   :  { %5228 = vmatprep.subr.bf16.mxu0 %v5601_v44 }
 0x54b   :  { %5229 = vmatpush3.bf16.msra.mxu0 %v5601_v44 }
 0x54c   :  { %5230 = vmatprep.subr.bf16.mxu0 %v5602_v51 }
 0x54f   :  { %5231 = vmatpush3.bf16.msra.mxu0 %v5602_v51 }
 0x550   :  { %5236 = vmatprep.subr.bf16.mxu0 %v5603_v55 }
 0x552   :  { %5233 = vmatmul.mubr.bf16.vlgmr.msra.gmra.mrb[12].mxu0 %v4522_v63 }
 0x553   :  { %5237 = vmatpush3.bf16.msra.mxu0 %v5603_v55  ;;  %5252 = vmatprep.mubr.bf16.mxu0 %v4533_v3 }
 0x554   :  { %5238 = vmatprep.subr.bf16.mxu0 %v5604_v35 }
 0x557   :  { %5239 = vmatpush3.bf16.msra.mxu0 %v5604_v35 }
 0x558   :  { %5240 = vmatprep.subr.bf16.mxu0 %v5605_v41 }
 0x55b   :  { %5241 = vmatpush3.bf16.msra.mxu0 %v5605_v41 }
 0x55c   :  { %5242 = vmatprep.subr.bf16.mxu0 %v5606_v1 }
 0x55f   :  { %5243 = vmatpush3.bf16.msra.mxu0 %v5606_v1 }
 0x560   :  { %5244 = vmatprep.subr.bf16.mxu0 %v5607_v59 }
 0x563   :  { %5245 = vmatpush3.bf16.msra.mxu0 %v5607_v59 }
 0x564   :  { %5246 = vmatprep.subr.bf16.mxu0 %v5608_v27 }
 0x567   :  { %5247 = vmatpush3.bf16.msra.mxu0 %v5608_v27 }
 0x568   :  { %5248 = vmatprep.subr.bf16.mxu0 %v5609_v5 }
 0x56b   :  { %5249 = vmatpush3.bf16.msra.mxu0 %v5609_v5 }
 0x56c   :  { %5250 = vmatprep.subr.bf16.mxu0 %v5610_v29 }
 0x56f   :  { %5251 = vmatpush3.bf16.msra.mxu0 %v5610_v29 }
 0x572   :  { %5253 = vmatmul.mubr.bf16.vlgmr.msra.gmra.mrb[12].mxu0 %v4534_v11 }
 0x645   :  { %v5254_v12 = vpop.f32.mrb[12].mxu0 }
 0x646   :  { %v3454_v13 = vadd.f32 %v5254_v12, %v4543_v31  ;;  %v3426_v32 = vpop.f32.mrb[13].mxu0 }
 0x647   :  { %v3452_v33 = vadd.f32 %v4543_v31, %v3426_v32  ;;  %v5255_v4 = vpop.f32.mrb[14].mxu0 }
 0x648   :  { %v3458_v37 = vmax.f32 %v3454_v13, 0.0  ;;  %v3455_v10 = vadd.f32 %v5255_v4, %v4543_v31  ;;  %v3429_v25 = vpop.f32.mrb[15].mxu0 }
 0x649   :  { %v3456_v40 = vmax.f32 %v3452_v33, 0.0  ;;  %v3453_v36 = vadd.f32 %v4543_v31, %v3429_v25 }
 0x64a   :  { %v4621_v39 = vpack.c.bf16 %v3458_v37, %v3458_v37  ;;  %v3459_v24 = vmax.f32 %v3455_v10, 0.0 }
 0x64b   :  { %v4619_v17 = vpack.c.bf16 %v3456_v40, %v3456_v40  ;;  %v3457_v42 = vmax.f32 %v3453_v36, 0.0 }
 0x64c   :  { %v3479_v44 = vrot.slane %v4621_v39, 7  ;;  %v4622_v43 = vpack.c.bf16 %v3459_v24, %v3459_v24 }
 0x64d   :  { %v3474_v46 = vrot.slane %v4619_v17, 7  ;;  %v4620_v49 = vpack.c.bf16 %v3457_v42, %v3457_v42 }
 0x64e   :  { %v3480_v48 = vrot.slane %v3479_v44, 4  ;;  %3493 = vst [vmem:[#allocation3 + $0xc] sm:$0xe] %v3479_v44  ;;  %v3481_v51 = vrot.slane %v4622_v43, 7  ;;  %v5621_v43 = vld [vmem:[#allocation17 + $0x8] sm:$0xff]  }
 0x64f   :  { %v3475_v15 = vrot.slane %v3474_v46, 4  ;;  %3490 = vst [vmem:[#allocation3] sm:$0xe] %v3474_v46  ;;  %v3476_v61 = vrot.slane %v4620_v49, 7 }
 0x650   :  { %v3482_v16 = vsel %vm6312_vm11, %v3480_v48, %v3481_v51  ;;  %v3483_v20 = vrot.slane %v3481_v51, 4 }
 0x651   :  { %3494 = vst [vmem:[#allocation3 + $0x10] sm:$0xf] %v3482_v16  ;;  %v3477_v53 = vsel %vm6312_vm11, %v3475_v15, %v3476_v61  ;;  %v3478_v54 = vrot.slane %v3476_v61, 4  ;;  %v5622_v61 = vld [vmem:[#allocation17 + $0x10] sm:$0xff]  }
 0x652   :  { %3495 = vst [vmem:[#allocation3 + $0x14] sm:$0x1] %v3483_v20  ;;  %3491 = vst [vmem:[#allocation3 + $0x4] sm:$0xf] %v3477_v53  ;;  %v5623_v20 = vld [vmem:[#allocation17 + $0x18] sm:$0xff]   ;;  %v5624_v53 = vld [vmem:[#allocation17 + $0x20] sm:$0xff]  }
 0x653   :  { %3492 = vst [vmem:[#allocation3 + $0x8] sm:$0x1] %v3478_v54  ;;  %v5625_v54 = vld [vmem:[#allocation17 + $0x28] sm:$0xff]  }
 0x655   :  { %v3521_v55 = vld [vmem:[#allocation3 + $0xc] sm:$0xf] }
 0x656   :  { %v3518_v57 = vld [vmem:[#allocation3] sm:$0xf]  ;;  %v3549_v45 = vshrl.u32 %v3521_v55, 16  ;;  %v3552_v60 = vshll.u32 %v3521_v55, 16  ;;  %v6548_v50 = vld [vmem:[#allocation3 + $0xc] sm:$0xe] }
 0x657   :  { %v3525_v47 = vshrl.u32 %v3518_v57, 16  ;;  %v3528_v63 = vshll.u32 %v3518_v57, 16  ;;  %v4569_v13 = vrot.slane %v6548_v50, 9  ;;  %v5626_v55 = vld [vmem:[#allocation17 + $0x30] sm:$0xff]   ;;  %v5627_v57 = vld [vmem:[#allocation17 + $0x38] sm:$0xff]  }
 0x658   :  { %v6537_v0 = vld [vmem:[#allocation3 + $0x10] sm:$0xf]  ;;  %v3551_v35 = vrot.slane %v3549_v45, 4  ;;  %v3554_v3 = vrot.slane %v3552_v60, 5 }
 0x659   :  { %v6539_v41 = vld [vmem:[#allocation3 + $0x4] sm:$0xf]  ;;  %v3527_v1 = vrot.slane %v3525_v47, 4  ;;  %v3530_v59 = vrot.slane %v3528_v63, 5  ;;  %v3523_v34 = vld [vmem:[#allocation3 + $0x14] sm:$0x1] }
 0x65a   :  { %v6541_v27 = vld [vmem:[#allocation3 + $0x8] sm:$0x1]  ;;  %v3534_v5 = vshll.u32 %v6539_v41, 16  ;;  %v3538_v52 = vshrl.u32 %v6539_v41, 16  ;;  %v3555_v29 = vor.u32 %v3554_v3, %v3551_v35  ;;  %v3558_v6 = vshll.u32 %v6537_v0, 16  ;;  %v5620_v49 = vld [vmem:[#allocation3] sm:$0xff]  }
 0x65b   :  { %v3531_v9 = vor.u32 %v3530_v59, %v3527_v1  ;;  %v3562_v14 = vshrl.u32 %v6537_v0, 16  ;;  %v3544_v18 = vshll.u32 %v6541_v27, 16  ;;  %v3568_v62 = vshll.u32 %v3523_v34, 16  ;;  %v3803_v47 = vld [vmem:[#allocation3] sm:$0xe]  ;;  %v5629_v63 = vld [vmem:[#allocation17 + $0x80] sm:$0xff]  }
 0x65c   :  { %v3536_v2 = vrot.slane %v3534_v5, 5  ;;  %v3540_v38 = vrot.slane %v3538_v52, 4  ;;  %v3560_v11 = vrot.slane %v3558_v6, 5  ;;  %v3556_v26 = vrot.slane %v3555_v29, 4  ;;  %v5628_v1 = vld [vmem:[#allocation3 + $0xc] sm:$0xff]  }
 0x65d   :  { %v3564_v23 = vrot.slane %v3562_v14, 4  ;;  %v3532_v21 = vrot.slane %v3531_v9, 4  ;;  %v3820_v30 = vrot.slane %v6537_v0, 5  ;;  %v3546_v12 = vrot.slane %v3544_v18, 5  ;;  %v5633_v29 = vld [vmem:[#allocation17 + $0xa0] sm:$0xff]   ;;  %v5634_v9 = vld [vmem:[#allocation17 + $0xa8] sm:$0xff]  }
 0x65e   :  { %v3541_v19 = vor.u32 %v3540_v38, %v3536_v2  ;;  %v3823_v32 = vrot.slane %v3523_v34, 5  ;;  %v3570_v4 = vrot.slane %v3568_v62, 5  ;;  %v3561_v40 = vsel %vm6177_vm15, %v3556_v26, %v3560_v11  ;;  %v5630_v34 = vld [vmem:[#allocation17 + $0x88] sm:$0xff]   ;;  %v5635_v18 = vld [vmem:[#allocation17 + $0xb0] sm:$0xff]  }
 0x65f   :  { %v3565_v7 = vor.u32 %v3564_v23, %v3560_v11  ;;  %v3822_v37 = vrot.slane %v3820_v30, 4  ;;  %v3537_v10 = vsel %vm6177_vm15, %v3532_v21, %v3536_v2  ;;  %v6560_v36 = vsel %vm6141_vm14, %v4569_v13, %v3820_v30 }
 0x660   :  { %v3542_v31 = vrot.slane %v3541_v19, 4  ;;  %v3962_v42 = vrot.slane %v3538_v52, 5  ;;  %v3963_v48 = vrot.slane %v3534_v5, 6  ;;  %v3985_v51 = vrot.slane %v3562_v14, 5  ;;  %v5632_v52 = vld [vmem:[#allocation17 + $0x98] sm:$0xff]  }
 0x661   :  { %v3566_v33 = vrot.slane %v3565_v7, 4  ;;  %v6566_v17 = vsel %vm6141_vm14, %v3822_v37, %v3823_v32  ;;  %v3986_v15 = vrot.slane %v3558_v6, 6  ;;  %v3816_v60 = vrot.slane %v6541_v27, 5  ;;  %v5631_v27 = vld [vmem:[#allocation17 + $0x90] sm:$0xff]   ;;  %v6581_v6 = vld [vmem:[#allocation3 + $0x8] sm:$0x3] }
 0x662   :  { %v3547_v25 = vsel %vm6177_vm15, %v3542_v31, %v3546_v12  ;;  %v4571_v46 = vcombine.low %v6560_v36, %v6566_v17  ;;  %v6571_v56 = vor.u32 %v3963_v48, %v3962_v42  ;;  %v4568_v35 = vrot.slane %v3803_v47, 9  ;;  %v5636_v19 = vld [vmem:[#allocation17 + $0xb8] sm:$0xff]   ;;  %v5637_v31 = vld [vmem:[#allocation17 + $0xc0] sm:$0xff]   ;;  %v5639_v37 = vld [vmem:[#allocation17 + $0xd0] sm:$0xff]  }
 0x663   :  { %v4548_v39 = vcombine.low %v3537_v10, %v3547_v25  ;;  %v3571_v24 = vsel %vm6177_vm15, %v3566_v33, %v3570_v4  ;;  %v6573_v16 = vor.u32 %v3986_v15, %v3985_v51  ;;  %v3954_v22 = vshrl.u32 %v3803_v47, 16  ;;  %v5638_v33 = vld [vmem:[#allocation17 + $0xc8] sm:$0xff]   ;;  %v5640_v10 = vld [vmem:[#allocation17 + $0xd8] sm:$0xff]   ;;  %v5641_v25 = vld [vmem:[#allocation17 + $0xe0] sm:$0xff]  }
 0x664   :  { %v4549_v44 = vcombine.low %v3561_v40, %v3571_v24  ;;  %v3957_v14 = vshll.u32 %v3803_v47, 16  ;;  %v3968_v2 = vshrl.u32 %v6581_v6, 16  ;;  %v3971_v38 = vshll.u32 %v6581_v6, 16  ;;  %v6594_v40 = vld [vmem:[#allocation3 + $0x14] sm:$0x3] }
 0x665   :  { %5272 = vmatprep.mubr.bf16.mxu1 %v4548_v39  ;;  %v3956_v11 = vrot.slane %v3954_v22, 5  ;;  %v3966_v7 = vrot.slane %v6571_v56, 4  ;;  %v3977_v39 = vshrl.u32 %v6548_v50, 16  ;;  %v3980_v24 = vshll.u32 %v6548_v50, 16  ;;  %v5642_v36 = vld [vmem:[#allocation17 + $0xe8] sm:$0xff]  }
 0x666   :  { %5273 = vmatmul.mubr.bf16.vlgmr.msra.gmra.mrb[4].mxu1 %v4549_v44  ;;  %v3959_v23 = vrot.slane %v3957_v14, 6  ;;  %v3970_v62 = vrot.slane %v3968_v2, 5  ;;  %v3973_v21 = vrot.slane %v3971_v38, 6  ;;  %v3991_v17 = vshrl.u32 %v6594_v40, 16 }
 0x667   :  { %5277 = vmatpush3.bf16.msra.mxu1 %v6530_v28  ;;  %5292 = vmatprep.mubr.bf16.mxu1 %v5620_v49  ;;  %v3813_v28 = vrot.slane %v6539_v41, 5  ;;  %v3994_v42 = vshll.u32 %v6594_v40, 16  ;;  %v3979_v44 = vrot.slane %v3977_v39, 5  ;;  %v4133_v51 = vrot.slane %v6539_v41, 6 }
 0x668   :  { %5278 = vmatprep.subr.bf16.mxu1 %v5621_v43  ;;  %v3960_v26 = vor.u32 %v3959_v23, %v3956_v11  ;;  %v3974_v30 = vor.u32 %v3973_v21, %v3970_v62  ;;  %v3993_v49 = vrot.slane %v3991_v17, 5  ;;  %v3989_v50 = vrot.slane %v6573_v16, 4 }
 0x669   :  { %v3815_v45 = vrot.slane %v3813_v28, 4  ;;  %v3814_v59 = vsel %vm6141_vm14, %v4568_v35, %v3813_v28  ;;  %v3996_v48 = vrot.slane %v3994_v42, 6  ;;  %v5645_v28 = vld [vmem:[#allocation17 + $0x100] sm:$0xff]   ;;  %v5646_v35 = vld [vmem:[#allocation17 + $0x108] sm:$0xff]  }
 0x66a   :  { %v3961_v12 = vrot.slane %v3960_v26, 4  ;;  %v3975_v13 = vsel %vm6228_vm3, %v3966_v7, %v3974_v30 }
 0x66b   :  { %5279 = vmatpush3.bf16.msra.mxu1 %v5621_v43  ;;  %v3817_v3 = vsel %vm6141_vm14, %v3815_v45, %v3816_v60  ;;  %v3982_v43 = vrot.slane %v3980_v24, 6 }
 0x66c   :  { %5280 = vmatprep.subr.bf16.mxu1 %v5622_v61  ;;  %v4570_v5 = vcombine.low %v3814_v59, %v3817_v3  ;;  %v3965_v32 = vsel %vm6228_vm3, %v3961_v12, %v6571_v56  ;;  %v5644_v56 = vld [vmem:[#allocation17 + $0xf8] sm:$0xff]  }
 0x66d   :  { %v4580_v4 = vcombine.low %v3965_v32, %v3975_v13  ;;  %v3983_v15 = vor.u32 %v3982_v43, %v3979_v44  ;;  %v5648_v59 = vld [vmem:[#allocation17 + $0x118] sm:$0xff]  }
 0x66f   :  { %5281 = vmatpush3.bf16.msra.mxu1 %v5622_v61  ;;  %v3997_v61 = vor.u32 %v3996_v48, %v3993_v49 }
 0x670   :  { %5282 = vmatprep.subr.bf16.mxu1 %v5623_v20 }
 0x673   :  { %5283 = vmatpush3.bf16.msra.mxu1 %v5623_v20  ;;  %v4135_v20 = vrot.slane %v4133_v51, 4 }
 0x674   :  { %5284 = vmatprep.subr.bf16.mxu1 %v5624_v53 }
 0x677   :  { %5285 = vmatpush3.bf16.msra.mxu1 %v5624_v53  ;;  %v4136_v53 = vrot.slane %v6581_v6, 6  ;;  %v4126_v6 = vld [vmem:[#allocation3 + $0xc] sm:$0xc] }
 0x678   :  { %5286 = vmatprep.subr.bf16.mxu1 %v5625_v54 }
 0x679   :  { %v4137_v41 = vsel %vm6279_vm8, %v4135_v20, %v4136_v53 }
 0x67b   :  { %5287 = vmatpush3.bf16.msra.mxu1 %v5625_v54  ;;  %v3984_v54 = vrot.slane %v3983_v15, 4 }
 0x67c   :  { %5288 = vmatprep.subr.bf16.mxu1 %v5626_v55 }
 0x67d   :  { %v3988_v60 = vsel %vm6228_vm3, %v3984_v54, %v6573_v16  ;;  %v5651_v16 = vld [vmem:[#allocation17 + $0x130] sm:$0xff]  }
 0x67f   :  { %5289 = vmatpush3.bf16.msra.mxu1 %v5626_v55  ;;  %v4125_v55 = vld [vmem:[#allocation3] sm:$0xc] }
 0x680   :  { %5290 = vmatprep.subr.bf16.mxu1 %v5627_v57  ;;  %v4590_v45 = vrot.slane %v4125_v55, 10 }
 0x683   :  { %5291 = vmatpush3.bf16.msra.mxu1 %v5627_v57  ;;  %v3998_v57 = vsel %vm6228_vm3, %v3989_v50, %v3997_v61 }
 0x684   :  { %5296 = vmatprep.subr.bf16.mxu1 %v5629_v63  ;;  %v4581_v47 = vcombine.low %v3988_v60, %v3998_v57 }
 0x686   :  { %5293 = vmatmul.mubr.bf16.vlgmr.msra.gmra.mrb[4].mxu1 %v5628_v1  ;;  %v5647_v1 = vld [vmem:[#allocation17 + $0x110] sm:$0xff]  }
 0x687   :  { %5297 = vmatpush3.bf16.msra.mxu1 %v5629_v63  ;;  %5312 = vmatprep.mubr.bf16.mxu1 %v4570_v5  ;;  %v4134_v63 = vsel %vm6279_vm8, %v4590_v45, %v4133_v51  ;;  %v4140_v5 = vrot.slane %v6537_v0, 6  ;;  %v4602_v0 = vld [vmem:[#allocation18] ss:$0 sm:$0xff] }
 0x688   :  { %5298 = vmatprep.subr.bf16.mxu1 %v5630_v34  ;;  %v4592_v3 = vcombine.low %v4134_v63, %v4137_v41 }
 0x68b   :  { %5299 = vmatpush3.bf16.msra.mxu1 %v5630_v34  ;;  %v5649_v34 = vld [vmem:[#allocation17 + $0x120] sm:$0xff]  }
 0x68c   :  { %5300 = vmatprep.subr.bf16.mxu1 %v5631_v27 }
 0x68f   :  { %5301 = vmatpush3.bf16.msra.mxu1 %v5631_v27  ;;  %v5652_v27 = vld [vmem:[#allocation17 + $0x138] sm:$0xff]  }
 0x690   :  { %5302 = vmatprep.subr.bf16.mxu1 %v5632_v52 }
 0x693   :  { %5303 = vmatpush3.bf16.msra.mxu1 %v5632_v52  ;;  %v4142_v52 = vrot.slane %v4140_v5, 4 }
 0x694   :  { %5304 = vmatprep.subr.bf16.mxu1 %v5633_v29 }
 0x697   :  { %5305 = vmatpush3.bf16.msra.mxu1 %v5633_v29  ;;  %v4143_v29 = vrot.slane %v6594_v40, 6 }
 0x698   :  { %5306 = vmatprep.subr.bf16.mxu1 %v5634_v9 }
 0x699   :  { %v4144_v22 = vsel %vm6279_vm8, %v4142_v52, %v4143_v29 }
 0x69b   :  { %5307 = vmatpush3.bf16.msra.mxu1 %v5634_v9  ;;  %v4591_v9 = vrot.slane %v4126_v6, 10 }
 0x69c   :  { %5308 = vmatprep.subr.bf16.mxu1 %v5635_v18 }
 0x69d   :  { %v4141_v14 = vsel %vm6279_vm8, %v4591_v9, %v4140_v5 }
 0x69e   :  { %v4593_v2 = vcombine.low %v4141_v14, %v4144_v22 }
 0x69f   :  { %5309 = vmatpush3.bf16.msra.mxu1 %v5635_v18 }
 0x6a0   :  { %5310 = vmatprep.subr.bf16.mxu1 %v5636_v19 }
 0x6a3   :  { %5311 = vmatpush3.bf16.msra.mxu1 %v5636_v19 }
 0x6a4   :  { %5316 = vmatprep.subr.bf16.mxu1 %v5637_v31 }
 0x6a6   :  { %5313 = vmatmul.mubr.bf16.vlgmr.msra.gmra.mrb[4].mxu1 %v4571_v46  ;;  %v5643_v46 = vld [vmem:[#allocation17 + $0xf0] sm:$0xff]  }
 0x6a7   :  { %5317 = vmatpush3.bf16.msra.mxu1 %v5637_v31  ;;  %5332 = vmatprep.mubr.bf16.mxu1 %v4580_v4 }
 0x6a8   :  { %5318 = vmatprep.subr.bf16.mxu1 %v5638_v33 }
 0x6ab   :  { %5319 = vmatpush3.bf16.msra.mxu1 %v5638_v33 }
 0x6ac   :  { %5320 = vmatprep.subr.bf16.mxu1 %v5639_v37 }
 0x6af   :  { %5321 = vmatpush3.bf16.msra.mxu1 %v5639_v37 }
 0x6b0   :  { %5322 = vmatprep.subr.bf16.mxu1 %v5640_v10 }
 0x6b3   :  { %5323 = vmatpush3.bf16.msra.mxu1 %v5640_v10 }
 0x6b4   :  { %5324 = vmatprep.subr.bf16.mxu1 %v5641_v25 }
 0x6b7   :  { %5325 = vmatpush3.bf16.msra.mxu1 %v5641_v25 }
 0x6b8   :  { %5326 = vmatprep.subr.bf16.mxu1 %v5642_v36 }
 0x6bb   :  { %5327 = vmatpush3.bf16.msra.mxu1 %v5642_v36 }
 0x6bc   :  { %5328 = vmatprep.subr.bf16.mxu1 %v5643_v46 }
 0x6bf   :  { %5329 = vmatpush3.bf16.msra.mxu1 %v5643_v46 }
 0x6c0   :  { %5330 = vmatprep.subr.bf16.mxu1 %v5644_v56 }
 0x6c3   :  { %5331 = vmatpush3.bf16.msra.mxu1 %v5644_v56 }
 0x6c4   :  { %5336 = vmatprep.subr.bf16.mxu1 %v5645_v28 }
 0x6c6   :  { %5333 = vmatmul.mubr.bf16.vlgmr.msra.gmra.mrb[4].mxu1 %v4581_v47 }
 0x6c7   :  { %5337 = vmatpush3.bf16.msra.mxu1 %v5645_v28  ;;  %5352 = vmatprep.mubr.bf16.mxu1 %v4592_v3 }
 0x6c8   :  { %5338 = vmatprep.subr.bf16.mxu1 %v5646_v35 }
 0x6cb   :  { %5339 = vmatpush3.bf16.msra.mxu1 %v5646_v35 }
 0x6cc   :  { %5340 = vmatprep.subr.bf16.mxu1 %v5647_v1 }
 0x6cf   :  { %5341 = vmatpush3.bf16.msra.mxu1 %v5647_v1 }
 0x6d0   :  { %5342 = vmatprep.subr.bf16.mxu1 %v5648_v59 }
 0x6d3   :  { %5343 = vmatpush3.bf16.msra.mxu1 %v5648_v59 }
 0x6d4   :  { %5344 = vmatprep.subr.bf16.mxu1 %v5649_v34 }
 0x6d7   :  { %5345 = vmatpush3.bf16.msra.mxu1 %v5649_v34 }
 0x6d8   :  { %5346 = vmatprep.subr.bf16.mxu1 %v5650_v58 }
 0x6db   :  { %5347 = vmatpush3.bf16.msra.mxu1 %v5650_v58 }
 0x6dc   :  { %5348 = vmatprep.subr.bf16.mxu1 %v5651_v16 }
 0x6df   :  { %5349 = vmatpush3.bf16.msra.mxu1 %v5651_v16 }
 0x6e0   :  { %5350 = vmatprep.subr.bf16.mxu1 %v5652_v27 }
 0x6e3   :  { %5351 = vmatpush3.bf16.msra.mxu1 %v5652_v27 }
 0x6e6   :  { %5353 = vmatmul.mubr.bf16.vlgmr.msra.gmra.mrb[4].mxu1 %v4593_v2 }
 0x7b9   :  { %v5354_v38 = vpop.f32.mrb[4].mxu1 }
 0x7ba   :  { %v4280_v18 = vadd.f32 %v5354_v38, %v4602_v0  ;;  %v4252_v11 = vpop.f32.mrb[5].mxu1 }
 0x7bb   :  { %v4278_v23 = vadd.f32 %v4602_v0, %v4252_v11  ;;  %v5355_v62 = vpop.f32.mrb[6].mxu1 }
 0x7bc   :  { %v4284_v21 = vmax.f32 %v4280_v18, 0.0  ;;  %v4281_v19 = vadd.f32 %v5355_v62, %v4602_v0  ;;  %v4255_v26 = vpop.f32.mrb[7].mxu1 }
 0x7bd   :  { %v4282_v7 = vmax.f32 %v4278_v23, 0.0  ;;  %v4279_v30 = vadd.f32 %v4602_v0, %v4255_v26 }
 0x7be   :  { %v4625_v31 = vpack.c.bf16 %v4284_v21, %v4284_v21  ;;  %v4285_v12 = vmax.f32 %v4281_v19, 0.0 }
 0x7bf   :  { %v4623_v13 = vpack.c.bf16 %v4282_v7, %v4282_v7  ;;  %v4283_v32 = vmax.f32 %v4279_v30, 0.0 }
 0x7c0   :  { %4305 = vst.msk [vmem:[%s6641_s11 + $0x8] sm:$0xf] %vm4302_vm9, %v4625_v31  ;;  %v4626_v8 = vpack.c.bf16 %v4285_v12, %v4285_v12 }
 0x7c1   :  { %4303 = vst.msk [vmem:[%s6641_s11] sm:$0xf] %vm4302_vm9, %v4623_v13  ;;  %v4624_v33 = vpack.c.bf16 %v4283_v32, %v4283_v32 }
 0x7c2   :  { %4306 = vst.msk [vmem:[%s6641_s11 + $0xc] sm:$0xf] %vm4302_vm9, %v4626_v8 }
 0x7c3   :  { %4304 = vst.msk [vmem:[%s6641_s11 + $0x4] sm:$0xf] %vm4302_vm9, %v4624_v33 }
 0x7c4   :  { %4311 = vsyncpa [#allocation5], 1 }
 0x7c5   :  { %4312 = vsyncpa [#allocation7], 1 }
 0x7c6   :  { %4313 = vsyncpa [#allocation10], 1 }
 0x7c7   :  { %4314 = vsyncpa [#allocation13], 1 }
 0x7c8   :  { %4315 = vsyncpa [#allocation16], 1 }
 0x7c9   :  { %4316 = vsyncpa [#allocation19], 1 }

</bundles_post_ra>
